<compile_context>
chip_gen: v7x
topology: tpu7x:2x2x1
jax: 0.10.0
libtpu: 0.0.40
codegen_flags: <defaults>
</compile_context>

<pallas_src>
import functools

import numpy as np
import jax
import jax.numpy as jnp
from jax import lax
from jax.experimental import pallas as pl
from jax.experimental.pallas import tpu as pltpu


EXPANSION = 4
BN_EPS = 1e-5

_TM_CANDIDATES = (1024, 512, 256)          # row tiles for the 1x1 matmuls


# ----------------------------- small helpers --------------------------------

def _round_up(x, m):
    return (x + m - 1) // m * m


def _dtype_bytes(dt):
    return jnp.dtype(dt).itemsize


@functools.lru_cache(maxsize=None)
def _num_tensorcores():
    """Best-effort TensorCores-per-device (2 on v4/v5p/v7x style parts)."""
    try:
        kind = jax.devices()[0].device_kind.lower()
    except Exception:
        return 1
    if "lite" in kind or "v5e" in kind or "v6" in kind:
        return 1
    if "v4" in kind or "v5p" in kind or "v7" in kind or "7x" in kind:
        return 2
    return 1


@functools.lru_cache(maxsize=None)
def _vmem_budget_bytes():
    """Scoped-VMEM budget: ~3/4 of physical, capped at 96 MiB (conservative fallback 48 MiB)."""
    cap = 0
    try:
        cap = int(getattr(pltpu.get_tpu_info(), "vmem_capacity_bytes", 0) or 0)
    except Exception:
        cap = 0
    if cap <= 0:
        cap = 64 * 1024 * 1024            # v7x-per-core sized fallback
    return int(min(cap * 3 // 4, 96 * 1024 * 1024))


def _choose_tm(m, per_row_bytes, vmem_avail):
    """Row-tile chooser: big tiles, never below 256, >=2 blocks only on 2-TC chips."""
    min_blocks = 2 if _num_tensorcores() >= 2 else 1
    if m <= _TM_CANDIDATES[-1]:
        return max(8, _round_up(m, 8))    # single full-extent row block
    fitting = [t for t in _TM_CANDIDATES if t * per_row_bytes <= vmem_avail]
    if not fitting:
        fitting = [_TM_CANDIDATES[-1]]

    def score(t):
        m_pad = _round_up(m, t)
        return (m_pad // t < min_blocks, m_pad, -t)
    return min(fitting, key=score)


def fold_bn(gamma, beta, mean, var, eps=BN_EPS):
    scale = gamma / jnp.sqrt(var + eps)
    bias = beta - mean * scale
    return scale, bias


# --------------------- fused 1x1 conv (+BN, +res, +ReLU) --------------------

def _pointwise_kernel(*refs, relu, res_mode):
    """o = act(x @ w + b [+ r | + xs @ wd + bd]); f32 acc, weights VMEM-resident."""
    if res_mode == 0:
        x_ref, w_ref, b_ref, o_ref = refs
        r_ref = xs_ref = wd_ref = bd_ref = None
    elif res_mode == 1:
        x_ref, w_ref, b_ref, r_ref, o_ref = refs
        xs_ref = wd_ref = bd_ref = None
    else:
        x_ref, w_ref, b_ref, xs_ref, wd_ref, bd_ref, o_ref = refs
        r_ref = None

    acc = jnp.dot(x_ref[...], w_ref[...], preferred_element_type=jnp.float32)
    acc = acc + b_ref[...]
    if res_mode == 1:
        acc = acc + r_ref[...].astype(jnp.float32)          # identity skip in f32
    elif res_mode == 2:
        acc = acc + jnp.dot(xs_ref[...], wd_ref[...],
                            preferred_element_type=jnp.float32)
        acc = acc + bd_ref[...]
    if relu:
        acc = jnp.maximum(acc, 0.0)
    o_ref[...] = acc.astype(o_ref.dtype)


def fused_pointwise(x, w, scale, bias, *, relu, residual=None, downsample=None,
                    out_dtype=jnp.float32):
    """1x1-conv-as-matmul with folded BN, fused bias / residual / downsample / ReLU.

    x: (M, K); w: (K, N); scale/bias: (N,).  residual: (M, N) identity skip
    (added in f32).  downsample: (xs, wd, scale_d, bias_d) -> second matmul
    fused into the same kernel.  The full weight is VMEM-resident, so the grid
    has only a row axis and every activation byte is streamed exactly once.
    """
    m, k = x.shape
    n = w.shape[1]
    assert residual is None or downsample is None

    x_b = x.astype(jnp.bfloat16)
    w_s = (w * scale[None, :]).astype(jnp.bfloat16)
    b_f = bias.astype(jnp.float32).reshape(1, n)

    out_b = _dtype_bytes(out_dtype)
    per_row = 2 * (k * 2) + 2 * (n * out_b) + n * 4
    weight_bytes = 2 * (k * n * 2)

    r_f = None
    xs_b = wd_s = bd_f = None
    kd = 0
    if residual is not None:
        r_f = residual.astype(jnp.float32)
        per_row += 2 * (n * 4)
    if downsample is not None:
        xs, wd, sd, bd = downsample
        kd = wd.shape[0]
        xs_b = xs.astype(jnp.bfloat16)
        wd_s = (wd * sd[None, :]).astype(jnp.bfloat16)
        bd_f = bd.astype(jnp.float32).reshape(1, n)
        per_row += 2 * (kd * 2)
        weight_bytes += 2 * (kd * n * 2)

    budget = _vmem_budget_bytes()
    tm = _choose_tm(m, per_row, int(budget * 0.7) - weight_bytes)
    m_pad = _round_up(m, tm)
    if m_pad != m:
        x_b = jnp.pad(x_b, ((0, m_pad - m), (0, 0)))
        if r_f is not None:
            r_f = jnp.pad(r_f, ((0, m_pad - m), (0, 0)))
        if xs_b is not None:
            xs_b = jnp.pad(xs_b, ((0, m_pad - m), (0, 0)))

    in_specs = [pl.BlockSpec((tm, k), lambda i: (i, 0)),
                pl.BlockSpec((k, n), lambda i: (0, 0)),      # resident weight
                pl.BlockSpec((1, n), lambda i: (0, 0))]
    args = [x_b, w_s, b_f]
    res_mode = 0
    if r_f is not None:
        in_specs.append(pl.BlockSpec((tm, n), lambda i: (i, 0)))
        args.append(r_f)
        res_mode = 1
    elif xs_b is not None:
        in_specs += [pl.BlockSpec((tm, kd), lambda i: (i, 0)),
                     pl.BlockSpec((kd, n), lambda i: (0, 0)),  # resident ds weight
                     pl.BlockSpec((1, n), lambda i: (0, 0))]
        args += [xs_b, wd_s, bd_f]
        res_mode = 2

    out = pl.pallas_call(
        functools.partial(_pointwise_kernel, relu=relu, res_mode=res_mode),
        out_shape=jax.ShapeDtypeStruct((m_pad, n), out_dtype),
        grid_spec=pltpu.PrefetchScalarGridSpec(
            num_scalar_prefetch=0,
            grid=(m_pad // tm,),
            in_specs=in_specs,
            out_specs=pl.BlockSpec((tm, n), lambda i: (i, 0))),
        compiler_params=pltpu.CompilerParams(
            dimension_semantics=("parallel",),
            vmem_limit_bytes=budget),
    )(*args)
    return out[:m] if m_pad != m else out


# ------------------- fused 3x3 conv (+BN, +ReLU), no im2col ------------------

def _conv3x3_kernel(x_ref, w_ref, b_ref, o_ref, acc_ref, *, s, ho, wo8):
    """Accumulate the 9 conv taps in-kernel on the MXU (f32 VMEM accumulator)."""
    bn = o_ref.shape[0]
    cout = o_ref.shape[-1]
    c = x_ref.shape[-1]
    rows = bn * ho * wo8

    acc_ref[...] = jnp.zeros_like(acc_ref)
    for ph in range(s):                               # stride-phase planes
        for pw in range(s):
            plane = x_ref[ph * s + pw]                # (bn, hq, wq, c)
            for kh in range(ph, 3, s):
                oh = kh // s
                for kw in range(pw, 3, s):
                    ow = kw // s
                    win = plane[:, oh:oh + ho, ow:ow + wo8, :]
                    acc_ref[...] += jnp.dot(win.reshape(rows, c),
                                            w_ref[kh * 3 + kw],
                                            preferred_element_type=jnp.float32)
    out = jnp.maximum(acc_ref[...] + b_ref[...], 0.0)
    o_ref[...] = out.reshape(bn, ho, wo8, cout).astype(o_ref.dtype)


def fused_conv3x3(y, w_oihw, scale, bias, stride, *, out_dtype=jnp.bfloat16):
    """3x3 conv (pad=1, stride) + folded BN + ReLU without an HBM im2col.

    The padded NHWC activation is split into s*s stride-phase planes (~1x the
    activation bytes) so every tap inside the kernel is a contiguous window.
    Returns (n, ho, wo8, cout) bf16; columns >= wo hold padding garbage that
    the caller keeps (and slices away only at the very end of the block).
    """
    n, h, w, c = y.shape
    cout = w_oihw.shape[0]
    s = int(stride)
    ho = (h - 1) // s + 1
    wo = (w - 1) // s + 1
    wo8 = _round_up(wo, 8)
    off = 2 // s                                       # max intra-phase window offset
    hq, wq = ho + off, wo8 + off
    Hp, Wp = hq * s, wq * s

    xp = jnp.pad(y.astype(jnp.bfloat16),
                 ((0, 0), (1, Hp - h - 1), (1, Wp - w - 1), (0, 0)))
    xph = (xp.reshape(n, hq, s, wq, s, c)
             .transpose(2, 4, 0, 1, 3, 5)
             .reshape(s * s, n, hq, wq, c))            # stride-phase planes
    wk = jnp.transpose(w_oihw, (2, 3, 1, 0)) * scale[None, None, None, :]
    wk = wk.astype(jnp.bfloat16).reshape(9, c, cout)
    b_f = bias.astype(jnp.float32).reshape(1, cout)

    budget = _vmem_budget_bytes()
    rows_img = ho * wo8
    per_img = (2 * (s * s * hq * wq * c * 2)
               + 2 * (rows_img * cout * _dtype_bytes(out_dtype))
               + rows_img * cout * 4)
    fixed = 2 * (9 * c * cout * 2)
    avail = max(int(budget * 0.7) - fixed, per_img)
    bn = max(1, min(n, avail // per_img, max(1, 1024 // rows_img)))
    if _num_tensorcores() >= 2 and n >= 2:
        bn = max(1, min(bn, n // 2))                   # >=2 grid blocks on megacore parts
    n_pad = _round_up(n, bn)
    if n_pad != n:
        xph = jnp.pad(xph, ((0, 0), (0, n_pad - n), (0, 0), (0, 0), (0, 0)))

    out = pl.pallas_call(
        functools.partial(_conv3x3_kernel, s=s, ho=ho, wo8=wo8),
        out_shape=jax.ShapeDtypeStruct((n_pad, ho, wo8, cout), out_dtype),
        grid_spec=pltpu.PrefetchScalarGridSpec(
            num_scalar_prefetch=0,
            grid=(n_pad // bn,),
            in_specs=[pl.BlockSpec((s * s, bn, hq, wq, c),
                                   lambda i: (0, i, 0, 0, 0)),
                      pl.BlockSpec((9, c, cout), lambda i: (0, 0, 0)),   # resident
                      pl.BlockSpec((1, cout), lambda i: (0, 0))],
            out_specs=pl.BlockSpec((bn, ho, wo8, cout), lambda i: (i, 0, 0, 0)),
            scratch_shapes=[pltpu.VMEM((bn * ho * wo8, cout), jnp.float32)]),
        compiler_params=pltpu.CompilerParams(
            dimension_semantics=("parallel",),
            vmem_limit_bytes=budget),
    )(xph, wk, b_f)
    return out[:n]


# ------------------------------- parameters ---------------------------------

def init_params(key, in_channels, channels, stride):
    e = EXPANSION * channels
    keys = jax.random.split(key, 8)

    def conv_w(k, cout, cin, kh, kw):                  # PyTorch OIHW layout
        return 0.1 * jax.random.normal(k, (cout, cin, kh, kw), jnp.float32)

    def bn_p(k, c):
        k1, k2, k3, k4 = jax.random.split(k, 4)
        gamma = 1.0 + 0.1 * jax.random.normal(k1, (c,), jnp.float32)
        beta = 0.1 * jax.random.normal(k2, (c,), jnp.float32)
        mean = 0.1 * jax.random.normal(k3, (c,), jnp.float32)
        var = 1.0 + 0.1 * jax.random.uniform(k4, (c,), jnp.float32)
        return (gamma, beta, mean, var)

    params = {
        "w1": conv_w(keys[0], channels, in_channels, 1, 1),
        "bn1": bn_p(keys[1], channels),
        "w2": conv_w(keys[2], channels, channels, 3, 3),
        "bn2": bn_p(keys[3], channels),
        "w3": conv_w(keys[4], e, channels, 1, 1),
        "bn3": bn_p(keys[5], e),
    }
    if stride != 1 or in_channels != e:
        params["wd"] = conv_w(keys[6], e, in_channels, 1, 1)
        params["bnd"] = bn_p(keys[7], e)
    return params


# ------------------------------ forward pass ---------------------------------

def bottleneck_forward(x_nchw, params, stride):
    x = jnp.transpose(x_nchw, (0, 2, 3, 1))            # NCHW -> NHWC (lanes = C)
    n, h, w, cin = x.shape
    c = params["w1"].shape[0]
    e = params["w3"].shape[0]
    s = int(stride)
    ho = (h - 1) // s + 1
    wo = (w - 1) // s + 1
    wo8 = _round_up(wo, 8)

    # conv1 (1x1) + bn1 + relu — weight-resident single-pass matmul, bf16 out.
    w1 = jnp.transpose(params["w1"][:, :, 0, 0], (1, 0))
    s1, b1 = fold_bn(*params["bn1"])
    y1 = fused_pointwise(x.reshape(n * h * w, cin), w1, s1, b1,
                         relu=True, out_dtype=jnp.bfloat16).reshape(n, h, w, c)

    # conv2 (3x3, stride, pad=1) + bn2 + relu — 9 taps accumulated in-kernel.
    s2, b2 = fold_bn(*params["bn2"])
    y2 = fused_conv3x3(y1, params["w2"], s2, b2, s, out_dtype=jnp.bfloat16)
    y2_flat = y2.reshape(n * ho * wo8, c)

    # conv3 (1x1) + bn3 + residual + relu — downsample matmul fused in-kernel.
    w3 = jnp.transpose(params["w3"][:, :, 0, 0], (1, 0))
    s3, b3 = fold_bn(*params["bn3"])
    if "wd" in params:
        # TODO(synk): this stride-s subsample is still a JAX-level strided slice.
        xs = x[:, ::s, ::s, :]                          # (n, ho, wo, cin)
        if wo8 != wo:
            xs = jnp.pad(xs, ((0, 0), (0, 0), (0, wo8 - wo), (0, 0)))
        wd = jnp.transpose(params["wd"][:, :, 0, 0], (1, 0))
        sd, bd = fold_bn(*params["bnd"])
        y = fused_pointwise(y2_flat, w3, s3, b3, relu=True,
                            downsample=(xs.reshape(n * ho * wo8, cin), wd, sd, bd),
                            out_dtype=x_nchw.dtype)
    else:
        res = x if wo8 == wo else jnp.pad(x, ((0, 0), (0, 0), (0, wo8 - wo), (0, 0)))
        y = fused_pointwise(y2_flat, w3, s3, b3, relu=True,
                            residual=res.reshape(n * ho * wo8, e),
                            out_dtype=x_nchw.dtype)

    y = y.reshape(n, ho, wo8, e)[:, :, :wo, :]
    return jnp.transpose(y, (0, 3, 1, 2))               # back to NCHW


# --------------------------- plain-JAX reference -----------------------------

def reference_forward(x, params, stride):
    def conv(x, w, s, padding):
        return lax.conv_general_dilated(
            x, w, (s, s), padding, dimension_numbers=("NCHW", "OIHW", "NCHW"))

    def bn(x, p):
        gamma, beta, mean, var = p
        scale = gamma / jnp.sqrt(var + BN_EPS)
        bias = beta - mean * scale
        return x * scale[None, :, None, None] + bias[None, :, None, None]

    out = jax.nn.relu(bn(conv(x, params["w1"], 1, "VALID"), params["bn1"]))
    out = jax.nn.relu(bn(conv(out, params["w2"], stride, [(1, 1), (1, 1)]), params["bn2"]))
    out = bn(conv(out, params["w3"], 1, "VALID"), params["bn3"])
    if "wd" in params:
        x = bn(conv(x, params["wd"], stride, "VALID"), params["bnd"])
    return jax.nn.relu(out + x)


# ----------------------------------- main ------------------------------------

if __name__ == "__main__":
    key = jax.random.PRNGKey(0)
    kx, kp = jax.random.split(key)

    in_channels, channels, stride = 8, 4, 2    # expansion*channels = 16 -> downsample active
    x = jax.random.normal(kx, (2, in_channels, 16, 16), jnp.float32)
    params = init_params(kp, in_channels, channels, stride)

    fwd = jax.jit(bottleneck_forward, static_argnums=2)
    y = jax.block_until_ready(fwd(x, params, stride))

    y_ref = reference_forward(x, params, stride)
    assert y.shape == y_ref.shape, (y.shape, y_ref.shape)
    # bf16 MXU operands (f32 accumulation) vs a pure-f32 XLA reference.
    if not np.allclose(np.asarray(y), np.asarray(y_ref), atol=3e-2, rtol=3e-2):
        err = float(np.max(np.abs(np.asarray(y) - np.asarray(y_ref))))
        raise AssertionError(
            f"Pallas bottleneck output mismatch vs JAX reference (max abs err {err})")

    print("KERNEL_OK")
</pallas_src>

<mosaic_0001>
module attributes {stable_mosaic.version = 11 : i64} {
  func.func @_pointwise_kernel(%arg0: i32, %arg1: memref<512x8xbf16, #tpu.memory_space<vmem>>, %arg2: memref<8x4xbf16, #tpu.memory_space<vmem>>, %arg3: memref<1x4xf32, #tpu.memory_space<vmem>>, %arg4: memref<512x4xbf16, #tpu.memory_space<vmem>>) attributes {dimension_semantics = [#tpu.dimension_semantics<parallel>], iteration_bounds = array<i64: 1>, scalar_prefetch = 0 : i64, scratch_operands = 0 : i64, tpu.core_type = #tpu.core_type<tc>, window_params = [{transform_indices = @transform_0, window_bounds = array<i64: 512, 8>}, {pipeline_mode = #tpu.pipeline_mode<synchronous>, transform_indices = @transform_1, window_bounds = array<i64: 8, 4>}, {pipeline_mode = #tpu.pipeline_mode<synchronous>, transform_indices = @transform_2, window_bounds = array<i64: 1, 4>}, {transform_indices = @transform_3, window_bounds = array<i64: 512, 4>}]} {
    %c0 = arith.constant 0 : index
    %c0_0 = arith.constant 0 : index
    %0 = vector.load %arg1[%c0, %c0_0] : memref<512x8xbf16, #tpu.memory_space<vmem>>, vector<512x8xbf16>
    %c0_1 = arith.constant 0 : index
    %c0_2 = arith.constant 0 : index
    %1 = vector.load %arg2[%c0_1, %c0_2] : memref<8x4xbf16, #tpu.memory_space<vmem>>, vector<8x4xbf16>
    %cst = arith.constant dense<0.000000e+00> : vector<512x4xf32>
    %2 = tpu.matmul %0, %1, %cst {dimension_numbers = #tpu.dot_dimension_numbers<[1], [0], [0], [1], [0, 0, 1, 1], [], []>} : vector<512x8xbf16>, vector<8x4xbf16>, vector<512x4xf32> -> vector<512x4xf32>
    %c0_3 = arith.constant 0 : index
    %c0_4 = arith.constant 0 : index
    %3 = vector.load %arg3[%c0_3, %c0_4] : memref<1x4xf32, #tpu.memory_space<vmem>>, vector<1x4xf32>
    %4 = vector.broadcast %3 : vector<1x4xf32> to vector<512x4xf32>
    %5 = arith.addf %2, %4 : vector<512x4xf32>
    %cst_5 = arith.constant 0.000000e+00 : f32
    %6 = vector.broadcast %cst_5 : f32 to vector<512x4xf32>
    %7 = arith.maximumf %5, %6 : vector<512x4xf32>
    %8 = arith.truncf %7 : vector<512x4xf32> to vector<512x4xbf16>
    %c0_6 = arith.constant 0 : index
    %c0_7 = arith.constant 0 : index
    %9 = vector.load %arg4[%c0_6, %c0_7] : memref<512x4xbf16, #tpu.memory_space<vmem>>, vector<512x4xbf16>
    tpu.vector_store %arg4[%c0_6, %c0_7], %8 {strides = array<i32>} : memref<512x4xbf16, #tpu.memory_space<vmem>>, vector<512x4xbf16>,
    return
  }
  func.func @transform_0(%arg0: i32) -> (i32, i32) {
    %c0_i32 = arith.constant 0 : i32
    %c0_i32_0 = arith.constant 0 : i32
    return %arg0, %c0_i32 : i32, i32
  }
  func.func @transform_1(%arg0: i32) -> (i32, i32) {
    %c0_i32 = arith.constant 0 : i32
    %c0_i32_0 = arith.constant 0 : i32
    %c0_i32_1 = arith.constant 0 : i32
    return %c0_i32, %c0_i32_0 : i32, i32
  }
  func.func @transform_2(%arg0: i32) -> (i32, i32) {
    %c0_i32 = arith.constant 0 : i32
    %c0_i32_0 = arith.constant 0 : i32
    %c0_i32_1 = arith.constant 0 : i32
    return %c0_i32, %c0_i32_0 : i32, i32
  }
  func.func @transform_3(%arg0: i32) -> (i32, i32) {
    %c0_i32 = arith.constant 0 : i32
    %c0_i32_0 = arith.constant 0 : i32
    return %arg0, %c0_i32 : i32, i32
  }
}

module attributes {stable_mosaic.version = 11 : i64} {
  func.func @_pointwise_kernel(%arg0: i32, %arg1: memref<128x4xbf16, #tpu.memory_space<vmem>>, %arg2: memref<4x16xbf16, #tpu.memory_space<vmem>>, %arg3: memref<1x16xf32, #tpu.memory_space<vmem>>, %arg4: memref<128x8xbf16, #tpu.memory_space<vmem>>, %arg5: memref<8x16xbf16, #tpu.memory_space<vmem>>, %arg6: memref<1x16xf32, #tpu.memory_space<vmem>>, %arg7: memref<128x16xf32, #tpu.memory_space<vmem>>) attributes {dimension_semantics = [#tpu.dimension_semantics<parallel>], iteration_bounds = array<i64: 1>, scalar_prefetch = 0 : i64, scratch_operands = 0 : i64, tpu.core_type = #tpu.core_type<tc>, window_params = [{transform_indices = @transform_0, window_bounds = array<i64: 128, 4>}, {pipeline_mode = #tpu.pipeline_mode<synchronous>, transform_indices = @transform_1, window_bounds = array<i64: 4, 16>}, {pipeline_mode = #tpu.pipeline_mode<synchronous>, transform_indices = @transform_2, window_bounds = array<i64: 1, 16>}, {transform_indices = @transform_3, window_bounds = array<i64: 128, 8>}, {pipeline_mode = #tpu.pipeline_mode<synchronous>, transform_indices = @transform_4, window_bounds = array<i64: 8, 16>}, {pipeline_mode = #tpu.pipeline_mode<synchronous>, transform_indices = @transform_5, window_bounds = array<i64: 1, 16>}, {transform_indices = @transform_6, window_bounds = array<i64: 128, 16>}]} {
    %c0 = arith.constant 0 : index
    %c0_0 = arith.constant 0 : index
    %0 = vector.load %arg1[%c0, %c0_0] : memref<128x4xbf16, #tpu.memory_space<vmem>>, vector<128x4xbf16>
    %c0_1 = arith.constant 0 : index
    %c0_2 = arith.constant 0 : index
    %1 = vector.load %arg2[%c0_1, %c0_2] : memref<4x16xbf16, #tpu.memory_space<vmem>>, vector<4x16xbf16>
    %cst = arith.constant dense<0.000000e+00> : vector<128x16xf32>
    %2 = tpu.matmul %0, %1, %cst {dimension_numbers = #tpu.dot_dimension_numbers<[1], [0], [0], [1], [0, 0, 1, 1], [], []>} : vector<128x4xbf16>, vector<4x16xbf16>, vector<128x16xf32> -> vector<128x16xf32>
    %c0_3 = arith.constant 0 : index
    %c0_4 = arith.constant 0 : index
    %3 = vector.load %arg3[%c0_3, %c0_4] : memref<1x16xf32, #tpu.memory_space<vmem>>, vector<1x16xf32>
    %4 = vector.broadcast %3 : vector<1x16xf32> to vector<128x16xf32>
    %5 = arith.addf %2, %4 : vector<128x16xf32>
    %c0_5 = arith.constant 0 : index
    %c0_6 = arith.constant 0 : index
    %6 = vector.load %arg4[%c0_5, %c0_6] : memref<128x8xbf16, #tpu.memory_space<vmem>>, vector<128x8xbf16>
    %c0_7 = arith.constant 0 : index
    %c0_8 = arith.constant 0 : index
    %7 = vector.load %arg5[%c0_7, %c0_8] : memref<8x16xbf16, #tpu.memory_space<vmem>>, vector<8x16xbf16>
    %cst_9 = arith.constant dense<0.000000e+00> : vector<128x16xf32>
    %8 = tpu.matmul %6, %7, %cst_9 {dimension_numbers = #tpu.dot_dimension_numbers<[1], [0], [0], [1], [0, 0, 1, 1], [], []>} : vector<128x8xbf16>, vector<8x16xbf16>, vector<128x16xf32> -> vector<128x16xf32>
    %9 = arith.addf %5, %8 : vector<128x16xf32>
    %c0_10 = arith.constant 0 : index
    %c0_11 = arith.constant 0 : index
    %10 = vector.load %arg6[%c0_10, %c0_11] : memref<1x16xf32, #tpu.memory_space<vmem>>, vector<1x16xf32>
    %11 = vector.broadcast %10 : vector<1x16xf32> to vector<128x16xf32>
    %12 = arith.addf %9, %11 : vector<128x16xf32>
    %cst_12 = arith.constant 0.000000e+00 : f32
    %13 = vector.broadcast %cst_12 : f32 to vector<128x16xf32>
    %14 = arith.maximumf %12, %13 : vector<128x16xf32>
    %c0_13 = arith.constant 0 : index
    %c0_14 = arith.constant 0 : index
    %15 = vector.load %arg7[%c0_13, %c0_14] : memref<128x16xf32, #tpu.memory_space<vmem>>, vector<128x16xf32>
    tpu.vector_store %arg7[%c0_13, %c0_14], %14 {strides = array<i32>} : memref<128x16xf32, #tpu.memory_space<vmem>>, vector<128x16xf32>,
    return
  }
  func.func @transform_0(%arg0: i32) -> (i32, i32) {
    %c0_i32 = arith.constant 0 : i32
    %c0_i32_0 = arith.constant 0 : i32
    return %arg0, %c0_i32 : i32, i32
  }
  func.func @transform_1(%arg0: i32) -> (i32, i32) {
    %c0_i32 = arith.constant 0 : i32
    %c0_i32_0 = arith.constant 0 : i32
    %c0_i32_1 = arith.constant 0 : i32
    return %c0_i32, %c0_i32_0 : i32, i32
  }
  func.func @transform_2(%arg0: i32) -> (i32, i32) {
    %c0_i32 = arith.constant 0 : i32
    %c0_i32_0 = arith.constant 0 : i32
    %c0_i32_1 = arith.constant 0 : i32
    return %c0_i32, %c0_i32_0 : i32, i32
  }
  func.func @transform_3(%arg0: i32) -> (i32, i32) {
    %c0_i32 = arith.constant 0 : i32
    %c0_i32_0 = arith.constant 0 : i32
    return %arg0, %c0_i32 : i32, i32
  }
  func.func @transform_4(%arg0: i32) -> (i32, i32) {
    %c0_i32 = arith.constant 0 : i32
    %c0_i32_0 = arith.constant 0 : i32
    %c0_i32_1 = arith.constant 0 : i32
    return %c0_i32, %c0_i32_0 : i32, i32
  }
  func.func @transform_5(%arg0: i32) -> (i32, i32) {
    %c0_i32 = arith.constant 0 : i32
    %c0_i32_0 = arith.constant 0 : i32
    %c0_i32_1 = arith.constant 0 : i32
    return %c0_i32, %c0_i32_0 : i32, i32
  }
  func.func @transform_6(%arg0: i32) -> (i32, i32) {
    %c0_i32 = arith.constant 0 : i32
    %c0_i32_0 = arith.constant 0 : i32
    return %arg0, %c0_i32 : i32, i32
  }
}

module attributes {stable_mosaic.version = 11 : i64} {
  func.func @_conv3x3_kernel(%arg0: i32, %arg1: memref<4x2x9x9x4xbf16, #tpu.memory_space<vmem>>, %arg2: memref<9x4x4xbf16, #tpu.memory_space<vmem>>, %arg3: memref<1x4xf32, #tpu.memory_space<vmem>>, %arg4: memref<2x8x8x4xbf16, #tpu.memory_space<vmem>>, %arg5: memref<128x4xf32, #tpu.memory_space<vmem>>) attributes {dimension_semantics = [#tpu.dimension_semantics<parallel>], iteration_bounds = array<i64: 1>, scalar_prefetch = 0 : i64, scratch_operands = 1 : i64, tpu.core_type = #tpu.core_type<tc>, window_params = [{transform_indices = @transform_0, window_bounds = array<i64: 4, 2, 9, 9, 4>}, {pipeline_mode = #tpu.pipeline_mode<synchronous>, transform_indices = @transform_1, window_bounds = array<i64: 9, 4, 4>}, {pipeline_mode = #tpu.pipeline_mode<synchronous>, transform_indices = @transform_2, window_bounds = array<i64: 1, 4>}, {transform_indices = @transform_3, window_bounds = array<i64: 2, 8, 8, 4>}]} {
    %cst = arith.constant 0.000000e+00 : f32
    %0 = vector.broadcast %cst : f32 to vector<128x4xf32>
    %c0 = arith.constant 0 : index
    %c0_0 = arith.constant 0 : index
    %1 = vector.load %arg5[%c0, %c0_0] : memref<128x4xf32, #tpu.memory_space<vmem>>, vector<128x4xf32>
    tpu.vector_store %arg5[%c0, %c0_0], %0 {strides = array<i32>} : memref<128x4xf32, #tpu.memory_space<vmem>>, vector<128x4xf32>,
    %c0_1 = arith.constant 0 : index
    %c0_2 = arith.constant 0 : index
    %c0_3 = arith.constant 0 : index
    %c0_4 = arith.constant 0 : index
    %c0_5 = arith.constant 0 : index
    %2 = vector.load %arg1[%c0_1, %c0_2, %c0_3, %c0_4, %c0_5] : memref<4x2x9x9x4xbf16, #tpu.memory_space<vmem>>, vector<1x2x9x9x4xbf16>
    %3 = vector.shape_cast %2 : vector<1x2x9x9x4xbf16> to vector<2x9x9x4xbf16>
    %4 = vector.extract_strided_slice %3 {offsets = [0, 0, 0, 0], sizes = [2, 8, 8, 4], strides = [1, 1, 1, 1]} : vector<2x9x9x4xbf16> to vector<2x8x8x4xbf16>
    %c0_6 = arith.constant 0 : index
    %c0_7 = arith.constant 0 : index
    %5 = vector.load %arg5[%c0_6, %c0_7] : memref<128x4xf32, #tpu.memory_space<vmem>>, vector<128x4xf32>
    %6 = vector.shape_cast %4 : vector<2x8x8x4xbf16> to vector<128x4xbf16>
    %c0_8 = arith.constant 0 : index
    %c0_9 = arith.constant 0 : index
    %c0_10 = arith.constant 0 : index
    %7 = vector.load %arg2[%c0_8, %c0_9, %c0_10] : memref<9x4x4xbf16, #tpu.memory_space<vmem>>, vector<1x4x4xbf16>
    %8 = vector.shape_cast %7 : vector<1x4x4xbf16> to vector<4x4xbf16>
    %cst_11 = arith.constant dense<0.000000e+00> : vector<128x4xf32>
    %9 = tpu.matmul %6, %8, %cst_11 {dimension_numbers = #tpu.dot_dimension_numbers<[1], [0], [0], [1], [0, 0, 1, 1], [], []>} : vector<128x4xbf16>, vector<4x4xbf16>, vector<128x4xf32> -> vector<128x4xf32>
    %10 = arith.addf %5, %9 : vector<128x4xf32>
    %c0_12 = arith.constant 0 : index
    %c0_13 = arith.constant 0 : index
    %11 = vector.load %arg5[%c0_12, %c0_13] : memref<128x4xf32, #tpu.memory_space<vmem>>, vector<128x4xf32>
    tpu.vector_store %arg5[%c0_12, %c0_13], %10 {strides = array<i32>} : memref<128x4xf32, #tpu.memory_space<vmem>>, vector<128x4xf32>,
    %12 = vector.extract_strided_slice %3 {offsets = [0, 0, 1, 0], sizes = [2, 8, 8, 4], strides = [1, 1, 1, 1]} : vector<2x9x9x4xbf16> to vector<2x8x8x4xbf16>
    %c0_14 = arith.constant 0 : index
    %c0_15 = arith.constant 0 : index
    %13 = vector.load %arg5[%c0_14, %c0_15] : memref<128x4xf32, #tpu.memory_space<vmem>>, vector<128x4xf32>
    %14 = vector.shape_cast %12 : vector<2x8x8x4xbf16> to vector<128x4xbf16>
    %c2 = arith.constant 2 : index
    %c0_16 = arith.constant 0 : index
    %c0_17 = arith.constant 0 : index
    %15 = vector.load %arg2[%c2, %c0_16, %c0_17] : memref<9x4x4xbf16, #tpu.memory_space<vmem>>, vector<1x4x4xbf16>
    %16 = vector.shape_cast %15 : vector<1x4x4xbf16> to vector<4x4xbf16>
    %cst_18 = arith.constant dense<0.000000e+00> : vector<128x4xf32>
    %17 = tpu.matmul %14, %16, %cst_18 {dimension_numbers = #tpu.dot_dimension_numbers<[1], [0], [0], [1], [0, 0, 1, 1], [], []>} : vector<128x4xbf16>, vector<4x4xbf16>, vector<128x4xf32> -> vector<128x4xf32>
    %18 = arith.addf %13, %17 : vector<128x4xf32>
    %c0_19 = arith.constant 0 : index
    %c0_20 = arith.constant 0 : index
    %19 = vector.load %arg5[%c0_19, %c0_20] : memref<128x4xf32, #tpu.memory_space<vmem>>, vector<128x4xf32>
    tpu.vector_store %arg5[%c0_19, %c0_20], %18 {strides = array<i32>} : memref<128x4xf32, #tpu.memory_space<vmem>>, vector<128x4xf32>,
    %20 = vector.extract_strided_slice %3 {offsets = [0, 1, 0, 0], sizes = [2, 8, 8, 4], strides = [1, 1, 1, 1]} : vector<2x9x9x4xbf16> to vector<2x8x8x4xbf16>
    %c0_21 = arith.constant 0 : index
    %c0_22 = arith.constant 0 : index
    %21 = vector.load %arg5[%c0_21, %c0_22] : memref<128x4xf32, #tpu.memory_space<vmem>>, vector<128x4xf32>
    %22 = vector.shape_cast %20 : vector<2x8x8x4xbf16> to vector<128x4xbf16>
    %c6 = arith.constant 6 : index
    %c0_23 = arith.constant 0 : index
    %c0_24 = arith.constant 0 : index
    %23 = vector.load %arg2[%c6, %c0_23, %c0_24] : memref<9x4x4xbf16, #tpu.memory_space<vmem>>, vector<1x4x4xbf16>
    %24 = vector.shape_cast %23 : vector<1x4x4xbf16> to vector<4x4xbf16>
    %cst_25 = arith.constant dense<0.000000e+00> : vector<128x4xf32>
    %25 = tpu.matmul %22, %24, %cst_25 {dimension_numbers = #tpu.dot_dimension_numbers<[1], [0], [0], [1], [0, 0, 1, 1], [], []>} : vector<128x4xbf16>, vector<4x4xbf16>, vector<128x4xf32> -> vector<128x4xf32>
    %26 = arith.addf %21, %25 : vector<128x4xf32>
    %c0_26 = arith.constant 0 : index
    %c0_27 = arith.constant 0 : index
    %27 = vector.load %arg5[%c0_26, %c0_27] : memref<128x4xf32, #tpu.memory_space<vmem>>, vector<128x4xf32>
    tpu.vector_store %arg5[%c0_26, %c0_27], %26 {strides = array<i32>} : memref<128x4xf32, #tpu.memory_space<vmem>>, vector<128x4xf32>,
    %28 = vector.extract_strided_slice %3 {offsets = [0, 1, 1, 0], sizes = [2, 8, 8, 4], strides = [1, 1, 1, 1]} : vector<2x9x9x4xbf16> to vector<2x8x8x4xbf16>
    %c0_28 = arith.constant 0 : index
    %c0_29 = arith.constant 0 : index
    %29 = vector.load %arg5[%c0_28, %c0_29] : memref<128x4xf32, #tpu.memory_space<vmem>>, vector<128x4xf32>
    %30 = vector.shape_cast %28 : vector<2x8x8x4xbf16> to vector<128x4xbf16>
    %c8 = arith.constant 8 : index
    %c0_30 = arith.constant 0 : index
    %c0_31 = arith.constant 0 : index
    %31 = vector.load %arg2[%c8, %c0_30, %c0_31] : memref<9x4x4xbf16, #tpu.memory_space<vmem>>, vector<1x4x4xbf16>
    %32 = vector.shape_cast %31 : vector<1x4x4xbf16> to vector<4x4xbf16>
    %cst_32 = arith.constant dense<0.000000e+00> : vector<128x4xf32>
    %33 = tpu.matmul %30, %32, %cst_32 {dimension_numbers = #tpu.dot_dimension_numbers<[1], [0], [0], [1], [0, 0, 1, 1], [], []>} : vector<128x4xbf16>, vector<4x4xbf16>, vector<128x4xf32> -> vector<128x4xf32>
    %34 = arith.addf %29, %33 : vector<128x4xf32>
    %c0_33 = arith.constant 0 : index
    %c0_34 = arith.constant 0 : index
    %35 = vector.load %arg5[%c0_33, %c0_34] : memref<128x4xf32, #tpu.memory_space<vmem>>, vector<128x4xf32>
    tpu.vector_store %arg5[%c0_33, %c0_34], %34 {strides = array<i32>} : memref<128x4xf32, #tpu.memory_space<vmem>>, vector<128x4xf32>,
    %c1 = arith.constant 1 : index
    %c0_35 = arith.constant 0 : index
    %c0_36 = arith.constant 0 : index
    %c0_37 = arith.constant 0 : index
    %c0_38 = arith.constant 0 : index
    %36 = vector.load %arg1[%c1, %c0_35, %c0_36, %c0_37, %c0_38] : memref<4x2x9x9x4xbf16, #tpu.memory_space<vmem>>, vector<1x2x9x9x4xbf16>
    %37 = vector.shape_cast %36 : vector<1x2x9x9x4xbf16> to vector<2x9x9x4xbf16>
    %38 = vector.extract_strided_slice %37 {offsets = [0, 0, 0, 0], sizes = [2, 8, 8, 4], strides = [1, 1, 1, 1]} : vector<2x9x9x4xbf16> to vector<2x8x8x4xbf16>
    %c0_39 = arith.constant 0 : index
    %c0_40 = arith.constant 0 : index
    %39 = vector.load %arg5[%c0_39, %c0_40] : memref<128x4xf32, #tpu.memory_space<vmem>>, vector<128x4xf32>
    %40 = vector.shape_cast %38 : vector<2x8x8x4xbf16> to vector<128x4xbf16>
    %c1_41 = arith.constant 1 : index
    %c0_42 = arith.constant 0 : index
    %c0_43 = arith.constant 0 : index
    %41 = vector.load %arg2[%c1_41, %c0_42, %c0_43] : memref<9x4x4xbf16, #tpu.memory_space<vmem>>, vector<1x4x4xbf16>
    %42 = vector.shape_cast %41 : vector<1x4x4xbf16> to vector<4x4xbf16>
    %cst_44 = arith.constant dense<0.000000e+00> : vector<128x4xf32>
    %43 = tpu.matmul %40, %42, %cst_44 {dimension_numbers = #tpu.dot_dimension_numbers<[1], [0], [0], [1], [0, 0, 1, 1], [], []>} : vector<128x4xbf16>, vector<4x4xbf16>, vector<128x4xf32> -> vector<128x4xf32>
    %44 = arith.addf %39, %43 : vector<128x4xf32>
    %c0_45 = arith.constant 0 : index
    %c0_46 = arith.constant 0 : index
    %45 = vector.load %arg5[%c0_45, %c0_46] : memref<128x4xf32, #tpu.memory_space<vmem>>, vector<128x4xf32>
    tpu.vector_store %arg5[%c0_45, %c0_46], %44 {strides = array<i32>} : memref<128x4xf32, #tpu.memory_space<vmem>>, vector<128x4xf32>,
    %46 = vector.extract_strided_slice %37 {offsets = [0, 1, 0, 0], sizes = [2, 8, 8, 4], strides = [1, 1, 1, 1]} : vector<2x9x9x4xbf16> to vector<2x8x8x4xbf16>
    %c0_47 = arith.constant 0 : index
    %c0_48 = arith.constant 0 : index
    %47 = vector.load %arg5[%c0_47, %c0_48] : memref<128x4xf32, #tpu.memory_space<vmem>>, vector<128x4xf32>
    %48 = vector.shape_cast %46 : vector<2x8x8x4xbf16> to vector<128x4xbf16>
    %c7 = arith.constant 7 : index
    %c0_49 = arith.constant 0 : index
    %c0_50 = arith.constant 0 : index
    %49 = vector.load %arg2[%c7, %c0_49, %c0_50] : memref<9x4x4xbf16, #tpu.memory_space<vmem>>, vector<1x4x4xbf16>
    %50 = vector.shape_cast %49 : vector<1x4x4xbf16> to vector<4x4xbf16>
    %cst_51 = arith.constant dense<0.000000e+00> : vector<128x4xf32>
    %51 = tpu.matmul %48, %50, %cst_51 {dimension_numbers = #tpu.dot_dimension_numbers<[1], [0], [0], [1], [0, 0, 1, 1], [], []>} : vector<128x4xbf16>, vector<4x4xbf16>, vector<128x4xf32> -> vector<128x4xf32>
    %52 = arith.addf %47, %51 : vector<128x4xf32>
    %c0_52 = arith.constant 0 : index
    %c0_53 = arith.constant 0 : index
    %53 = vector.load %arg5[%c0_52, %c0_53] : memref<128x4xf32, #tpu.memory_space<vmem>>, vector<128x4xf32>
    tpu.vector_store %arg5[%c0_52, %c0_53], %52 {strides = array<i32>} : memref<128x4xf32, #tpu.memory_space<vmem>>, vector<128x4xf32>,
    %c2_54 = arith.constant 2 : index
    %c0_55 = arith.constant 0 : index
    %c0_56 = arith.constant 0 : index
    %c0_57 = arith.constant 0 : index
    %c0_58 = arith.constant 0 : index
    %54 = vector.load %arg1[%c2_54, %c0_55, %c0_56, %c0_57, %c0_58] : memref<4x2x9x9x4xbf16, #tpu.memory_space<vmem>>, vector<1x2x9x9x4xbf16>
    %55 = vector.shape_cast %54 : vector<1x2x9x9x4xbf16> to vector<2x9x9x4xbf16>
    %56 = vector.extract_strided_slice %55 {offsets = [0, 0, 0, 0], sizes = [2, 8, 8, 4], strides = [1, 1, 1, 1]} : vector<2x9x9x4xbf16> to vector<2x8x8x4xbf16>
    %c0_59 = arith.constant 0 : index
    %c0_60 = arith.constant 0 : index
    %57 = vector.load %arg5[%c0_59, %c0_60] : memref<128x4xf32, #tpu.memory_space<vmem>>, vector<128x4xf32>
    %58 = vector.shape_cast %56 : vector<2x8x8x4xbf16> to vector<128x4xbf16>
    %c3 = arith.constant 3 : index
    %c0_61 = arith.constant 0 : index
    %c0_62 = arith.constant 0 : index
    %59 = vector.load %arg2[%c3, %c0_61, %c0_62] : memref<9x4x4xbf16, #tpu.memory_space<vmem>>, vector<1x4x4xbf16>
    %60 = vector.shape_cast %59 : vector<1x4x4xbf16> to vector<4x4xbf16>
    %cst_63 = arith.constant dense<0.000000e+00> : vector<128x4xf32>
    %61 = tpu.matmul %58, %60, %cst_63 {dimension_numbers = #tpu.dot_dimension_numbers<[1], [0], [0], [1], [0, 0, 1, 1], [], []>} : vector<128x4xbf16>, vector<4x4xbf16>, vector<128x4xf32> -> vector<128x4xf32>
    %62 = arith.addf %57, %61 : vector<128x4xf32>
    %c0_64 = arith.constant 0 : index
    %c0_65 = arith.constant 0 : index
    %63 = vector.load %arg5[%c0_64, %c0_65] : memref<128x4xf32, #tpu.memory_space<vmem>>, vector<128x4xf32>
    tpu.vector_store %arg5[%c0_64, %c0_65], %62 {strides = array<i32>} : memref<128x4xf32, #tpu.memory_space<vmem>>, vector<128x4xf32>,
    %64 = vector.extract_strided_slice %55 {offsets = [0, 0, 1, 0], sizes = [2, 8, 8, 4], strides = [1, 1, 1, 1]} : vector<2x9x9x4xbf16> to vector<2x8x8x4xbf16>
    %c0_66 = arith.constant 0 : index
    %c0_67 = arith.constant 0 : index
    %65 = vector.load %arg5[%c0_66, %c0_67] : memref<128x4xf32, #tpu.memory_space<vmem>>, vector<128x4xf32>
    %66 = vector.shape_cast %64 : vector<2x8x8x4xbf16> to vector<128x4xbf16>
    %c5 = arith.constant 5 : index
    %c0_68 = arith.constant 0 : index
    %c0_69 = arith.constant 0 : index
    %67 = vector.load %arg2[%c5, %c0_68, %c0_69] : memref<9x4x4xbf16, #tpu.memory_space<vmem>>, vector<1x4x4xbf16>
    %68 = vector.shape_cast %67 : vector<1x4x4xbf16> to vector<4x4xbf16>
    %cst_70 = arith.constant dense<0.000000e+00> : vector<128x4xf32>
    %69 = tpu.matmul %66, %68, %cst_70 {dimension_numbers = #tpu.dot_dimension_numbers<[1], [0], [0], [1], [0, 0, 1, 1], [], []>} : vector<128x4xbf16>, vector<4x4xbf16>, vector<128x4xf32> -> vector<128x4xf32>
    %70 = arith.addf %65, %69 : vector<128x4xf32>
    %c0_71 = arith.constant 0 : index
    %c0_72 = arith.constant 0 : index
    %71 = vector.load %arg5[%c0_71, %c0_72] : memref<128x4xf32, #tpu.memory_space<vmem>>, vector<128x4xf32>
    tpu.vector_store %arg5[%c0_71, %c0_72], %70 {strides = array<i32>} : memref<128x4xf32, #tpu.memory_space<vmem>>, vector<128x4xf32>,
    %c3_73 = arith.constant 3 : index
    %c0_74 = arith.constant 0 : index
    %c0_75 = arith.constant 0 : index
    %c0_76 = arith.constant 0 : index
    %c0_77 = arith.constant 0 : index
    %72 = vector.load %arg1[%c3_73, %c0_74, %c0_75, %c0_76, %c0_77] : memref<4x2x9x9x4xbf16, #tpu.memory_space<vmem>>, vector<1x2x9x9x4xbf16>
    %73 = vector.shape_cast %72 : vector<1x2x9x9x4xbf16> to vector<2x9x9x4xbf16>
    %74 = vector.extract_strided_slice %73 {offsets = [0, 0, 0, 0], sizes = [2, 8, 8, 4], strides = [1, 1, 1, 1]} : vector<2x9x9x4xbf16> to vector<2x8x8x4xbf16>
    %c0_78 = arith.constant 0 : index
    %c0_79 = arith.constant 0 : index
    %75 = vector.load %arg5[%c0_78, %c0_79] : memref<128x4xf32, #tpu.memory_space<vmem>>, vector<128x4xf32>
    %76 = vector.shape_cast %74 : vector<2x8x8x4xbf16> to vector<128x4xbf16>
    %c4 = arith.constant 4 : index
    %c0_80 = arith.constant 0 : index
    %c0_81 = arith.constant 0 : index
    %77 = vector.load %arg2[%c4, %c0_80, %c0_81] : memref<9x4x4xbf16, #tpu.memory_space<vmem>>, vector<1x4x4xbf16>
    %78 = vector.shape_cast %77 : vector<1x4x4xbf16> to vector<4x4xbf16>
    %cst_82 = arith.constant dense<0.000000e+00> : vector<128x4xf32>
    %79 = tpu.matmul %76, %78, %cst_82 {dimension_numbers = #tpu.dot_dimension_numbers<[1], [0], [0], [1], [0, 0, 1, 1], [], []>} : vector<128x4xbf16>, vector<4x4xbf16>, vector<128x4xf32> -> vector<128x4xf32>
    %80 = arith.addf %75, %79 : vector<128x4xf32>
    %c0_83 = arith.constant 0 : index
    %c0_84 = arith.constant 0 : index
    %81 = vector.load %arg5[%c0_83, %c0_84] : memref<128x4xf32, #tpu.memory_space<vmem>>, vector<128x4xf32>
    tpu.vector_store %arg5[%c0_83, %c0_84], %80 {strides = array<i32>} : memref<128x4xf32, #tpu.memory_space<vmem>>, vector<128x4xf32>,
    %c0_85 = arith.constant 0 : index
    %c0_86 = arith.constant 0 : index
    %82 = vector.load %arg5[%c0_85, %c0_86] : memref<128x4xf32, #tpu.memory_space<vmem>>, vector<128x4xf32>
    %c0_87 = arith.constant 0 : index
    %c0_88 = arith.constant 0 : index
    %83 = vector.load %arg3[%c0_87, %c0_88] : memref<1x4xf32, #tpu.memory_space<vmem>>, vector<1x4xf32>
    %84 = vector.broadcast %83 : vector<1x4xf32> to vector<128x4xf32>
    %85 = arith.addf %82, %84 : vector<128x4xf32>
    %cst_89 = arith.constant 0.000000e+00 : f32
    %86 = vector.broadcast %cst_89 : f32 to vector<128x4xf32>
    %87 = arith.maximumf %85, %86 : vector<128x4xf32>
    %88 = vector.shape_cast %87 : vector<128x4xf32> to vector<2x8x8x4xf32>
    %89 = arith.truncf %88 : vector<2x8x8x4xf32> to vector<2x8x8x4xbf16>
    %c0_90 = arith.constant 0 : index
    %c0_91 = arith.constant 0 : index
    %c0_92 = arith.constant 0 : index
    %c0_93 = arith.constant 0 : index
    %90 = vector.load %arg4[%c0_90, %c0_91, %c0_92, %c0_93] : memref<2x8x8x4xbf16, #tpu.memory_space<vmem>>, vector<2x8x8x4xbf16>
    tpu.vector_store %arg4[%c0_90, %c0_91, %c0_92, %c0_93], %89 {strides = array<i32>} : memref<2x8x8x4xbf16, #tpu.memory_space<vmem>>, vector<2x8x8x4xbf16>,
    return
  }
  func.func @transform_0(%arg0: i32) -> (i32, i32, i32, i32, i32) {
    %c0_i32 = arith.constant 0 : i32
    %c0_i32_0 = arith.constant 0 : i32
    %c0_i32_1 = arith.constant 0 : i32
    %c0_i32_2 = arith.constant 0 : i32
    %c0_i32_3 = arith.constant 0 : i32
    return %c0_i32, %arg0, %c0_i32_0, %c0_i32_1, %c0_i32_2 : i32, i32, i32, i32, i32
  }
  func.func @transform_1(%arg0: i32) -> (i32, i32, i32) {
    %c0_i32 = arith.constant 0 : i32
    %c0_i32_0 = arith.constant 0 : i32
    %c0_i32_1 = arith.constant 0 : i32
    %c0_i32_2 = arith.constant 0 : i32
    return %c0_i32, %c0_i32_0, %c0_i32_1 : i32, i32, i32
  }
  func.func @transform_2(%arg0: i32) -> (i32, i32) {
    %c0_i32 = arith.constant 0 : i32
    %c0_i32_0 = arith.constant 0 : i32
    %c0_i32_1 = arith.constant 0 : i32
    return %c0_i32, %c0_i32_0 : i32, i32
  }
  func.func @transform_3(%arg0: i32) -> (i32, i32, i32, i32) {
    %c0_i32 = arith.constant 0 : i32
    %c0_i32_0 = arith.constant 0 : i32
    %c0_i32_1 = arith.constant 0 : i32
    %c0_i32_2 = arith.constant 0 : i32
    return %arg0, %c0_i32, %c0_i32_0, %c0_i32_1 : i32, i32, i32, i32
  }
}

</mosaic_0001>

<bundles_post_ra>
// kernel: bottleneck_forward.3
= control target key start
LH: loop header
LB: loop body
LE: loop exit
PB: predicated region body
PF: predicated region fallthrough
CT: control target
= control target key end

     0   :  { %vm344_vm0 = vcmask 1043456   ;;  %vm247_vm1 = vcmask 64512   ;;  %vm957_vm2 = vcmask 27648   ;;  %s1830_s1 = inlined_call_operand.vmem [shape: bf16[8,4], index: 1, kind: input, shape index: {}]   ;;  %s1831_s0 = inlined_call_operand.vmem [shape: bf16[512,8], index: 0, kind: input, shape index: {}]   ;;  %s1832_s2 = inlined_call_operand.vmem [shape: f32[1,4], index: 2, kind: input, shape index: {}]   ;;  %s1833_s3 = inlined_call_operand.vmem [shape: bf16[512,4], index: 3, kind: output, shape index: {}]  }
   0x1   :  { %v79_v0 = vld [vmem:[%s1830_s1] sm:$0xf]  ;;  %v1324_v4 = vld [vmem:[%s1831_s0 + $0x8] sm:$0xff]   ;;  %v1326_v6 = vld [vmem:[%s1831_s0 + $0x10] sm:$0xff]  }
   0x2   :  { %1320 = vmatprep.subr.msk.bf16.mxu0 %vm344_vm0, %v79_v0  ;;  %1321 = vmatprep.subr.msk.bf16.mxu1 %vm344_vm0, %v79_v0  ;;  %v346_v1 = vsel %vm344_vm0, %v79_v0, 0  ;;  %v1322_v2 = vld [vmem:[%s1831_s0] sm:$0xff]   ;;  %v1325_v5 = vld [vmem:[%s1831_s0 + $0x88] sm:$0xff]   ;;  %v1327_v7 = vld [vmem:[%s1831_s0 + $0x90] sm:$0xff]  }
   0x3   :  { %1253 = vmatpush3.bf16.msra.mxu0 %v346_v1  ;;  %1319 = vmatpush3.bf16.msra.mxu1 %v346_v1  ;;  %v1323_v3 = vld [vmem:[%s1831_s0 + $0x80] sm:$0xff]   ;;  %v1328_v8 = vld [vmem:[%s1831_s0 + $0x18] sm:$0xff]   ;;  %v1332_v12 = vld [vmem:[%s1831_s0 + $0x28] sm:$0xff]  }
   0x4   :  { %1254 = vmatprep.mubr.msk.bf16.mxu0 %vm247_vm1, %v1322_v2  ;;  %1286 = vmatprep.mubr.msk.bf16.mxu1 %vm247_vm1, %v1323_v3  ;;  %v1329_v9 = vld [vmem:[%s1831_s0 + $0x98] sm:$0xff]   ;;  %v1330_v10 = vld [vmem:[%s1831_s0 + $0x20] sm:$0xff]   ;;  %v1333_v13 = vld [vmem:[%s1831_s0 + $0xa8] sm:$0xff]  }
   0x5   :  { %v1331_v11 = vld [vmem:[%s1831_s0 + $0xa0] sm:$0xff]   ;;  %v1334_v14 = vld [vmem:[%s1831_s0 + $0x30] sm:$0xff]   ;;  %v1336_v16 = vld [vmem:[%s1831_s0 + $0x38] sm:$0xff]  }
   0x6   :  { %1255 = vmatmul.mubr.msk.bf16.vlgmr.msra.gmra.mrb[0].mxu0 %vm247_vm1, %v1324_v4  ;;  %1287 = vmatmul.mubr.msk.bf16.vlgmr.msra.gmra.mrb[0].mxu1 %vm247_vm1, %v1325_v5  ;;  %v1335_v15 = vld [vmem:[%s1831_s0 + $0xb0] sm:$0xff]   ;;  %v1337_v17 = vld [vmem:[%s1831_s0 + $0xb8] sm:$0xff]   ;;  %v1338_v18 = vld [vmem:[%s1831_s0 + $0x40] sm:$0xff]  }
   0x7   :  { %1258 = vmatprep.mubr.msk.bf16.mxu0 %vm247_vm1, %v1326_v6  ;;  %1290 = vmatprep.mubr.msk.bf16.mxu1 %vm247_vm1, %v1327_v7  ;;  %v1339_v19 = vld [vmem:[%s1831_s0 + $0xc0] sm:$0xff]   ;;  %v1340_v20 = vld [vmem:[%s1831_s0 + $0x48] sm:$0xff]   ;;  %v1342_v22 = vld [vmem:[%s1831_s0 + $0x50] sm:$0xff]  }
   0x8   :  { %v1341_v21 = vld [vmem:[%s1831_s0 + $0xc8] sm:$0xff]   ;;  %v1343_v23 = vld [vmem:[%s1831_s0 + $0xd0] sm:$0xff]   ;;  %v1344_v24 = vld [vmem:[%s1831_s0 + $0x58] sm:$0xff]  }
   0x9   :  { %v1345_v25 = vld [vmem:[%s1831_s0 + $0xd8] sm:$0xff]   ;;  %v1346_v26 = vld [vmem:[%s1831_s0 + $0x60] sm:$0xff]   ;;  %v1348_v28 = vld [vmem:[%s1831_s0 + $0x68] sm:$0xff]  }
   0xa   :  { %v1347_v27 = vld [vmem:[%s1831_s0 + $0xe0] sm:$0xff]   ;;  %v1349_v29 = vld [vmem:[%s1831_s0 + $0xe8] sm:$0xff]   ;;  %v1350_v30 = vld [vmem:[%s1831_s0 + $0x70] sm:$0xff]  }
   0xb   :  { %v1351_v31 = vld [vmem:[%s1831_s0 + $0xf0] sm:$0xff]   ;;  %v1352_v32 = vld [vmem:[%s1831_s0 + $0x78] sm:$0xff]   ;;  %v1508_v34 = vld [vmem:[%s1832_s2] ss:$0 sm:$0xff] }
   0xc   :  { %v1353_v33 = vld [vmem:[%s1831_s0 + $0xf8] sm:$0xff]  }
   0xe   :  { %1259 = vmatmul.mubr.msk.bf16.gmra.mrb[4].mxu0 %vm247_vm1, %v1328_v8  ;;  %1291 = vmatmul.mubr.msk.bf16.gmra.mrb[4].mxu1 %vm247_vm1, %v1329_v9 }
   0xf   :  { %1262 = vmatprep.mubr.msk.bf16.mxu0 %vm247_vm1, %v1330_v10  ;;  %1294 = vmatprep.mubr.msk.bf16.mxu1 %vm247_vm1, %v1331_v11 }
  0x16   :  { %1263 = vmatmul.mubr.msk.bf16.gmra.mrb[8].mxu0 %vm247_vm1, %v1332_v12  ;;  %1295 = vmatmul.mubr.msk.bf16.gmra.mrb[8].mxu1 %vm247_vm1, %v1333_v13 }
  0x17   :  { %1266 = vmatprep.mubr.msk.bf16.mxu0 %vm247_vm1, %v1334_v14  ;;  %1298 = vmatprep.mubr.msk.bf16.mxu1 %vm247_vm1, %v1335_v15 }
  0x1e   :  { %1267 = vmatmul.mubr.msk.bf16.gmra.mrb[12].mxu0 %vm247_vm1, %v1336_v16  ;;  %1299 = vmatmul.mubr.msk.bf16.gmra.mrb[12].mxu1 %vm247_vm1, %v1337_v17 }
  0x1f   :  { %1270 = vmatprep.mubr.msk.bf16.mxu0 %vm247_vm1, %v1338_v18  ;;  %1302 = vmatprep.mubr.msk.bf16.mxu1 %vm247_vm1, %v1339_v19 }
  0x26   :  { %1271 = vmatmul.mubr.msk.bf16.gmra.mrb[16].mxu0 %vm247_vm1, %v1340_v20  ;;  %1303 = vmatmul.mubr.msk.bf16.gmra.mrb[16].mxu1 %vm247_vm1, %v1341_v21 }
  0x27   :  { %1274 = vmatprep.mubr.msk.bf16.mxu0 %vm247_vm1, %v1342_v22  ;;  %1306 = vmatprep.mubr.msk.bf16.mxu1 %vm247_vm1, %v1343_v23 }
  0x2e   :  { %1275 = vmatmul.mubr.msk.bf16.gmra.mrb[20].mxu0 %vm247_vm1, %v1344_v24  ;;  %1307 = vmatmul.mubr.msk.bf16.gmra.mrb[20].mxu1 %vm247_vm1, %v1345_v25 }
  0x2f   :  { %1278 = vmatprep.mubr.msk.bf16.mxu0 %vm247_vm1, %v1346_v26  ;;  %1310 = vmatprep.mubr.msk.bf16.mxu1 %vm247_vm1, %v1347_v27 }
  0x36   :  { %1279 = vmatmul.mubr.msk.bf16.gmra.mrb[24].mxu0 %vm247_vm1, %v1348_v28  ;;  %1311 = vmatmul.mubr.msk.bf16.gmra.mrb[24].mxu1 %vm247_vm1, %v1349_v29 }
  0x37   :  { %1282 = vmatprep.mubr.msk.bf16.mxu0 %vm247_vm1, %v1350_v30  ;;  %1314 = vmatprep.mubr.msk.bf16.mxu1 %vm247_vm1, %v1351_v31 }
  0x3e   :  { %1283 = vmatmul.mubr.msk.bf16.gmra.mrb[28].mxu0 %vm247_vm1, %v1352_v32  ;;  %1315 = vmatmul.mubr.msk.bf16.gmra.mrb[28].mxu1 %vm247_vm1, %v1353_v33 }
  0xd9   :  { %v1256_v35 = vpop.f32.mrb[0].mxu0  ;;  %v1288_v37 = vpop.f32.mrb[0].mxu1 }
  0xda   :  { %v391_v36 = vadd.f32 %v1256_v35, %v1508_v34  ;;  %v382_v38 = vpop.f32.mrb[1].mxu0  ;;  %v519_v39 = vadd.f32 %v1288_v37, %v1508_v34  ;;  %v510_v41 = vpop.f32.mrb[1].mxu1 }
  0xdb   :  { %v383_v40 = vadd.f32 %v1508_v34, %v382_v38  ;;  %v1257_v42 = vpop.f32.mrb[2].mxu0  ;;  %v511_v44 = vadd.f32 %v1508_v34, %v510_v41  ;;  %v1289_v46 = vpop.f32.mrb[2].mxu1 }
  0xdc   :  { %v639_v43 = vmax.f32 %v391_v36, 0.0  ;;  %v394_v45 = vadd.f32 %v1257_v42, %v1508_v34  ;;  %v385_v47 = vpop.f32.mrb[3].mxu0  ;;  %v671_v48 = vmax.f32 %v519_v39, 0.0  ;;  %v522_v50 = vadd.f32 %v1289_v46, %v1508_v34  ;;  %v513_v52 = vpop.f32.mrb[3].mxu1 }
  0xdd   :  { %v637_v49 = vmax.f32 %v383_v40, 0.0  ;;  %v386_v51 = vadd.f32 %v1508_v34, %v385_v47  ;;  %v669_v54 = vmax.f32 %v511_v44, 0.0  ;;  %v514_v56 = vadd.f32 %v1508_v34, %v513_v52 }
  0xde   :  { %v1157_v53 = vpack.c.bf16 %v639_v43, %v639_v43  ;;  %v640_v55 = vmax.f32 %v394_v45, 0.0  ;;  %v1189_v57 = vpack.c.bf16 %v671_v48, %v671_v48  ;;  %v672_v59 = vmax.f32 %v522_v50, 0.0 }
  0xdf   :  { %v1155_v58 = vpack.c.bf16 %v637_v49, %v637_v49  ;;  %v638_v60 = vmax.f32 %v386_v51, 0.0  ;;  %v1187_v61 = vpack.c.bf16 %v669_v54, %v669_v54  ;;  %v670_v63 = vmax.f32 %v514_v56, 0.0 }
  0xe0   :  { %960 = vst.msk [vmem:[%s1833_s3 + $0x8] sm:$0xf] %vm957_vm2, %v1157_v53  ;;  %v1158_v62 = vpack.c.bf16 %v640_v55, %v640_v55  ;;  %992 = vst.msk [vmem:[%s1833_s3 + $0x88] sm:$0xf] %vm957_vm2, %v1189_v57  ;;  %v1190_v0 = vpack.c.bf16 %v672_v59, %v672_v59 }
  0xe1   :  { %958 = vst.msk [vmem:[%s1833_s3] sm:$0xf] %vm957_vm2, %v1155_v58  ;;  %v1156_v1 = vpack.c.bf16 %v638_v60, %v638_v60  ;;  %v1260_v2 = vpop.f32.mrb[4].mxu0  ;;  %990 = vst.msk [vmem:[%s1833_s3 + $0x80] sm:$0xf] %vm957_vm2, %v1187_v61  ;;  %v1188_v3 = vpack.c.bf16 %v670_v63, %v670_v63  ;;  %v1292_v5 = vpop.f32.mrb[4].mxu1 }
  0xe2   :  { %961 = vst.msk [vmem:[%s1833_s3 + $0xc] sm:$0xf] %vm957_vm2, %v1158_v62  ;;  %v407_v4 = vadd.f32 %v1260_v2, %v1508_v34  ;;  %v398_v6 = vpop.f32.mrb[5].mxu0  ;;  %993 = vst.msk [vmem:[%s1833_s3 + $0x8c] sm:$0xf] %vm957_vm2, %v1190_v0  ;;  %v535_v7 = vadd.f32 %v1292_v5, %v1508_v34  ;;  %v526_v9 = vpop.f32.mrb[5].mxu1 }
  0xe3   :  { %959 = vst.msk [vmem:[%s1833_s3 + $0x4] sm:$0xf] %vm957_vm2, %v1156_v1  ;;  %v399_v8 = vadd.f32 %v1508_v34, %v398_v6  ;;  %v1261_v10 = vpop.f32.mrb[6].mxu0  ;;  %991 = vst.msk [vmem:[%s1833_s3 + $0x84] sm:$0xf] %vm957_vm2, %v1188_v3  ;;  %v527_v12 = vadd.f32 %v1508_v34, %v526_v9  ;;  %v1293_v14 = vpop.f32.mrb[6].mxu1 }
  0xe4   :  { %v643_v11 = vmax.f32 %v407_v4, 0.0  ;;  %v410_v13 = vadd.f32 %v1261_v10, %v1508_v34  ;;  %v401_v15 = vpop.f32.mrb[7].mxu0  ;;  %v675_v16 = vmax.f32 %v535_v7, 0.0  ;;  %v538_v18 = vadd.f32 %v1293_v14, %v1508_v34  ;;  %v529_v20 = vpop.f32.mrb[7].mxu1 }
  0xe5   :  { %v641_v17 = vmax.f32 %v399_v8, 0.0  ;;  %v402_v19 = vadd.f32 %v1508_v34, %v401_v15  ;;  %v673_v22 = vmax.f32 %v527_v12, 0.0  ;;  %v530_v24 = vadd.f32 %v1508_v34, %v529_v20 }
  0xe6   :  { %v1161_v21 = vpack.c.bf16 %v643_v11, %v643_v11  ;;  %v644_v23 = vmax.f32 %v410_v13, 0.0  ;;  %v1193_v25 = vpack.c.bf16 %v675_v16, %v675_v16  ;;  %v676_v27 = vmax.f32 %v538_v18, 0.0 }
  0xe7   :  { %v1159_v26 = vpack.c.bf16 %v641_v17, %v641_v17  ;;  %v642_v28 = vmax.f32 %v402_v19, 0.0  ;;  %v1191_v29 = vpack.c.bf16 %v673_v22, %v673_v22  ;;  %v674_v31 = vmax.f32 %v530_v24, 0.0 }
  0xe8   :  { %964 = vst.msk [vmem:[%s1833_s3 + $0x18] sm:$0xf] %vm957_vm2, %v1161_v21  ;;  %v1162_v30 = vpack.c.bf16 %v644_v23, %v644_v23  ;;  %996 = vst.msk [vmem:[%s1833_s3 + $0x98] sm:$0xf] %vm957_vm2, %v1193_v25  ;;  %v1194_v32 = vpack.c.bf16 %v676_v27, %v676_v27 }
  0xe9   :  { %962 = vst.msk [vmem:[%s1833_s3 + $0x10] sm:$0xf] %vm957_vm2, %v1159_v26  ;;  %v1160_v33 = vpack.c.bf16 %v642_v28, %v642_v28  ;;  %v1264_v35 = vpop.f32.mrb[8].mxu0  ;;  %994 = vst.msk [vmem:[%s1833_s3 + $0x90] sm:$0xf] %vm957_vm2, %v1191_v29  ;;  %v1192_v36 = vpack.c.bf16 %v674_v31, %v674_v31  ;;  %v1296_v38 = vpop.f32.mrb[8].mxu1 }
  0xea   :  { %965 = vst.msk [vmem:[%s1833_s3 + $0x1c] sm:$0xf] %vm957_vm2, %v1162_v30  ;;  %v423_v37 = vadd.f32 %v1264_v35, %v1508_v34  ;;  %v414_v39 = vpop.f32.mrb[9].mxu0  ;;  %997 = vst.msk [vmem:[%s1833_s3 + $0x9c] sm:$0xf] %vm957_vm2, %v1194_v32  ;;  %v551_v40 = vadd.f32 %v1296_v38, %v1508_v34  ;;  %v542_v42 = vpop.f32.mrb[9].mxu1 }
  0xeb   :  { %963 = vst.msk [vmem:[%s1833_s3 + $0x14] sm:$0xf] %vm957_vm2, %v1160_v33  ;;  %v415_v41 = vadd.f32 %v1508_v34, %v414_v39  ;;  %v1265_v43 = vpop.f32.mrb[10].mxu0  ;;  %995 = vst.msk [vmem:[%s1833_s3 + $0x94] sm:$0xf] %vm957_vm2, %v1192_v36  ;;  %v543_v45 = vadd.f32 %v1508_v34, %v542_v42  ;;  %v1297_v47 = vpop.f32.mrb[10].mxu1 }
  0xec   :  { %v647_v44 = vmax.f32 %v423_v37, 0.0  ;;  %v426_v46 = vadd.f32 %v1265_v43, %v1508_v34  ;;  %v417_v48 = vpop.f32.mrb[11].mxu0  ;;  %v679_v49 = vmax.f32 %v551_v40, 0.0  ;;  %v554_v51 = vadd.f32 %v1297_v47, %v1508_v34  ;;  %v545_v53 = vpop.f32.mrb[11].mxu1 }
  0xed   :  { %v645_v50 = vmax.f32 %v415_v41, 0.0  ;;  %v418_v52 = vadd.f32 %v1508_v34, %v417_v48  ;;  %v677_v55 = vmax.f32 %v543_v45, 0.0  ;;  %v546_v57 = vadd.f32 %v1508_v34, %v545_v53 }
  0xee   :  { %v1165_v54 = vpack.c.bf16 %v647_v44, %v647_v44  ;;  %v648_v56 = vmax.f32 %v426_v46, 0.0  ;;  %v1197_v58 = vpack.c.bf16 %v679_v49, %v679_v49  ;;  %v680_v60 = vmax.f32 %v554_v51, 0.0 }
  0xef   :  { %v1163_v59 = vpack.c.bf16 %v645_v50, %v645_v50  ;;  %v646_v61 = vmax.f32 %v418_v52, 0.0  ;;  %v1195_v62 = vpack.c.bf16 %v677_v55, %v677_v55  ;;  %v678_v0 = vmax.f32 %v546_v57, 0.0 }
  0xf0   :  { %968 = vst.msk [vmem:[%s1833_s3 + $0x28] sm:$0xf] %vm957_vm2, %v1165_v54  ;;  %v1166_v63 = vpack.c.bf16 %v648_v56, %v648_v56  ;;  %1000 = vst.msk [vmem:[%s1833_s3 + $0xa8] sm:$0xf] %vm957_vm2, %v1197_v58  ;;  %v1198_v1 = vpack.c.bf16 %v680_v60, %v680_v60 }
  0xf1   :  { %966 = vst.msk [vmem:[%s1833_s3 + $0x20] sm:$0xf] %vm957_vm2, %v1163_v59  ;;  %v1164_v2 = vpack.c.bf16 %v646_v61, %v646_v61  ;;  %v1268_v3 = vpop.f32.mrb[12].mxu0  ;;  %998 = vst.msk [vmem:[%s1833_s3 + $0xa0] sm:$0xf] %vm957_vm2, %v1195_v62  ;;  %v1196_v4 = vpack.c.bf16 %v678_v0, %v678_v0  ;;  %v1300_v6 = vpop.f32.mrb[12].mxu1 }
  0xf2   :  { %969 = vst.msk [vmem:[%s1833_s3 + $0x2c] sm:$0xf] %vm957_vm2, %v1166_v63  ;;  %v439_v5 = vadd.f32 %v1268_v3, %v1508_v34  ;;  %v430_v7 = vpop.f32.mrb[13].mxu0  ;;  %1001 = vst.msk [vmem:[%s1833_s3 + $0xac] sm:$0xf] %vm957_vm2, %v1198_v1  ;;  %v567_v8 = vadd.f32 %v1300_v6, %v1508_v34  ;;  %v558_v10 = vpop.f32.mrb[13].mxu1 }
  0xf3   :  { %967 = vst.msk [vmem:[%s1833_s3 + $0x24] sm:$0xf] %vm957_vm2, %v1164_v2  ;;  %v431_v9 = vadd.f32 %v1508_v34, %v430_v7  ;;  %v1269_v11 = vpop.f32.mrb[14].mxu0  ;;  %999 = vst.msk [vmem:[%s1833_s3 + $0xa4] sm:$0xf] %vm957_vm2, %v1196_v4  ;;  %v559_v13 = vadd.f32 %v1508_v34, %v558_v10  ;;  %v1301_v15 = vpop.f32.mrb[14].mxu1 }
  0xf4   :  { %v651_v12 = vmax.f32 %v439_v5, 0.0  ;;  %v442_v14 = vadd.f32 %v1269_v11, %v1508_v34  ;;  %v433_v16 = vpop.f32.mrb[15].mxu0  ;;  %v683_v17 = vmax.f32 %v567_v8, 0.0  ;;  %v570_v19 = vadd.f32 %v1301_v15, %v1508_v34  ;;  %v561_v21 = vpop.f32.mrb[15].mxu1 }
  0xf5   :  { %v649_v18 = vmax.f32 %v431_v9, 0.0  ;;  %v434_v20 = vadd.f32 %v1508_v34, %v433_v16  ;;  %v681_v23 = vmax.f32 %v559_v13, 0.0  ;;  %v562_v25 = vadd.f32 %v1508_v34, %v561_v21 }
  0xf6   :  { %v1169_v22 = vpack.c.bf16 %v651_v12, %v651_v12  ;;  %v652_v24 = vmax.f32 %v442_v14, 0.0  ;;  %v1201_v26 = vpack.c.bf16 %v683_v17, %v683_v17  ;;  %v684_v28 = vmax.f32 %v570_v19, 0.0 }
  0xf7   :  { %v1167_v27 = vpack.c.bf16 %v649_v18, %v649_v18  ;;  %v650_v29 = vmax.f32 %v434_v20, 0.0  ;;  %v1199_v30 = vpack.c.bf16 %v681_v23, %v681_v23  ;;  %v682_v32 = vmax.f32 %v562_v25, 0.0 }
  0xf8   :  { %972 = vst.msk [vmem:[%s1833_s3 + $0x38] sm:$0xf] %vm957_vm2, %v1169_v22  ;;  %v1170_v31 = vpack.c.bf16 %v652_v24, %v652_v24  ;;  %1004 = vst.msk [vmem:[%s1833_s3 + $0xb8] sm:$0xf] %vm957_vm2, %v1201_v26  ;;  %v1202_v33 = vpack.c.bf16 %v684_v28, %v684_v28 }
  0xf9   :  { %970 = vst.msk [vmem:[%s1833_s3 + $0x30] sm:$0xf] %vm957_vm2, %v1167_v27  ;;  %v1168_v35 = vpack.c.bf16 %v650_v29, %v650_v29  ;;  %v1272_v36 = vpop.f32.mrb[16].mxu0  ;;  %1002 = vst.msk [vmem:[%s1833_s3 + $0xb0] sm:$0xf] %vm957_vm2, %v1199_v30  ;;  %v1200_v37 = vpack.c.bf16 %v682_v32, %v682_v32  ;;  %v1304_v39 = vpop.f32.mrb[16].mxu1 }
  0xfa   :  { %973 = vst.msk [vmem:[%s1833_s3 + $0x3c] sm:$0xf] %vm957_vm2, %v1170_v31  ;;  %v455_v38 = vadd.f32 %v1272_v36, %v1508_v34  ;;  %v446_v40 = vpop.f32.mrb[17].mxu0  ;;  %1005 = vst.msk [vmem:[%s1833_s3 + $0xbc] sm:$0xf] %vm957_vm2, %v1202_v33  ;;  %v583_v41 = vadd.f32 %v1304_v39, %v1508_v34  ;;  %v574_v43 = vpop.f32.mrb[17].mxu1 }
  0xfb   :  { %971 = vst.msk [vmem:[%s1833_s3 + $0x34] sm:$0xf] %vm957_vm2, %v1168_v35  ;;  %v447_v42 = vadd.f32 %v1508_v34, %v446_v40  ;;  %v1273_v44 = vpop.f32.mrb[18].mxu0  ;;  %1003 = vst.msk [vmem:[%s1833_s3 + $0xb4] sm:$0xf] %vm957_vm2, %v1200_v37  ;;  %v575_v46 = vadd.f32 %v1508_v34, %v574_v43  ;;  %v1305_v48 = vpop.f32.mrb[18].mxu1 }
  0xfc   :  { %v655_v45 = vmax.f32 %v455_v38, 0.0  ;;  %v458_v47 = vadd.f32 %v1273_v44, %v1508_v34  ;;  %v449_v49 = vpop.f32.mrb[19].mxu0  ;;  %v687_v50 = vmax.f32 %v583_v41, 0.0  ;;  %v586_v52 = vadd.f32 %v1305_v48, %v1508_v34  ;;  %v577_v54 = vpop.f32.mrb[19].mxu1 }
  0xfd   :  { %v653_v51 = vmax.f32 %v447_v42, 0.0  ;;  %v450_v53 = vadd.f32 %v1508_v34, %v449_v49  ;;  %v685_v56 = vmax.f32 %v575_v46, 0.0  ;;  %v578_v58 = vadd.f32 %v1508_v34, %v577_v54 }
  0xfe   :  { %v1173_v55 = vpack.c.bf16 %v655_v45, %v655_v45  ;;  %v656_v57 = vmax.f32 %v458_v47, 0.0  ;;  %v1205_v59 = vpack.c.bf16 %v687_v50, %v687_v50  ;;  %v688_v61 = vmax.f32 %v586_v52, 0.0 }
  0xff   :  { %v1171_v60 = vpack.c.bf16 %v653_v51, %v653_v51  ;;  %v654_v62 = vmax.f32 %v450_v53, 0.0  ;;  %v1203_v63 = vpack.c.bf16 %v685_v56, %v685_v56  ;;  %v686_v1 = vmax.f32 %v578_v58, 0.0 }
 0x100   :  { %976 = vst.msk [vmem:[%s1833_s3 + $0x48] sm:$0xf] %vm957_vm2, %v1173_v55  ;;  %v1174_v0 = vpack.c.bf16 %v656_v57, %v656_v57  ;;  %1008 = vst.msk [vmem:[%s1833_s3 + $0xc8] sm:$0xf] %vm957_vm2, %v1205_v59  ;;  %v1206_v2 = vpack.c.bf16 %v688_v61, %v688_v61 }
 0x101   :  { %974 = vst.msk [vmem:[%s1833_s3 + $0x40] sm:$0xf] %vm957_vm2, %v1171_v60  ;;  %v1172_v3 = vpack.c.bf16 %v654_v62, %v654_v62  ;;  %v1276_v4 = vpop.f32.mrb[20].mxu0  ;;  %1006 = vst.msk [vmem:[%s1833_s3 + $0xc0] sm:$0xf] %vm957_vm2, %v1203_v63  ;;  %v1204_v5 = vpack.c.bf16 %v686_v1, %v686_v1  ;;  %v1308_v7 = vpop.f32.mrb[20].mxu1 }
 0x102   :  { %977 = vst.msk [vmem:[%s1833_s3 + $0x4c] sm:$0xf] %vm957_vm2, %v1174_v0  ;;  %v471_v6 = vadd.f32 %v1276_v4, %v1508_v34  ;;  %v462_v8 = vpop.f32.mrb[21].mxu0  ;;  %1009 = vst.msk [vmem:[%s1833_s3 + $0xcc] sm:$0xf] %vm957_vm2, %v1206_v2  ;;  %v599_v9 = vadd.f32 %v1308_v7, %v1508_v34  ;;  %v590_v11 = vpop.f32.mrb[21].mxu1 }
 0x103   :  { %975 = vst.msk [vmem:[%s1833_s3 + $0x44] sm:$0xf] %vm957_vm2, %v1172_v3  ;;  %v463_v10 = vadd.f32 %v1508_v34, %v462_v8  ;;  %v1277_v12 = vpop.f32.mrb[22].mxu0  ;;  %1007 = vst.msk [vmem:[%s1833_s3 + $0xc4] sm:$0xf] %vm957_vm2, %v1204_v5  ;;  %v591_v14 = vadd.f32 %v1508_v34, %v590_v11  ;;  %v1309_v16 = vpop.f32.mrb[22].mxu1 }
 0x104   :  { %v659_v13 = vmax.f32 %v471_v6, 0.0  ;;  %v474_v15 = vadd.f32 %v1277_v12, %v1508_v34  ;;  %v465_v17 = vpop.f32.mrb[23].mxu0  ;;  %v691_v18 = vmax.f32 %v599_v9, 0.0  ;;  %v602_v20 = vadd.f32 %v1309_v16, %v1508_v34  ;;  %v593_v22 = vpop.f32.mrb[23].mxu1 }
 0x105   :  { %v657_v19 = vmax.f32 %v463_v10, 0.0  ;;  %v466_v21 = vadd.f32 %v1508_v34, %v465_v17  ;;  %v689_v24 = vmax.f32 %v591_v14, 0.0  ;;  %v594_v26 = vadd.f32 %v1508_v34, %v593_v22 }
 0x106   :  { %v1177_v23 = vpack.c.bf16 %v659_v13, %v659_v13  ;;  %v660_v25 = vmax.f32 %v474_v15, 0.0  ;;  %v1209_v27 = vpack.c.bf16 %v691_v18, %v691_v18  ;;  %v692_v29 = vmax.f32 %v602_v20, 0.0 }
 0x107   :  { %v1175_v28 = vpack.c.bf16 %v657_v19, %v657_v19  ;;  %v658_v30 = vmax.f32 %v466_v21, 0.0  ;;  %v1207_v31 = vpack.c.bf16 %v689_v24, %v689_v24  ;;  %v690_v33 = vmax.f32 %v594_v26, 0.0 }
 0x108   :  { %980 = vst.msk [vmem:[%s1833_s3 + $0x58] sm:$0xf] %vm957_vm2, %v1177_v23  ;;  %v1178_v32 = vpack.c.bf16 %v660_v25, %v660_v25  ;;  %1012 = vst.msk [vmem:[%s1833_s3 + $0xd8] sm:$0xf] %vm957_vm2, %v1209_v27  ;;  %v1210_v35 = vpack.c.bf16 %v692_v29, %v692_v29 }
 0x109   :  { %978 = vst.msk [vmem:[%s1833_s3 + $0x50] sm:$0xf] %vm957_vm2, %v1175_v28  ;;  %v1176_v36 = vpack.c.bf16 %v658_v30, %v658_v30  ;;  %v1280_v37 = vpop.f32.mrb[24].mxu0  ;;  %1010 = vst.msk [vmem:[%s1833_s3 + $0xd0] sm:$0xf] %vm957_vm2, %v1207_v31  ;;  %v1208_v38 = vpack.c.bf16 %v690_v33, %v690_v33  ;;  %v1312_v40 = vpop.f32.mrb[24].mxu1 }
 0x10a   :  { %981 = vst.msk [vmem:[%s1833_s3 + $0x5c] sm:$0xf] %vm957_vm2, %v1178_v32  ;;  %v487_v39 = vadd.f32 %v1280_v37, %v1508_v34  ;;  %v478_v41 = vpop.f32.mrb[25].mxu0  ;;  %1013 = vst.msk [vmem:[%s1833_s3 + $0xdc] sm:$0xf] %vm957_vm2, %v1210_v35  ;;  %v615_v42 = vadd.f32 %v1312_v40, %v1508_v34  ;;  %v606_v44 = vpop.f32.mrb[25].mxu1 }
 0x10b   :  { %979 = vst.msk [vmem:[%s1833_s3 + $0x54] sm:$0xf] %vm957_vm2, %v1176_v36  ;;  %v479_v43 = vadd.f32 %v1508_v34, %v478_v41  ;;  %v1281_v45 = vpop.f32.mrb[26].mxu0  ;;  %1011 = vst.msk [vmem:[%s1833_s3 + $0xd4] sm:$0xf] %vm957_vm2, %v1208_v38  ;;  %v607_v47 = vadd.f32 %v1508_v34, %v606_v44  ;;  %v1313_v49 = vpop.f32.mrb[26].mxu1 }
 0x10c   :  { %v663_v46 = vmax.f32 %v487_v39, 0.0  ;;  %v490_v48 = vadd.f32 %v1281_v45, %v1508_v34  ;;  %v481_v50 = vpop.f32.mrb[27].mxu0  ;;  %v695_v51 = vmax.f32 %v615_v42, 0.0  ;;  %v618_v53 = vadd.f32 %v1313_v49, %v1508_v34  ;;  %v609_v55 = vpop.f32.mrb[27].mxu1 }
 0x10d   :  { %v661_v52 = vmax.f32 %v479_v43, 0.0  ;;  %v482_v54 = vadd.f32 %v1508_v34, %v481_v50  ;;  %v693_v57 = vmax.f32 %v607_v47, 0.0  ;;  %v610_v59 = vadd.f32 %v1508_v34, %v609_v55 }
 0x10e   :  { %v1181_v56 = vpack.c.bf16 %v663_v46, %v663_v46  ;;  %v664_v58 = vmax.f32 %v490_v48, 0.0  ;;  %v1213_v60 = vpack.c.bf16 %v695_v51, %v695_v51  ;;  %v696_v62 = vmax.f32 %v618_v53, 0.0 }
 0x10f   :  { %v1179_v61 = vpack.c.bf16 %v661_v52, %v661_v52  ;;  %v662_v63 = vmax.f32 %v482_v54, 0.0  ;;  %v1211_v0 = vpack.c.bf16 %v693_v57, %v693_v57  ;;  %v694_v2 = vmax.f32 %v610_v59, 0.0 }
 0x110   :  { %984 = vst.msk [vmem:[%s1833_s3 + $0x68] sm:$0xf] %vm957_vm2, %v1181_v56  ;;  %v1182_v1 = vpack.c.bf16 %v664_v58, %v664_v58  ;;  %1016 = vst.msk [vmem:[%s1833_s3 + $0xe8] sm:$0xf] %vm957_vm2, %v1213_v60  ;;  %v1214_v3 = vpack.c.bf16 %v696_v62, %v696_v62 }
 0x111   :  { %982 = vst.msk [vmem:[%s1833_s3 + $0x60] sm:$0xf] %vm957_vm2, %v1179_v61  ;;  %v1180_v4 = vpack.c.bf16 %v662_v63, %v662_v63  ;;  %v1284_v5 = vpop.f32.mrb[28].mxu0  ;;  %1014 = vst.msk [vmem:[%s1833_s3 + $0xe0] sm:$0xf] %vm957_vm2, %v1211_v0  ;;  %v1212_v6 = vpack.c.bf16 %v694_v2, %v694_v2  ;;  %v1316_v8 = vpop.f32.mrb[28].mxu1 }
 0x112   :  { %985 = vst.msk [vmem:[%s1833_s3 + $0x6c] sm:$0xf] %vm957_vm2, %v1182_v1  ;;  %v503_v7 = vadd.f32 %v1284_v5, %v1508_v34  ;;  %v494_v9 = vpop.f32.mrb[29].mxu0  ;;  %1017 = vst.msk [vmem:[%s1833_s3 + $0xec] sm:$0xf] %vm957_vm2, %v1214_v3  ;;  %v631_v10 = vadd.f32 %v1316_v8, %v1508_v34  ;;  %v622_v12 = vpop.f32.mrb[29].mxu1 }
 0x113   :  { %983 = vst.msk [vmem:[%s1833_s3 + $0x64] sm:$0xf] %vm957_vm2, %v1180_v4  ;;  %v495_v11 = vadd.f32 %v1508_v34, %v494_v9  ;;  %v1285_v13 = vpop.f32.mrb[30].mxu0  ;;  %1015 = vst.msk [vmem:[%s1833_s3 + $0xe4] sm:$0xf] %vm957_vm2, %v1212_v6  ;;  %v623_v15 = vadd.f32 %v1508_v34, %v622_v12  ;;  %v1317_v17 = vpop.f32.mrb[30].mxu1 }
 0x114   :  { %v667_v14 = vmax.f32 %v503_v7, 0.0  ;;  %v506_v16 = vadd.f32 %v1285_v13, %v1508_v34  ;;  %v497_v18 = vpop.f32.mrb[31].mxu0  ;;  %v699_v19 = vmax.f32 %v631_v10, 0.0  ;;  %v634_v21 = vadd.f32 %v1317_v17, %v1508_v34  ;;  %v625_v23 = vpop.f32.mrb[31].mxu1 }
 0x115   :  { %v665_v20 = vmax.f32 %v495_v11, 0.0  ;;  %v498_v22 = vadd.f32 %v1508_v34, %v497_v18  ;;  %v697_v25 = vmax.f32 %v623_v15, 0.0  ;;  %v626_v27 = vadd.f32 %v1508_v34, %v625_v23 }
 0x116   :  { %v1185_v24 = vpack.c.bf16 %v667_v14, %v667_v14  ;;  %v668_v26 = vmax.f32 %v506_v16, 0.0  ;;  %v1217_v28 = vpack.c.bf16 %v699_v19, %v699_v19  ;;  %v700_v30 = vmax.f32 %v634_v21, 0.0 }
 0x117   :  { %v1183_v29 = vpack.c.bf16 %v665_v20, %v665_v20  ;;  %v666_v31 = vmax.f32 %v498_v22, 0.0  ;;  %v1215_v32 = vpack.c.bf16 %v697_v25, %v697_v25  ;;  %v698_v35 = vmax.f32 %v626_v27, 0.0 }
 0x118   :  { %988 = vst.msk [vmem:[%s1833_s3 + $0x78] sm:$0xf] %vm957_vm2, %v1185_v24  ;;  %v1186_v33 = vpack.c.bf16 %v668_v26, %v668_v26  ;;  %1020 = vst.msk [vmem:[%s1833_s3 + $0xf8] sm:$0xf] %vm957_vm2, %v1217_v28  ;;  %v1218_v34 = vpack.c.bf16 %v700_v30, %v700_v30 }
 0x119   :  { %986 = vst.msk [vmem:[%s1833_s3 + $0x70] sm:$0xf] %vm957_vm2, %v1183_v29  ;;  %v1184_v36 = vpack.c.bf16 %v666_v31, %v666_v31  ;;  %1018 = vst.msk [vmem:[%s1833_s3 + $0xf0] sm:$0xf] %vm957_vm2, %v1215_v32  ;;  %v1216_v37 = vpack.c.bf16 %v698_v35, %v698_v35 }
 0x11a   :  { %989 = vst.msk [vmem:[%s1833_s3 + $0x7c] sm:$0xf] %vm957_vm2, %v1186_v33  ;;  %1021 = vst.msk [vmem:[%s1833_s3 + $0xfc] sm:$0xf] %vm957_vm2, %v1218_v34 }
 0x11b   :  { %987 = vst.msk [vmem:[%s1833_s3 + $0x74] sm:$0xf] %vm957_vm2, %v1184_v36  ;;  %1019 = vst.msk [vmem:[%s1833_s3 + $0xf4] sm:$0xf] %vm957_vm2, %v1216_v37 }

// kernel: bottleneck_forward.5
= control target key start
LH: loop header
LB: loop body
LE: loop exit
PB: predicated region body
PF: predicated region fallthrough
CT: control target
= control target key end

     0   :  { %vm114_vm0 = vcmask 1041408   ;;  %vm297_vm1 = vcmask 1043456   ;;  %vm89_vm2 = vcmask 31744   ;;  %vm272_vm3 = vcmask 64512   ;;  %s829_s0 = inlined_call_operand.vmem [shape: bf16[128,4], index: 0, kind: input, shape index: {}]   ;;  %s830_s1 = inlined_call_operand.vmem [shape: bf16[4,16], index: 1, kind: input, shape index: {}]   ;;  %s831_s2 = inlined_call_operand.vmem [shape: f32[1,16], index: 2, kind: input, shape index: {}]   ;;  %s832_s3 = inlined_call_operand.vmem [shape: bf16[128,8], index: 3, kind: input, shape index: {}]   ;;  %s833_s4 = inlined_call_operand.vmem [shape: bf16[8,16], index: 4, kind: input, shape index: {}]   ;;  %s834_s5 = inlined_call_operand.vmem [shape: f32[1,16], index: 5, kind: input, shape index: {}]   ;;  %s835_s6 = inlined_call_operand.hbm [shape: f32[128,16], index: 6, kind: output, shape index: {}]  }
   0x1   :  { %v41_v0 = vld [vmem:[%s830_s1] sm:$0x3]  ;;  %v613_v6 = vld [vmem:[%s829_s0 + $0x8] sm:$0xff]   ;;  %v615_v8 = vld [vmem:[%s829_s0 + $0x10] sm:$0xff]  }
   0x2   :  { %v231_v1 = vld [vmem:[%s833_s4] sm:$0xf]  ;;  %606 = vmatprep.subr.msk.bf16.mxu1 %vm114_vm0, %v41_v0  ;;  %v116_v2 = vsel %vm114_vm0, %v41_v0, 0  ;;  %v614_v7 = vld [vmem:[%s832_s3 + $0x8] sm:$0xff]   ;;  %v616_v9 = vld [vmem:[%s832_s3 + $0x10] sm:$0xff]  }
   0x3   :  { %607 = vmatprep.subr.msk.bf16.mxu0 %vm297_vm1, %v231_v1  ;;  %v299_v3 = vsel %vm297_vm1, %v231_v1, 0  ;;  %539 = vmatpush3.bf16.msra.mxu1 %v116_v2  ;;  %v611_v4 = vld [vmem:[%s829_s0] sm:$0xff]   ;;  %v617_v10 = vld [vmem:[%s829_s0 + $0x18] sm:$0xff]  }
   0x4   :  { %557 = vmatpush3.bf16.msra.mxu0 %v299_v3  ;;  %v612_v5 = vld [vmem:[%s832_s3] sm:$0xff]   ;;  %540 = vmatprep.mubr.msk.bf16.mxu1 %vm89_vm2, %v611_v4  ;;  %v618_v11 = vld [vmem:[%s832_s3 + $0x18] sm:$0xff]  }
   0x5   :  { %558 = vmatprep.mubr.msk.bf16.mxu0 %vm272_vm3, %v612_v5  ;;  %v619_v12 = vld [vmem:[%s829_s0 + $0x20] sm:$0xff]  }
   0x6   :  { %541 = vmatmul.mubr.msk.bf16.vlgmr.msra.gmra.mrb[0].mxu1 %vm89_vm2, %v613_v6  ;;  %v620_v13 = vld [vmem:[%s832_s3 + $0x20] sm:$0xff]  }
   0x7   :  { %559 = vmatmul.mubr.msk.bf16.vlgmr.msra.gmra.mrb[0].mxu0 %vm272_vm3, %v614_v7  ;;  %544 = vmatprep.mubr.msk.bf16.mxu1 %vm89_vm2, %v615_v8 }
   0x8   :  { %562 = vmatprep.mubr.msk.bf16.mxu0 %vm272_vm3, %v616_v9 }
   0xe   :  { %545 = vmatmul.mubr.msk.bf16.gmra.mrb[4].mxu1 %vm89_vm2, %v617_v10 }
   0xf   :  { %563 = vmatmul.mubr.msk.bf16.gmra.mrb[4].mxu0 %vm272_vm3, %v618_v11  ;;  %548 = vmatprep.mubr.msk.bf16.mxu1 %vm89_vm2, %v619_v12 }
  0x10   :  { %566 = vmatprep.mubr.msk.bf16.mxu0 %vm272_vm3, %v620_v13 }
  0x11   :  { %11 = vsyncpa [#allocation3], 0  ;;  %v621_v14 = vld [vmem:[%s829_s0 + $0x28] sm:$0xff]   ;;  %v623_v16 = vld [vmem:[%s829_s0 + $0x30] sm:$0xff]   ;;  %vm453_vm4 = vcmask 130048  }
  0x12   :  { %v622_v15 = vld [vmem:[%s832_s3 + $0x28] sm:$0xff]   ;;  %v624_v17 = vld [vmem:[%s832_s3 + $0x30] sm:$0xff]   ;;  %v625_v18 = vld [vmem:[%s829_s0 + $0x38] sm:$0xff]  }
  0x13   :  { %v626_v19 = vld [vmem:[%s832_s3 + $0x38] sm:$0xff]   ;;  %v762_v20 = vld [vmem:[%s831_s2] ss:$0 sm:$0xff]  ;;  %s651_s2 = smov [#allocation2]  }
  0x14   :  { %v768_v25 = vld [vmem:[%s834_s5] ss:$0 sm:$0xff]  ;;  %s475_s3 = sshll.u32 %s651_s2, 4  ;;  %s476_s3 = int_to_ptr.vmem [resolvable:$true] %s475_s3 }
  0x15   :  { %s627_s5 = scalar_lea.vmem %s476_s3, 2048  ;;  %p632_p1 = scmp.lt.s32.totalorder %s476_s3, %s476_s3 }
  0x16   :  { %549 = vmatmul.mubr.msk.bf16.gmra.mrb[8].mxu1 %vm89_vm2, %v621_v14  ;;  %p628_p0 = scmp.ne.s32.totalorder %s476_s3, %s627_s5  ;;  %p633_p2 = scmp.lt.s32.totalorder %s627_s5, %s627_s5 }
  0x17   :  { %567 = vmatmul.mubr.msk.bf16.gmra.mrb[8].mxu0 %vm272_vm3, %v622_v15  ;;  %552 = vmatprep.mubr.msk.bf16.mxu1 %vm89_vm2, %v623_v16 }
  0x18   :  { %570 = vmatprep.mubr.msk.bf16.mxu0 %vm272_vm3, %v624_v17  ;;  %p634_p3 = por %p633_p2, %p632_p1 }
  0x1a   :  { %p635_p4 = pnand %p634_p3, %p628_p0 }
  0x1e   :  { %553 = vmatmul.mubr.msk.bf16.gmra.mrb[12].mxu1 %vm89_vm2, %v625_v18 }
  0x1f   :  { %571 = vmatmul.mubr.msk.bf16.gmra.mrb[12].mxu0 %vm272_vm3, %v626_v19 }
  0xd9   :  { %v542_v21 = vpop.f32.mrb[0].mxu1 }
  0xda   :  { %v161_v22 = vadd.f32 %v542_v21, %v762_v20  ;;  %v560_v23 = vpop.f32.mrb[0].mxu0  ;;  %v152_v24 = vpop.f32.mrb[1].mxu1 }
  0xdb   :  { %v153_v26 = vadd.f32 %v762_v20, %v152_v24  ;;  %v335_v27 = vpop.f32.mrb[1].mxu0  ;;  %v543_v28 = vpop.f32.mrb[2].mxu1 }
  0xdc   :  { %v400_v29 = vadd.f32 %v560_v23, %v161_v22  ;;  %v164_v30 = vadd.f32 %v543_v28, %v762_v20  ;;  %v561_v31 = vpop.f32.mrb[2].mxu0  ;;  %v155_v32 = vpop.f32.mrb[3].mxu1 }
  0xdd   :  { %v398_v33 = vadd.f32 %v335_v27, %v153_v26  ;;  %v156_v34 = vadd.f32 %v762_v20, %v155_v32  ;;  %v338_v35 = vpop.f32.mrb[3].mxu0 }
  0xde   :  { %v423_v36 = vadd.f32 %v768_v25, %v400_v29  ;;  %v401_v37 = vadd.f32 %v561_v31, %v164_v30 }
  0xdf   :  { %v421_v38 = vadd.f32 %v768_v25, %v398_v33  ;;  %v399_v39 = vadd.f32 %v338_v35, %v156_v34 }
  0xe0   :  { %v439_v40 = vmax.f32 %v423_v36, 0.0  ;;  %v424_v41 = vadd.f32 %v768_v25, %v401_v37 }
  0xe1   :  { %v437_v42 = vmax.f32 %v421_v38, 0.0  ;;  %v422_v43 = vadd.f32 %v768_v25, %v399_v39  ;;  %v546_v44 = vpop.f32.mrb[4].mxu1 }
  0xe2   :  { %456 = vst.msk [vmem:[#allocation2 + $0x10] sm:$0xff] %vm453_vm4, %v439_v40  ;;  %v440_v45 = vmax.f32 %v424_v41, 0.0  ;;  %v177_v46 = vadd.f32 %v546_v44, %v762_v20  ;;  %v564_v47 = vpop.f32.mrb[4].mxu0  ;;  %v168_v48 = vpop.f32.mrb[5].mxu1 }
  0xe3   :  { %454 = vst.msk [vmem:[#allocation2] sm:$0xff] %vm453_vm4, %v437_v42  ;;  %v438_v49 = vmax.f32 %v422_v43, 0.0  ;;  %v169_v50 = vadd.f32 %v762_v20, %v168_v48  ;;  %v351_v51 = vpop.f32.mrb[5].mxu0  ;;  %v547_v52 = vpop.f32.mrb[6].mxu1 }
  0xe4   :  { %457 = vst.msk [vmem:[#allocation2 + $0x18] sm:$0xff] %vm453_vm4, %v440_v45  ;;  %v404_v53 = vadd.f32 %v564_v47, %v177_v46  ;;  %v180_v54 = vadd.f32 %v547_v52, %v762_v20  ;;  %v565_v55 = vpop.f32.mrb[6].mxu0  ;;  %v171_v56 = vpop.f32.mrb[7].mxu1 }
  0xe5   :  { %455 = vst.msk [vmem:[#allocation2 + $0x8] sm:$0xff] %vm453_vm4, %v438_v49  ;;  %v402_v57 = vadd.f32 %v351_v51, %v169_v50  ;;  %v172_v58 = vadd.f32 %v762_v20, %v171_v56  ;;  %v354_v59 = vpop.f32.mrb[7].mxu0 }
  0xe6   :  { %v427_v60 = vadd.f32 %v768_v25, %v404_v53  ;;  %v405_v61 = vadd.f32 %v565_v55, %v180_v54 }
  0xe7   :  { %v425_v62 = vadd.f32 %v768_v25, %v402_v57  ;;  %v403_v63 = vadd.f32 %v354_v59, %v172_v58 }
  0xe8   :  { %v443_v0 = vmax.f32 %v427_v60, 0.0  ;;  %v428_v1 = vadd.f32 %v768_v25, %v405_v61 }
  0xe9   :  { %v441_v2 = vmax.f32 %v425_v62, 0.0  ;;  %v426_v3 = vadd.f32 %v768_v25, %v403_v63  ;;  %v550_v4 = vpop.f32.mrb[8].mxu1 }
  0xea   :  { %460 = vst.msk [vmem:[#allocation2 + $0x30] sm:$0xff] %vm453_vm4, %v443_v0  ;;  %v444_v5 = vmax.f32 %v428_v1, 0.0  ;;  %v193_v6 = vadd.f32 %v550_v4, %v762_v20  ;;  %v568_v7 = vpop.f32.mrb[8].mxu0  ;;  %v184_v8 = vpop.f32.mrb[9].mxu1 }
  0xeb   :  { %458 = vst.msk [vmem:[#allocation2 + $0x20] sm:$0xff] %vm453_vm4, %v441_v2  ;;  %v442_v9 = vmax.f32 %v426_v3, 0.0  ;;  %v185_v10 = vadd.f32 %v762_v20, %v184_v8  ;;  %v367_v11 = vpop.f32.mrb[9].mxu0  ;;  %v551_v12 = vpop.f32.mrb[10].mxu1 }
  0xec   :  { %461 = vst.msk [vmem:[#allocation2 + $0x38] sm:$0xff] %vm453_vm4, %v444_v5  ;;  %v408_v13 = vadd.f32 %v568_v7, %v193_v6  ;;  %v196_v14 = vadd.f32 %v551_v12, %v762_v20  ;;  %v569_v15 = vpop.f32.mrb[10].mxu0  ;;  %v187_v16 = vpop.f32.mrb[11].mxu1 }
  0xed   :  { %459 = vst.msk [vmem:[#allocation2 + $0x28] sm:$0xff] %vm453_vm4, %v442_v9  ;;  %v406_v17 = vadd.f32 %v367_v11, %v185_v10  ;;  %v188_v18 = vadd.f32 %v762_v20, %v187_v16  ;;  %v370_v19 = vpop.f32.mrb[11].mxu0 }
  0xee   :  { %v431_v21 = vadd.f32 %v768_v25, %v408_v13  ;;  %v409_v22 = vadd.f32 %v569_v15, %v196_v14 }
  0xef   :  { %v429_v23 = vadd.f32 %v768_v25, %v406_v17  ;;  %v407_v24 = vadd.f32 %v370_v19, %v188_v18 }
  0xf0   :  { %v447_v26 = vmax.f32 %v431_v21, 0.0  ;;  %v432_v27 = vadd.f32 %v768_v25, %v409_v22 }
  0xf1   :  { %v445_v28 = vmax.f32 %v429_v23, 0.0  ;;  %v430_v29 = vadd.f32 %v768_v25, %v407_v24  ;;  %v554_v30 = vpop.f32.mrb[12].mxu1 }
  0xf2   :  { %464 = vst.msk [vmem:[#allocation2 + $0x50] sm:$0xff] %vm453_vm4, %v447_v26  ;;  %v448_v31 = vmax.f32 %v432_v27, 0.0  ;;  %v209_v32 = vadd.f32 %v554_v30, %v762_v20  ;;  %v572_v33 = vpop.f32.mrb[12].mxu0  ;;  %v200_v34 = vpop.f32.mrb[13].mxu1 }
  0xf3   :  { %462 = vst.msk [vmem:[#allocation2 + $0x40] sm:$0xff] %vm453_vm4, %v445_v28  ;;  %v446_v35 = vmax.f32 %v430_v29, 0.0  ;;  %v201_v36 = vadd.f32 %v762_v20, %v200_v34  ;;  %v383_v37 = vpop.f32.mrb[13].mxu0  ;;  %v555_v38 = vpop.f32.mrb[14].mxu1 }
  0xf4   :  { %465 = vst.msk [vmem:[#allocation2 + $0x58] sm:$0xff] %vm453_vm4, %v448_v31  ;;  %v412_v39 = vadd.f32 %v572_v33, %v209_v32  ;;  %v212_v40 = vadd.f32 %v555_v38, %v762_v20  ;;  %v573_v41 = vpop.f32.mrb[14].mxu0  ;;  %v203_v42 = vpop.f32.mrb[15].mxu1 }
  0xf5   :  { %463 = vst.msk [vmem:[#allocation2 + $0x48] sm:$0xff] %vm453_vm4, %v446_v35  ;;  %v410_v43 = vadd.f32 %v383_v37, %v201_v36  ;;  %v204_v44 = vadd.f32 %v762_v20, %v203_v42  ;;  %v386_v45 = vpop.f32.mrb[15].mxu0 }
  0xf6   :  { %v435_v46 = vadd.f32 %v768_v25, %v412_v39  ;;  %v413_v47 = vadd.f32 %v573_v41, %v212_v40 }
  0xf7   :  { %v433_v48 = vadd.f32 %v768_v25, %v410_v43  ;;  %v411_v49 = vadd.f32 %v386_v45, %v204_v44 }
  0xf8   :  { %v451_v50 = vmax.f32 %v435_v46, 0.0  ;;  %v436_v51 = vadd.f32 %v768_v25, %v413_v47 }
  0xf9   :  { %v449_v52 = vmax.f32 %v433_v48, 0.0  ;;  %v434_v53 = vadd.f32 %v768_v25, %v411_v49 }
  0xfa   :  { %468 = vst.msk [vmem:[#allocation2 + $0x70] sm:$0xff] %vm453_vm4, %v451_v50  ;;  %v452_v54 = vmax.f32 %v436_v51, 0.0 }
  0xfb   :  { %466 = vst.msk [vmem:[#allocation2 + $0x60] sm:$0xff] %vm453_vm4, %v449_v52  ;;  %v450_v20 = vmax.f32 %v434_v53, 0.0 }
  0xfc   :  { %469 = vst.msk [vmem:[#allocation2 + $0x78] sm:$0xff] %vm453_vm4, %v452_v54 }
  0xfd   :  { %467 = vst.msk [vmem:[#allocation2 + $0x68] sm:$0xff] %vm453_vm4, %v450_v20 }
  0xfe   :  { %638 = shalt.err (!%p635_p4)
}
  0xff   :  { %s639_s10 = scalar_lea.hbm %s835_s6, 2048 }
 0x100   :  { %p640_p5 = scmp.ne.s32.totalorder %s835_s6, %s639_s10  ;;  %p643_p6 = scmp.lt.u32.totalorder %s639_s10, %s835_s6 }
 0x102   :  { %p645_p7 = pnand %p643_p6, %p640_p5 }
 0x104   :  { %648 = shalt.err (!%p645_p7)
}
 0x105   :  { %s652_s15 = smov 128   ;;  %s653_s16 = smov 8  }
 0x106   :  { %481 = dma.vmem_to_hbm [thread:$0]  %s476_s3, 2048, %s835_s6, [#allocation3], %s652_s15, %s652_s15, %s653_s16  }
 0x107   :  { %649 = dma.done.wait [#allocation3], 2048  }
 0x108   :  { %650 = vsyncadd [#allocation3], 4294965248 }
 0x109   :  { %485 = vsyncpa [#allocation3], 1 }

// kernel: bottleneck_forward.4
= control target key start
LH: loop header
LB: loop body
LE: loop exit
PB: predicated region body
PF: predicated region fallthrough
CT: control target
= control target key end

     0   :  { %vm149_vm0 = vcmask 1041408   ;;  %vm15_vm1 = vcmask 31744   ;;  %vm298_vm2 = vsmask.f32 3328  ;;  %vm299_vm3 = vsmask.f32 7440  ;;  %s4118_s1 = inlined_call_operand.vmem [shape: bf16[9,4,4], index: 1, kind: input, shape index: {}]   ;;  %s4119_s0 = inlined_call_operand.vmem [shape: bf16[4,2,9,9,4], index: 0, kind: input, shape index: {}]   ;;  %s4120_s2 = inlined_call_operand.vmem [shape: f32[1,4], index: 2, kind: input, shape index: {}]   ;;  %s4121_s3 = inlined_call_operand.vmem [shape: bf16[2,8,8,4], index: 3, kind: output, shape index: {}]  }
   0x1   :  { %v84_v0 = vld [vmem:[%s4118_s1] sm:$0x3]  ;;  %v50_v1 = vld [vmem:[%s4119_s0 + $0x48] sm:$0xf]  ;;  %v3069_v2 = vld [vmem:[%s4119_s0 + $0x50] sm:$0xf] }
   0x2   :  { %2981 = vmatprep.subr.msk.bf16.mxu1 %vm149_vm0, %v84_v0  ;;  %v151_v3 = vsel %vm149_vm0, %v84_v0, 0  ;;  %v2520_v4 = vcombine.low %v50_v1, %v3069_v2  ;;  %v414_v5 = vshrl.u32 %v50_v1, 16  ;;  %v417_v6 = vshll.u32 %v50_v1, 16  ;;  %v3077_v7 = vld [vmem:[%s4119_s0 + $0x58] sm:$0xf]  ;;  %2980 = vmatprep.subr.msk.bf16.mxu0 %vm149_vm0, %v84_v0  ;;  %vm3226_vm4 = vmor %vm298_vm2, %vm299_vm3 }
   0x3   :  { %2979 = vmatpush3.bf16.msra.mxu1 %v151_v3  ;;  %v428_v8 = vshrl.u32 %v3069_v2, 16  ;;  %v431_v9 = vshll.u32 %v3069_v2, 16  ;;  %v3085_v10 = vld [vmem:[%s4119_s0 + $0x60] sm:$0xf]  ;;  %v442_v11 = vshrl.u32 %v3077_v7, 16  ;;  %v445_v12 = vshll.u32 %v3077_v7, 16  ;;  %2817 = vmatpush3.bf16.msra.mxu0 %v151_v3 }
   0x4   :  { %2826 = vmatprep.mubr.msk.bf16.mxu1 %vm15_vm1, %v2520_v4  ;;  %v416_v13 = vrot.slane %v414_v5, 4  ;;  %v419_v14 = vrot.slane %v417_v6, 5  ;;  %v2521_v15 = vcombine.low %v3077_v7, %v3085_v10  ;;  %v456_v16 = vshrl.u32 %v3085_v10, 16  ;;  %v2532_v17 = vld [vmem:[%s4118_s1 + $0x4] sm:$0x3] }
   0x5   :  { %v430_v18 = vrot.slane %v428_v8, 4  ;;  %v433_v19 = vrot.slane %v431_v9, 5  ;;  %v459_v20 = vshll.u32 %v3085_v10, 16  ;;  %2982 = vmatprep.subr.msk.bf16.mxu1 %vm149_vm0, %v2532_v17  ;;  %v576_v21 = vsel %vm149_vm0, %v2532_v17, 0  ;;  %v32_v22 = vld [vmem:[%s4119_s0] sm:$0xf] }
   0x6   :  { %v420_v23 = vor.u32 %v419_v14, %v416_v13  ;;  %2827 = vmatmul.mubr.msk.bf16.vlgmr.msra.gmra.mrb[0].mxu1 %vm15_vm1, %v2521_v15  ;;  %v3106_v24 = vld [vmem:[%s4119_s0 + $0x8] sm:$0xf]  ;;  %v302_v25 = vshrl.u32 %v32_v22, 16  ;;  %v305_v26 = vshll.u32 %v32_v22, 16  ;;  %v3111_v27 = vld [vmem:[%s4119_s0 + $0x10] sm:$0xf]  ;;  %v2554_v9 = vcombine.low %v3069_v2, %v3077_v7 }
   0x7   :  { %v434_v28 = vor.u32 %v433_v19, %v430_v18  ;;  %2835 = vmatpush3.bf16.msra.mxu1 %v576_v21  ;;  %v2516_v29 = vcombine.low %v32_v22, %v3106_v24  ;;  %v316_v30 = vshrl.u32 %v3106_v24, 16  ;;  %v319_v31 = vshll.u32 %v3106_v24, 16  ;;  %v3119_v32 = vld [vmem:[%s4119_s0 + $0x18] sm:$0xf]  ;;  %v3126_v36 = vld [vmem:[%s4119_s0 + $0x68] sm:$0xf] }
   0x8   :  { %v304_v33 = vrot.slane %v302_v25, 4  ;;  %v307_v34 = vrot.slane %v305_v26, 5  ;;  %v2517_v35 = vcombine.low %v3111_v27, %v3119_v32  ;;  %v3131_v37 = vld [vmem:[%s4119_s0 + $0x70] sm:$0xf]  ;;  %v3133_v38 = vrot.slane %v420_v23, 4 }
   0x9   :  { %2818 = vmatprep.mubr.msk.bf16.mxu0 %vm15_vm1, %v2516_v29  ;;  %v318_v39 = vrot.slane %v316_v30, 4  ;;  %v321_v40 = vrot.slane %v319_v31, 5  ;;  %v330_v41 = vshrl.u32 %v3111_v27, 16  ;;  %v333_v43 = vshll.u32 %v3111_v27, 16  ;;  %v3144_v46 = vld [vmem:[%s4119_s0 + $0x78] sm:$0xf] }
   0xa   :  { %v308_v42 = vor.u32 %v307_v34, %v304_v33  ;;  %2819 = vmatmul.mubr.msk.bf16.vlgmr.msra.gmra.mrb[0].mxu0 %vm15_vm1, %v2517_v35  ;;  %v344_v44 = vshrl.u32 %v3119_v32, 16  ;;  %v347_v45 = vshll.u32 %v3119_v32, 16  ;;  %v3146_v47 = vrot.slane %v434_v28, 4  ;;  %v3153_v51 = vld [vmem:[%s4119_s0 + $0x80] sm:$0xf] }
   0xb   :  { %v322_v48 = vor.u32 %v321_v40, %v318_v39  ;;  %v332_v49 = vrot.slane %v330_v41, 4  ;;  %v2522_v50 = vcombine.low %v3126_v36, %v3131_v37  ;;  %v2549_v52 = vld [vmem:[%s4118_s1 + $0xc] sm:$0x3]  ;;  %v335_v53 = vrot.slane %v333_v43, 5  ;;  %v3164_v59 = vld [vmem:[%s4119_s0 + $0x20] sm:$0xf] }
   0xc   :  { %v346_v54 = vrot.slane %v344_v44, 4  ;;  %v349_v55 = vrot.slane %v347_v45, 5  ;;  %v470_v56 = vshrl.u32 %v3126_v36, 16  ;;  %2983 = vmatprep.subr.msk.bf16.mxu0 %vm149_vm0, %v2549_v52  ;;  %v309_v57 = vrot.slane %v308_v42, 4  ;;  %v3169_v60 = vld [vmem:[%s4119_s0 + $0x28] sm:$0xf] }
   0xd   :  { %v323_v58 = vrot.slane %v322_v48, 4  ;;  %2830 = vmatprep.mubr.msk.bf16.mxu1 %vm15_vm1, %v2522_v50  ;;  %v336_v61 = vor.u32 %v335_v53, %v332_v49  ;;  %v473_v63 = vshll.u32 %v3126_v36, 16  ;;  %v2523_v0 = vcombine.low %v3144_v46, %v3153_v51  ;;  %v3177_v1 = vld [vmem:[%s4119_s0 + $0x30] sm:$0xf]  ;;  %v3182_v3 = vld [vmem:[%s4119_s0 + $0x38] sm:$0xf] }
   0xe   :  { %v350_v62 = vor.u32 %v349_v55, %v346_v54  ;;  %v484_v4 = vshrl.u32 %v3131_v37, 16  ;;  %v762_v5 = vsel %vm149_vm0, %v2549_v52, 0  ;;  %v33_v6 = vld [vmem:[%s4119_s0 + $0x4] sm:$0x1]  ;;  %v35_v8 = vld [vmem:[%s4119_s0 + $0xc] sm:$0x1]  ;;  %v2518_v15 = vcombine.low %v3164_v59, %v3169_v60 }
   0xf   :  { %v337_v13 = vrot.slane %v336_v61, 4  ;;  %2831 = vmatmul.mubr.msk.bf16.gmra.mrb[4].mxu1 %vm15_vm1, %v2523_v0  ;;  %2853 = vmatpush3.bf16.msra.mxu0 %v762_v5  ;;  %v358_v17 = vshrl.u32 %v3164_v59, 16  ;;  %v37_v18 = vld [vmem:[%s4119_s0 + $0x14] sm:$0x1]  ;;  %v361_v19 = vshll.u32 %v3164_v59, 16  ;;  %v372_v21 = vshrl.u32 %v3169_v60, 16 }
  0x10   :  { %v351_v14 = vrot.slane %v350_v62, 4  ;;  %v375_v22 = vshll.u32 %v3169_v60, 16  ;;  %v2551_v23 = vcombine.low %v3119_v32, %v3164_v59  ;;  %v39_v25 = vld [vmem:[%s4119_s0 + $0x1c] sm:$0x1]  ;;  %2822 = vmatprep.mubr.msk.bf16.mxu0 %vm15_vm1, %v2518_v15  ;;  %v2519_v26 = vcombine.low %v3177_v1, %v3182_v3  ;;  %v2566_v31 = vld [vmem:[%s4118_s1 + $0x10] sm:$0x3] }
  0x11   :  { %v386_v28 = vshrl.u32 %v3177_v1, 16  ;;  %v389_v29 = vshll.u32 %v3177_v1, 16  ;;  %v400_v30 = vshrl.u32 %v3182_v3, 16  ;;  %v403_v32 = vshll.u32 %v3182_v3, 16  ;;  %2984 = vmatprep.subr.msk.bf16.mxu1 %vm149_vm0, %v2566_v31  ;;  %v41_v39 = vld [vmem:[%s4119_s0 + $0x24] sm:$0x1] }
  0x12   :  { %v311_v33 = vshll.u32 %v33_v6, 16  ;;  %v325_v34 = vshll.u32 %v35_v8, 16  ;;  %v339_v35 = vshll.u32 %v37_v18, 16  ;;  %2823 = vmatmul.mubr.msk.bf16.gmra.mrb[4].mxu0 %vm15_vm1, %v2519_v26  ;;  %v353_v41 = vshll.u32 %v39_v25, 16  ;;  %v43_v53 = vld [vmem:[%s4119_s0 + $0x2c] sm:$0x1] }
  0x13   :  { %v974_v42 = vsel %vm149_vm0, %v2566_v31, 0  ;;  %v360_v43 = vrot.slane %v358_v17, 4  ;;  %v363_v44 = vrot.slane %v361_v19, 5  ;;  %v367_v50 = vshll.u32 %v41_v39, 16  ;;  %v45_v6 = vld [vmem:[%s4119_s0 + $0x34] sm:$0x1] }
  0x14   :  { %v313_v45 = vrot.slane %v311_v33, 5  ;;  %v327_v48 = vrot.slane %v325_v34, 5  ;;  %v341_v49 = vrot.slane %v339_v35, 5  ;;  %v355_v52 = vrot.slane %v353_v41, 5  ;;  %v2601_v8 = vld [vmem:[%s4118_s1 + $0x2] sm:$0x3] }
  0x15   :  { %v364_v54 = vor.u32 %v363_v44, %v360_v43  ;;  %v374_v55 = vrot.slane %v372_v21, 4  ;;  %v377_v59 = vrot.slane %v375_v22, 5  ;;  %v369_v5 = vrot.slane %v367_v50, 5  ;;  %2985 = vmatprep.subr.msk.bf16.mxu0 %vm149_vm0, %v2601_v8  ;;  %v47_v21 = vld [vmem:[%s4119_s0 + $0x3c] sm:$0x1] }
  0x16   :  { %v314_v61 = vsel %vm3226_vm4, %v309_v57, %v313_v45  ;;  %v3238_v62 = vsel %vm3226_vm4, %v323_v58, %v327_v48  ;;  %v3242_v0 = vsel %vm3226_vm4, %v337_v13, %v341_v49  ;;  %v3253_v57 = vsel %vm3226_vm4, %v351_v14, %v355_v52  ;;  %v51_v14 = vld [vmem:[%s4119_s0 + $0x4c] sm:$0x1]  ;;  %v3293_v52 = vld [vmem:[%s4118_s1 + $0xe] sm:$0x3] }
  0x17   :  { %v2533_v15 = vcombine.low %v314_v61, %v3238_v62  ;;  %v365_v58 = vrot.slane %v364_v54, 4  ;;  %v378_v17 = vor.u32 %v377_v59, %v374_v55  ;;  %v2534_v13 = vcombine.low %v3242_v0, %v3253_v57  ;;  %v57_v59 = vld [vmem:[%s4119_s0 + $0x64] sm:$0x1] }
  0x18   :  { %v381_v18 = vshll.u32 %v43_v53, 16  ;;  %v2550_v19 = vcombine.low %v3106_v24, %v3111_v27  ;;  %v388_v22 = vrot.slane %v386_v28, 4  ;;  %v487_v25 = vshll.u32 %v3131_v37, 16  ;;  %v53_v24 = vld [vmem:[%s4119_s0 + $0x54] sm:$0x1] }
  0x19   :  { %2836 = vmatprep.mubr.msk.bf16.mxu1 %vm15_vm1, %v2533_v15  ;;  %v379_v26 = vrot.slane %v378_v17, 4  ;;  %v391_v31 = vrot.slane %v389_v29, 5  ;;  %v395_v33 = vshll.u32 %v45_v6, 16  ;;  %v3274_v27 = vsel %vm3226_vm4, %v365_v58, %v369_v5 }
  0x1a   :  { %2837 = vmatmul.mubr.msk.bf16.vlgmr.msra.gmra.mrb[8].mxu1 %vm15_vm1, %v2534_v13  ;;  %v383_v28 = vrot.slane %v381_v18, 5  ;;  %2854 = vmatprep.mubr.msk.bf16.mxu0 %vm15_vm1, %v2550_v19  ;;  %v402_v34 = vrot.slane %v400_v30, 4  ;;  %v405_v35 = vrot.slane %v403_v32, 5  ;;  %v409_v29 = vshll.u32 %v47_v21, 16  ;;  %v55_v30 = vld [vmem:[%s4119_s0 + $0x5c] sm:$0x1] }
  0x1b   :  { %2871 = vmatpush3.bf16.msra.mxu1 %v974_v42  ;;  %v392_v39 = vor.u32 %v391_v31, %v388_v22  ;;  %v397_v41 = vrot.slane %v395_v33, 5  ;;  %2855 = vmatmul.mubr.msk.bf16.vlgmr.msra.gmra.mrb[8].mxu0 %vm15_vm1, %v2551_v23  ;;  %v1207_v43 = vsel %vm149_vm0, %v2601_v8, 0  ;;  %v423_v48 = vshll.u32 %v51_v14, 16  ;;  %v59_v19 = vld [vmem:[%s4119_s0 + $0x6c] sm:$0x1] }
  0x1c   :  { %v3281_v44 = vsel %vm3226_vm4, %v379_v26, %v383_v28  ;;  %v406_v45 = vor.u32 %v405_v35, %v402_v34  ;;  %2889 = vmatpush3.bf16.msra.mxu0 %v1207_v43  ;;  %v437_v49 = vshll.u32 %v53_v24, 16  ;;  %v411_v50 = vrot.slane %v409_v29, 5  ;;  %2986 = vmatprep.subr.msk.bf16.mxu1 %vm149_vm0, %v3293_v52  ;;  %v61_v31 = vld [vmem:[%s4119_s0 + $0x74] sm:$0x1] }
  0x1d   :  { %v2535_v32 = vcombine.low %v3274_v27, %v3281_v44  ;;  %v393_v42 = vrot.slane %v392_v39, 4  ;;  %v2552_v23 = vcombine.low %v3169_v60, %v3177_v1  ;;  %v425_v54 = vrot.slane %v423_v48, 5 }
  0x1e   :  { %v407_v53 = vrot.slane %v406_v45, 4  ;;  %v439_v55 = vrot.slane %v437_v49, 5  ;;  %v444_v61 = vrot.slane %v442_v11, 4  ;;  %v447_v1 = vrot.slane %v445_v12, 5  ;;  %v3315_v11 = vld [vmem:[%s4119_s0 + $0x40] sm:$0xf] }
  0x1f   :  { %2840 = vmatprep.mubr.msk.bf16.mxu1 %vm15_vm1, %v2535_v32  ;;  %v3305_v60 = vsel %vm3226_vm4, %v393_v42, %v397_v41  ;;  %2858 = vmatprep.mubr.msk.bf16.mxu0 %vm15_vm1, %v2552_v23  ;;  %v451_v5 = vshll.u32 %v55_v30, 16  ;;  %v458_v6 = vrot.slane %v456_v16, 4  ;;  %v426_v15 = vsel %vm3226_vm4, %v3133_v38, %v425_v54  ;;  %v3340_v38 = vld [vmem:[%s4118_s1 + $0x6] sm:$0x3] }
  0x20   :  { %v3319_v8 = vsel %vm3226_vm4, %v407_v53, %v411_v50  ;;  %v3327_v12 = vsel %vm3226_vm4, %v3146_v47, %v439_v55  ;;  %v461_v16 = vrot.slane %v459_v20, 5  ;;  %v448_v13 = vor.u32 %v447_v1, %v444_v61  ;;  %2987 = vmatprep.subr.msk.bf16.mxu0 %vm149_vm0, %v3340_v38 }
  0x21   :  { %v2536_v58 = vcombine.low %v3305_v60, %v3319_v8  ;;  %v2537_v17 = vcombine.low %v426_v15, %v3327_v12  ;;  %v453_v18 = vrot.slane %v451_v5, 5  ;;  %v498_v47 = vshrl.u32 %v3144_v46, 16 }
  0x22   :  { %v462_v21 = vor.u32 %v461_v16, %v458_v6  ;;  %v465_v20 = vshll.u32 %v57_v59, 16  ;;  %v2553_v22 = vcombine.low %v3182_v3, %v3315_v11  ;;  %v501_v14 = vshll.u32 %v3144_v46, 16 }
  0x23   :  { %2841 = vmatmul.mubr.msk.bf16.gmra.mrb[12].mxu1 %vm15_vm1, %v2536_v58  ;;  %v449_v26 = vrot.slane %v448_v13, 4  ;;  %v472_v33 = vrot.slane %v470_v56, 4  ;;  %v475_v24 = vrot.slane %v473_v63, 5  ;;  %v512_v3 = vshrl.u32 %v3153_v51, 16  ;;  %v63_v63 = vld [vmem:[%s4119_s0 + $0x7c] sm:$0x1] }
  0x24   :  { %2844 = vmatprep.mubr.msk.bf16.mxu1 %vm15_vm1, %v2537_v17  ;;  %v463_v28 = vrot.slane %v462_v21, 4  ;;  %v467_v34 = vrot.slane %v465_v20, 5  ;;  %2859 = vmatmul.mubr.msk.bf16.gmra.mrb[12].mxu0 %vm15_vm1, %v2553_v22  ;;  %v479_v35 = vshll.u32 %v59_v19, 16  ;;  %v515_v39 = vshll.u32 %v3153_v51, 16 }
  0x25   :  { %v3362_v41 = vsel %vm3226_vm4, %v449_v26, %v453_v18  ;;  %v476_v29 = vor.u32 %v475_v24, %v472_v33  ;;  %v486_v56 = vrot.slane %v484_v4, 4  ;;  %2862 = vmatprep.mubr.msk.bf16.mxu0 %vm15_vm1, %v2554_v9  ;;  %v489_v48 = vrot.slane %v487_v25, 5  ;;  %v65_v4 = vld [vmem:[%s4119_s0 + $0x84] sm:$0x1]  ;;  %v3416_v18 = vld [vmem:[%s4119_s0 + $0x98] sm:$0xf] }
  0x26   :  { %v3375_v43 = vsel %vm3226_vm4, %v463_v28, %v467_v34  ;;  %v481_v45 = vrot.slane %v479_v35, 5  ;;  %v493_v49 = vshll.u32 %v61_v31, 16  ;;  %v500_v9 = vrot.slane %v498_v47, 4  ;;  %v49_v31 = vld [vmem:[%s4119_s0 + $0x44] sm:$0x1] }
  0x27   :  { %v2538_v2 = vcombine.low %v3362_v41, %v3375_v43  ;;  %v477_v7 = vrot.slane %v476_v29, 4  ;;  %v503_v30 = vrot.slane %v501_v14, 5  ;;  %v490_v32 = vor.u32 %v489_v48, %v486_v56  ;;  %v3456_v28 = vld [vmem:[%s4119_s0 + $0xb8] sm:$0xf]  ;;  %v3469_v56 = vld [vmem:[%s4118_s1 + $0xa] sm:$0x3] }
  0x28   :  { %v495_v42 = vrot.slane %v493_v49, 5  ;;  %v507_v50 = vshll.u32 %v63_v63, 16  ;;  %v514_v23 = vrot.slane %v512_v3, 4  ;;  %v517_v54 = vrot.slane %v515_v39, 5  ;;  %v3451_v3 = vld [vmem:[%s4119_s0 + $0xb0] sm:$0xf] }
  0x29   :  { %v3386_v53 = vsel %vm3226_vm4, %v477_v7, %v481_v45  ;;  %v504_v25 = vor.u32 %v503_v30, %v500_v9  ;;  %v521_v55 = vshll.u32 %v65_v4, 16  ;;  %v491_v59 = vrot.slane %v490_v32, 4  ;;  %v3480_v45 = vld [vmem:[%s4118_s1 + $0x8] sm:$0x3]  ;;  %v2592_v4 = vld [vmem:[%s4119_s0 + $0xd8] sm:$0xf] }
  0x2a   :  { %v509_v61 = vrot.slane %v507_v50, 5  ;;  %v2555_v1 = vcombine.low %v3085_v10, %v3126_v36  ;;  %v2556_v5 = vcombine.low %v3131_v37, %v3144_v46  ;;  %v910_v6 = vshrl.u32 %v3315_v11, 16  ;;  %v66_v46 = vld [vmem:[%s4119_s0 + $0x88] sm:$0xf] }
  0x2b   :  { %2845 = vmatmul.mubr.msk.bf16.gmra.mrb[16].mxu1 %vm15_vm1, %v2538_v2  ;;  %v505_v15 = vrot.slane %v504_v25, 4  ;;  %v518_v16 = vor.u32 %v517_v54, %v514_v23  ;;  %v523_v58 = vrot.slane %v521_v55, 5  ;;  %v913_v17 = vshll.u32 %v3315_v11, 16  ;;  %v2583_v11 = vld [vmem:[%s4119_s0 + $0x90] sm:$0xf] }
  0x2c   :  { %v3397_v13 = vsel %vm3226_vm4, %v491_v59, %v495_v42  ;;  %2863 = vmatmul.mubr.msk.bf16.gmra.mrb[16].mxu0 %vm15_vm1, %v2555_v1  ;;  %v912_v19 = vrot.slane %v910_v6, 4  ;;  %v2567_v22 = vcombine.low %v3238_v62, %v3242_v0  ;;  %v2557_v14 = vcombine.low %v3153_v51, %v66_v46  ;;  %v3439_v51 = vld [vmem:[%s4119_s0 + $0xa0] sm:$0xf]  ;;  %v3444_v62 = vld [vmem:[%s4119_s0 + $0xa8] sm:$0xf] }
  0x2d   :  { %v2539_v10 = vcombine.low %v3386_v53, %v3397_v13  ;;  %v3404_v36 = vsel %vm3226_vm4, %v505_v15, %v509_v61  ;;  %v519_v37 = vrot.slane %v518_v16, 4  ;;  %2866 = vmatprep.mubr.msk.bf16.mxu0 %vm15_vm1, %v2556_v5  ;;  %v915_v21 = vrot.slane %v913_v17, 5  ;;  %v3492_v48 = vld [vmem:[%s4119_s0 + $0xc8] sm:$0xf]  ;;  %v3501_v2 = vld [vmem:[%s4119_s0 + $0xe0] sm:$0xf] }
  0x2e   :  { %v2602_v26 = vcombine.low %v2583_v11, %v3416_v18  ;;  %v919_v24 = vshll.u32 %v49_v31, 16  ;;  %v2568_v0 = vcombine.low %v3253_v57, %v3274_v27  ;;  %v2569_v34 = vcombine.low %v3281_v44, %v3305_v60  ;;  %v3531_v54 = vld [vmem:[%s4119_s0 + $0xf8] sm:$0xf]  ;;  %v3536_v55 = vld [vmem:[%s4119_s0 + $0x100] sm:$0xf] }
  0x2f   :  { %2848 = vmatprep.mubr.msk.bf16.mxu1 %vm15_vm1, %v2539_v10  ;;  %v3421_v47 = vsel %vm3226_vm4, %v519_v37, %v523_v58  ;;  %v916_v33 = vor.u32 %v915_v21, %v912_v19  ;;  %v1393_v29 = vsel %vm149_vm0, %v3293_v52, 0  ;;  %v2603_v57 = vcombine.low %v3439_v51, %v3444_v62  ;;  %v3552_v6 = vld [vmem:[%s4119_s0 + $0x108] sm:$0xf]  ;;  %v3558_v15 = vld [vmem:[%s4119_s0 + $0x110] sm:$0xf] }
  0x30   :  { %v2540_v20 = vcombine.low %v3404_v36, %v3421_v47  ;;  %v921_v39 = vrot.slane %v919_v24, 5  ;;  %v2604_v27 = vcombine.low %v3451_v3, %v3456_v28  ;;  %v1640_v44 = vsel %vm149_vm0, %v3340_v38, 0  ;;  %v2589_v38 = vld [vmem:[%s4119_s0 + $0xc0] sm:$0xf]  ;;  %v2637_v17 = vld [vmem:[%s4119_s0 + $0x128] sm:$0xf] }
  0x31   :  { %v917_v35 = vrot.slane %v916_v33, 4  ;;  %v924_v60 = vshrl.u32 %v66_v46, 16  ;;  %v927_v63 = vshll.u32 %v66_v46, 16  ;;  %v2571_v30 = vcombine.low %v3327_v12, %v3362_v41  ;;  %v3519_v12 = vld [vmem:[%s4119_s0 + $0xe8] sm:$0xf] }
  0x32   :  { %v2605_v32 = vcombine.low %v2589_v38, %v3492_v48  ;;  %v2606_v42 = vcombine.low %v2592_v4, %v3501_v2  ;;  %v3524_v41 = vld [vmem:[%s4119_s0 + $0xf0] sm:$0xf]  ;;  %v2572_v25 = vcombine.low %v3375_v43, %v3386_v53  ;;  %v2573_v59 = vcombine.low %v3397_v13, %v3404_v36  ;;  %v2635_v16 = vld [vmem:[%s4119_s0 + $0x120] sm:$0xf]  ;;  %v3581_v46 = vld [vmem:[%s4119_s0 + $0x138] sm:$0xf] }
  0x33   :  { %2849 = vmatmul.mubr.msk.bf16.gmra.mrb[20].mxu1 %vm15_vm1, %v2540_v20  ;;  %v922_v52 = vsel %vm3226_vm4, %v917_v35, %v921_v39  ;;  %v926_v7 = vrot.slane %v924_v60, 4  ;;  %v929_v9 = vrot.slane %v927_v63, 5  ;;  %v2607_v5 = vcombine.low %v3519_v12, %v3524_v41  ;;  %v2639_v37 = vld [vmem:[%s4119_s0 + $0x130] sm:$0xf]  ;;  %v3593_v19 = vld [vmem:[%s4119_s0 + $0x148] sm:$0xf] }
  0x34   :  { %2872 = vmatprep.mubr.msk.bf16.mxu1 %vm15_vm1, %v2567_v22  ;;  %2867 = vmatmul.mubr.msk.bf16.gmra.mrb[20].mxu0 %vm15_vm1, %v2557_v14  ;;  %v2570_v49 = vcombine.low %v3319_v8, %v922_v52  ;;  %v67_v8 = vld [vmem:[%s4119_s0 + $0x8c] sm:$0x1]  ;;  %v2608_v43 = vcombine.low %v3531_v54, %v3536_v55  ;;  %v2619_v13 = vcombine.low %v3416_v18, %v3439_v51  ;;  %v3588_v18 = vld [vmem:[%s4119_s0 + $0x140] sm:$0xf]  ;;  %v2062_v21 = vsel %vm149_vm0, %v3469_v56, 0 }
  0x35   :  { %2890 = vmatprep.mubr.msk.bf16.mxu0 %vm15_vm1, %v2602_v26  ;;  %v930_v50 = vor.u32 %v929_v9, %v926_v7  ;;  %v933_v23 = vshll.u32 %v67_v8, 16  ;;  %v2609_v10 = vcombine.low %v3552_v6, %v3558_v15  ;;  %v2668_v36 = vcombine.low %v2635_v16, %v2637_v17  ;;  %v2591_v31 = vld [vmem:[%s4119_s0 + $0xd0] sm:$0xf]  ;;  %v3624_v35 = vld [vmem:[%s4119_s0 + $0x168] sm:$0xf] }
  0x36   :  { %v2620_v11 = vcombine.low %v3444_v62, %v3451_v3  ;;  %v2669_v20 = vcombine.low %v2639_v37, %v3581_v46  ;;  %v2670_v22 = vcombine.low %v3588_v18, %v3593_v19  ;;  %v1788_v14 = vshrl.u32 %v2635_v16, 16  ;;  %v3612_v3 = vld [vmem:[%s4119_s0 + $0x150] sm:$0xf]  ;;  %v2636_v7 = vld [vmem:[%s4119_s0 + $0x124] sm:$0x1] }
  0x37   :  { %v931_v61 = vrot.slane %v930_v50, 4  ;;  %v935_v1 = vrot.slane %v933_v23, 5  ;;  %v1791_v26 = vshll.u32 %v2635_v16, 16  ;;  %v2293_v33 = vsel %vm149_vm0, %v3480_v45, 0  ;;  %v2638_v8 = vld [vmem:[%s4119_s0 + $0x12c] sm:$0x1] }
  0x38   :  { %v1802_v24 = vshrl.u32 %v2637_v17, 16  ;;  %v1805_v51 = vshll.u32 %v2637_v17, 16  ;;  %v1816_v62 = vshrl.u32 %v2639_v37, 16  ;;  %v3626_v39 = vrot.slane %v1788_v14, 4  ;;  %v3704_v16 = vld [vmem:[%s4119_s0 + $0x190] sm:$0xf] }
  0x39   :  { %v936_v53 = vsel %vm3226_vm4, %v931_v61, %v935_v1  ;;  %v2623_v63 = vcombine.low %v3501_v2, %v3519_v12  ;;  %v1844_v52 = vshrl.u32 %v3588_v18, 16  ;;  %v1858_v9 = vshrl.u32 %v3593_v19, 16  ;;  %v2644_v14 = vld [vmem:[%s4119_s0 + $0x144] sm:$0x1] }
  0x3a   :  { %v2574_v58 = vcombine.low %v3421_v47, %v936_v53  ;;  %v2621_v47 = vcombine.low %v3456_v28, %v2589_v38  ;;  %v2622_v28 = vcombine.low %v3492_v48, %v2591_v31  ;;  %v1804_v60 = vrot.slane %v1802_v24, 4  ;;  %v3699_v53 = vld [vmem:[%s4119_s0 + $0x188] sm:$0xf]  ;;  %v2600_v31 = vld [vmem:[%s4119_s0 + $0x118] sm:$0xf] }
  0x3b   :  { %2873 = vmatmul.mubr.msk.bf16.vlgmr.msra.gmra.mrb[24].mxu1 %vm15_vm1, %v2568_v0  ;;  %v1819_v0 = vshll.u32 %v2639_v37, 16  ;;  %v1807_v38 = vrot.slane %v1805_v51, 5  ;;  %v3657_v48 = vrot.slane %v1816_v62, 4  ;;  %v1861_v2 = vshll.u32 %v3593_v19, 16 }
  0x3c   :  { %2907 = vmatpush3.bf16.msra.mxu1 %v1393_v29  ;;  %2876 = vmatprep.mubr.msk.bf16.mxu1 %vm15_vm1, %v2569_v34  ;;  %v3619_v34 = vld [vmem:[%s4119_s0 + $0x158] sm:$0xf]  ;;  %v3628_v29 = vrot.slane %v1791_v26, 5  ;;  %v1875_v23 = vshll.u32 %v3612_v3, 16  ;;  %v2624_v1 = vcombine.low %v3524_v41, %v3531_v54  ;;  %v1797_v54 = vshll.u32 %v2636_v7, 16 }
  0x3d   :  { %2891 = vmatmul.mubr.msk.bf16.vlgmr.msra.gmra.mrb[24].mxu0 %vm15_vm1, %v2603_v57  ;;  %2988 = vmatprep.subr.msk.bf16.mxu1 %vm149_vm0, %v3469_v56  ;;  %v1830_v57 = vshrl.u32 %v3581_v46, 16  ;;  %v3635_v56 = vld [vmem:[%s4119_s0 + $0x170] sm:$0xf]  ;;  %v2671_v4 = vcombine.low %v3612_v3, %v3619_v34  ;;  %v1886_v12 = vshrl.u32 %v3619_v34, 16  ;;  %v1811_v17 = vshll.u32 %v2638_v8, 16 }
  0x3e   :  { %2925 = vmatpush3.bf16.msra.mxu0 %v1640_v44  ;;  %2894 = vmatprep.mubr.msk.bf16.mxu0 %vm15_vm1, %v2604_v27  ;;  %v1833_v27 = vshll.u32 %v3581_v46, 16  ;;  %v3039_v44 = vmov 0.0   ;;  %v1794_v41 = vor.u32 %v3628_v29, %v3626_v39  ;;  %v2625_v37 = vcombine.low %v3536_v55, %v3552_v6  ;;  %v2640_v46 = vld [vmem:[%s4119_s0 + $0x134] sm:$0x1]  ;;  %v2646_v26 = vld [vmem:[%s4119_s0 + $0x14c] sm:$0x1] }
  0x3f   :  { %2989 = vmatprep.subr.msk.bf16.mxu0 %vm149_vm0, %v3480_v45  ;;  %26 = vst.msk [vmem:[#allocation2 + $0x50] sm:$0xff] %vm15_vm1, %v3039_v44  ;;  %16 = vst.msk [vmem:[#allocation2] sm:$0xff] %vm15_vm1, %v3039_v44  ;;  %v1847_v45 = vshll.u32 %v3588_v18, 16  ;;  %v3718_v18 = vrot.slane %v1886_v12, 4  ;;  %v1900_v19 = vshrl.u32 %v3624_v35, 16  ;;  %v1914_v55 = vshrl.u32 %v3635_v56, 16 }
  0x40   :  { %17 = vst.msk [vmem:[#allocation2 + $0x8] sm:$0xff] %vm15_vm1, %v3039_v44  ;;  %18 = vst.msk [vmem:[#allocation2 + $0x10] sm:$0xff] %vm15_vm1, %v3039_v44  ;;  %v3677_v50 = vrot.slane %v1833_v27, 5  ;;  %v1799_v24 = vrot.slane %v1797_v54, 5  ;;  %v1813_v62 = vrot.slane %v1811_v17, 5  ;;  %v1853_v39 = vshll.u32 %v2644_v14, 16 }
  0x41   :  { %19 = vst.msk [vmem:[#allocation2 + $0x18] sm:$0xff] %vm15_vm1, %v3039_v44  ;;  %20 = vst.msk [vmem:[#allocation2 + $0x20] sm:$0xff] %vm15_vm1, %v3039_v44  ;;  %v1849_v61 = vrot.slane %v1847_v45, 5  ;;  %v3747_v27 = vrot.slane %v1900_v19, 4  ;;  %v1956_v54 = vshrl.u32 %v3699_v53, 16  ;;  %v1959_v14 = vshll.u32 %v3699_v53, 16 }
  0x42   :  { %21 = vst.msk [vmem:[#allocation2 + $0x28] sm:$0xff] %vm15_vm1, %v3039_v44  ;;  %22 = vst.msk [vmem:[#allocation2 + $0x30] sm:$0xff] %vm15_vm1, %v3039_v44  ;;  %vm2495_vm5 = vcmask 27648  }
  0x43   :  { %2877 = vmatmul.mubr.msk.bf16.gmra.mrb[28].mxu1 %vm15_vm1, %v2570_v49  ;;  %23 = vst.msk [vmem:[#allocation2 + $0x38] sm:$0xff] %vm15_vm1, %v3039_v44  ;;  %24 = vst.msk [vmem:[#allocation2 + $0x40] sm:$0xff] %vm15_vm1, %v3039_v44  ;;  %v3659_v49 = vrot.slane %v1819_v0, 5 }
  0x44   :  { %2880 = vmatprep.mubr.msk.bf16.mxu1 %vm15_vm1, %v2571_v30  ;;  %25 = vst.msk [vmem:[#allocation2 + $0x48] sm:$0xff] %vm15_vm1, %v3039_v44  ;;  %27 = vst.msk [vmem:[#allocation2 + $0x58] sm:$0xff] %vm15_vm1, %v3039_v44  ;;  %v1872_v30 = vshrl.u32 %v3612_v3, 16  ;;  %v1825_v3 = vshll.u32 %v2640_v46, 16 }
  0x45   :  { %2895 = vmatmul.mubr.msk.bf16.gmra.mrb[28].mxu0 %vm15_vm1, %v2605_v32  ;;  %28 = vst.msk [vmem:[#allocation2 + $0x60] sm:$0xff] %vm15_vm1, %v3039_v44  ;;  %29 = vst.msk [vmem:[#allocation2 + $0x68] sm:$0xff] %vm15_vm1, %v3039_v44  ;;  %v2672_v32 = vcombine.low %v3624_v35, %v3635_v56  ;;  %v1822_v0 = vor.u32 %v3659_v49, %v3657_v48  ;;  %v3760_v49 = vld [vmem:[%s4119_s0 + $0x198] sm:$0xf] }
  0x46   :  { %2898 = vmatprep.mubr.msk.bf16.mxu0 %vm15_vm1, %v2606_v42  ;;  %30 = vst.msk [vmem:[#allocation2 + $0x70] sm:$0xff] %vm15_vm1, %v3039_v44  ;;  %31 = vst.msk [vmem:[#allocation2 + $0x78] sm:$0xff] %vm15_vm1, %v3039_v44  ;;  %v3675_v42 = vrot.slane %v1830_v57, 4  ;;  %v1867_v57 = vshll.u32 %v2646_v26, 16  ;;  %v1970_v26 = vshrl.u32 %v3704_v16, 16 }
  0x4b   :  { %2881 = vmatmul.mubr.msk.bf16.gmra.mrb[32].mxu1 %vm15_vm1, %v2572_v25  ;;  %v3684_v25 = vld [vmem:[%s4119_s0 + $0x178] sm:$0xf] }
  0x4c   :  { %2884 = vmatprep.mubr.msk.bf16.mxu1 %vm15_vm1, %v2573_v59  ;;  %v1846_v59 = vrot.slane %v1844_v52, 4  ;;  %v1916_v52 = vrot.slane %v1914_v55, 4  ;;  %v1928_v45 = vshrl.u32 %v3684_v25, 16  ;;  %v1931_v12 = vshll.u32 %v3684_v25, 16 }
  0x4d   :  { %2899 = vmatmul.mubr.msk.bf16.gmra.mrb[32].mxu0 %vm15_vm1, %v2607_v5  ;;  %v1889_v5 = vshll.u32 %v3619_v34, 16 }
  0x4e   :  { %2902 = vmatprep.mubr.msk.bf16.mxu0 %vm15_vm1, %v2608_v43  ;;  %v3693_v43 = vld [vmem:[%s4119_s0 + $0x180] sm:$0xf] }
  0x4f   :  { %v2673_v6 = vcombine.low %v3684_v25, %v3693_v43  ;;  %v2654_v25 = vld [vmem:[%s4119_s0 + $0x174] sm:$0x1] }
  0x53   :  { %2885 = vmatmul.mubr.msk.bf16.gmra.mrb[36].mxu1 %vm15_vm1, %v2574_v58  ;;  %v1808_v58 = vor.u32 %v1807_v38, %v1804_v60  ;;  %v1917_v60 = vshll.u32 %v3635_v56, 16  ;;  %v1823_v56 = vrot.slane %v1822_v0, 4 }
  0x54   :  { %2908 = vmatprep.mubr.msk.bf16.mxu1 %vm15_vm1, %v2619_v13  ;;  %v1860_v13 = vrot.slane %v1858_v9, 4 }
  0x55   :  { %2903 = vmatmul.mubr.msk.bf16.gmra.mrb[36].mxu0 %vm15_vm1, %v2609_v10  ;;  %v1863_v10 = vrot.slane %v1861_v2, 5  ;;  %v1809_v51 = vrot.slane %v1808_v58, 4  ;;  %v2648_v2 = vld [vmem:[%s4119_s0 + $0x154] sm:$0x1] }
  0x56   :  { %2926 = vmatprep.mubr.msk.bf16.mxu0 %vm15_vm1, %v2668_v36  ;;  %v3708_v36 = vrot.slane %v1872_v30, 4 }
  0x57   :  { %v1864_v29 = vor.u32 %v1863_v10, %v1860_v13  ;;  %v1814_v48 = vsel %vm3226_vm4, %v1809_v51, %v1813_v62  ;;  %v3031_v10 = vld [vmem:[%s4119_s0 + $0x1b0] ss:$8 sps:$4 sm:$0xff]  }
  0x59   :  { %v1865_v8 = vrot.slane %v1864_v29, 4  ;;  %v3033_v29 = vld [vmem:[%s4119_s0 + $0x1d0] ss:$8 sps:$4 sm:$0xff]  }
  0x5b   :  { %2909 = vmatmul.mubr.msk.bf16.vlgmr.msra.gmra.mrb[40].mxu1 %vm15_vm1, %v2620_v11  ;;  %v3716_v11 = vrot.slane %v1875_v23, 5  ;;  %v1919_v23 = vrot.slane %v1917_v60, 5  ;;  %v1972_v60 = vrot.slane %v1970_v26, 4 }
  0x5c   :  { %2943 = vmatpush3.bf16.msra.mxu1 %v2062_v21  ;;  %2912 = vmatprep.mubr.msk.bf16.mxu1 %vm15_vm1, %v2621_v47  ;;  %v1903_v47 = vshll.u32 %v3624_v35, 16  ;;  %v2642_v21 = vld [vmem:[%s4119_s0 + $0x13c] sm:$0x1]  ;;  %v1850_v35 = vor.u32 %v1849_v61, %v1846_v59  ;;  %v1942_v59 = vshrl.u32 %v3693_v43, 16 }
  0x5d   :  { %2927 = vmatmul.mubr.msk.bf16.vlgmr.msra.gmra.mrb[40].mxu0 %vm15_vm1, %v2669_v20  ;;  %v3725_v20 = vrot.slane %v1889_v5, 5  ;;  %v1839_v34 = vshll.u32 %v2642_v21, 16  ;;  %v3779_v5 = vrot.slane %v1928_v45, 4  ;;  %v1984_v45 = vshrl.u32 %v3760_v49, 16 }
  0x5e   :  { %2961 = vmatpush3.bf16.msra.mxu0 %v2293_v33  ;;  %2930 = vmatprep.mubr.msk.bf16.mxu0 %vm15_vm1, %v2670_v22  ;;  %v2674_v22 = vcombine.low %v3699_v53, %v3704_v16  ;;  %v1795_v33 = vrot.slane %v1794_v41, 4  ;;  %v1905_v44 = vrot.slane %v1903_v47, 5  ;;  %v1851_v30 = vrot.slane %v1850_v35, 4  ;;  %v3032_v53 = vld [vmem:[%s4119_s0 + $0x1c0] ss:$8 sps:$4 sm:$0xff]  }
  0x5f   :  { %v1841_v9 = vrot.slane %v1839_v34, 5  ;;  %v1945_v41 = vshll.u32 %v3693_v43, 16  ;;  %v1878_v43 = vor.u32 %v3716_v11, %v3708_v36  ;;  %v1892_v47 = vor.u32 %v3725_v20, %v3718_v18 }
  0x60   :  { %v1800_v38 = vsel %vm3226_vm4, %v1795_v33, %v1799_v24  ;;  %v1906_v55 = vor.u32 %v1905_v44, %v3747_v27  ;;  %v1923_v36 = vshll.u32 %v2654_v25, 16  ;;  %v1933_v11 = vrot.slane %v1931_v12, 5 }
  0x61   :  { %v2685_v61 = vcombine.low %v1800_v38, %v1814_v48  ;;  %v1944_v33 = vrot.slane %v1942_v59, 4  ;;  %v1947_v24 = vrot.slane %v1945_v41, 5  ;;  %v1879_v20 = vrot.slane %v1878_v43, 4  ;;  %v2664_v43 = vld [vmem:[%s4119_s0 + $0x19c] sm:$0x1] }
  0x62   :  { %v1893_v0 = vrot.slane %v1892_v47, 4  ;;  %v1958_v27 = vrot.slane %v1956_v54, 4  ;;  %v1961_v44 = vrot.slane %v1959_v14, 5  ;;  %v1987_v38 = vshll.u32 %v3760_v49, 16 }
  0x63   :  { %2913 = vmatmul.mubr.msk.bf16.gmra.mrb[44].mxu1 %vm15_vm1, %v2622_v28  ;;  %v1836_v28 = vor.u32 %v3677_v50, %v3675_v42  ;;  %v1869_v42 = vrot.slane %v1867_v57, 5  ;;  %v2650_v50 = vld [vmem:[%s4119_s0 + $0x15c] sm:$0x1]  ;;  %v2658_v57 = vld [vmem:[%s4119_s0 + $0x184] sm:$0x1]  ;;  %v1986_v59 = vrot.slane %v1984_v45, 4 }
  0x64   :  { %2916 = vmatprep.mubr.msk.bf16.mxu1 %vm15_vm1, %v2623_v63  ;;  %v2626_v63 = vcombine.low %v3558_v15, %v2600_v31  ;;  %v3765_v15 = vld [vmem:[%s4119_s0 + $0x1a0] sm:$0xf]  ;;  %v1895_v21 = vshll.u32 %v2650_v50, 16  ;;  %v1973_v31 = vshll.u32 %v3704_v16, 16  ;;  %v2656_v16 = vld [vmem:[%s4119_s0 + $0x17c] sm:$0x1] }
  0x65   :  { %2931 = vmatmul.mubr.msk.bf16.gmra.mrb[44].mxu0 %vm15_vm1, %v2671_v4  ;;  %v1827_v4 = vrot.slane %v1825_v3, 5  ;;  %v1837_v7 = vrot.slane %v1836_v28, 4  ;;  %v2675_v58 = vcombine.low %v3760_v49, %v3765_v15  ;;  %v1870_v19 = vsel %vm3226_vm4, %v1865_v8, %v1869_v42  ;;  %v70_v45 = vld [vmem:[#allocation2 + $0x10] sm:$0xff] }
  0x66   :  { %2934 = vmatprep.mubr.msk.bf16.mxu0 %vm15_vm1, %v2672_v32  ;;  %v1855_v32 = vrot.slane %v1853_v39, 5  ;;  %v1897_v3 = vrot.slane %v1895_v21, 5  ;;  %v1907_v28 = vrot.slane %v1906_v55, 4  ;;  %v1925_v39 = vrot.slane %v1923_v36, 5  ;;  %v2666_v21 = vld [vmem:[%s4119_s0 + $0x1a4] sm:$0x1] }
  0x67   :  { %v1828_v17 = vsel %vm3226_vm4, %v1823_v56, %v1827_v4  ;;  %v1842_v13 = vsel %vm3226_vm4, %v1837_v7, %v1841_v9  ;;  %v1998_v48 = vshrl.u32 %v3765_v15, 16  ;;  %v2001_v56 = vshll.u32 %v3765_v15, 16  ;;  %v2662_v4 = vld [vmem:[%s4119_s0 + $0x194] sm:$0x1]  ;;  %v3035_v55 = vld [vmem:[%s4119_s0 + $0x1f8] ss:$8 sps:$4 sm:$0xff]  }
  0x68   :  { %v1856_v46 = vsel %vm3226_vm4, %v1851_v30, %v1855_v32  ;;  %v2686_v18 = vcombine.low %v1828_v17, %v1842_v13  ;;  %v1898_v9 = vsel %vm3226_vm4, %v1893_v0, %v1897_v3  ;;  %v1937_v30 = vshll.u32 %v2656_v16, 16  ;;  %v3036_v3 = vld [vmem:[%s4119_s0 + $0x208] ss:$8 sps:$4 sm:$0xff]  }
  0x69   :  { %v2687_v51 = vcombine.low %v1856_v46, %v1870_v19  ;;  %v1948_v32 = vor.u32 %v1947_v24, %v1944_v33  ;;  %v1951_v8 = vshll.u32 %v2658_v57, 16  ;;  %v1962_v42 = vor.u32 %v1961_v44, %v1958_v27  ;;  %v79_v27 = vld [vmem:[#allocation2 + $0x58] sm:$0xff] }
  0x6a   :  { %v1979_v12 = vshll.u32 %v2662_v4, 16  ;;  %v1939_v54 = vrot.slane %v1937_v30, 5  ;;  %v2003_v25 = vrot.slane %v2001_v56, 5  ;;  %v2007_v26 = vshll.u32 %v2666_v21, 16  ;;  %v68_v56 = vld [vmem:[#allocation2] sm:$0xff]  ;;  %v73_v21 = vld [vmem:[#allocation2 + $0x28] sm:$0xff] }
  0x6b   :  { %2917 = vmatmul.mubr.msk.bf16.gmra.mrb[48].mxu1 %vm15_vm1, %v2624_v1  ;;  %v2652_v1 = vld [vmem:[%s4119_s0 + $0x16c] sm:$0x1]  ;;  %v1949_v13 = vrot.slane %v1948_v32, 4 }
  0x6c   :  { %2920 = vmatprep.mubr.msk.bf16.mxu1 %vm15_vm1, %v2625_v37  ;;  %v1881_v37 = vshll.u32 %v2648_v2, 16  ;;  %v1934_v2 = vor.u32 %v1933_v11, %v3779_v5  ;;  %v1981_v47 = vrot.slane %v1979_v12, 5  ;;  %v1993_v11 = vshll.u32 %v2664_v43, 16  ;;  %v80_v12 = vld [vmem:[#allocation2 + $0x60] sm:$0xff] }
  0x6d   :  { %2935 = vmatmul.mubr.msk.bf16.gmra.mrb[48].mxu0 %vm15_vm1, %v2673_v6  ;;  %v1909_v6 = vshll.u32 %v2652_v1, 16  ;;  %v2000_v1 = vrot.slane %v1998_v48, 4  ;;  %v2009_v0 = vrot.slane %v2007_v26, 5 }
  0x6e   :  { %2938 = vmatprep.mubr.msk.bf16.mxu0 %vm15_vm1, %v2674_v22  ;;  %v1920_v22 = vor.u32 %v1919_v23, %v1916_v52  ;;  %v1883_v62 = vrot.slane %v1881_v37, 5  ;;  %v2660_v52 = vld [vmem:[%s4119_s0 + $0x18c] sm:$0x1]  ;;  %v1935_v41 = vrot.slane %v1934_v2, 4  ;;  %v1963_v37 = vrot.slane %v1962_v42, 4 }
  0x6f   :  { %v1911_v34 = vrot.slane %v1909_v6, 5  ;;  %v1965_v50 = vshll.u32 %v2660_v52, 16  ;;  %v2004_v14 = vor.u32 %v2003_v25, %v2000_v1  ;;  %v74_v25 = vld [vmem:[#allocation2 + $0x30] sm:$0xff] }
  0x70   :  { %v1921_v35 = vrot.slane %v1920_v22, 4  ;;  %v1884_v7 = vsel %vm3226_vm4, %v1879_v20, %v1883_v62  ;;  %v1940_v6 = vsel %vm3226_vm4, %v1935_v41, %v1939_v54  ;;  %v81_v41 = vld [vmem:[#allocation2 + $0x68] sm:$0xff] }
  0x71   :  { %v1912_v49 = vsel %vm3226_vm4, %v1907_v28, %v1911_v34  ;;  %v2688_v5 = vcombine.low %v1884_v7, %v1898_v9  ;;  %v1967_v46 = vrot.slane %v1965_v50, 5  ;;  %v2005_v62 = vrot.slane %v2004_v14, 4  ;;  %v71_v9 = vld [vmem:[#allocation2 + $0x18] sm:$0xff]  ;;  %v82_v50 = vld [vmem:[#allocation2 + $0x70] sm:$0xff] }
  0x72   :  { %v1926_v15 = vsel %vm3226_vm4, %v1921_v35, %v1925_v39  ;;  %v3038_v35 = vld [vmem:[%s4119_s0 + $0x228] ss:$8 sps:$4 sm:$0xff]  }
  0x73   :  { %2921 = vmatmul.mubr.msk.bf16.gmra.mrb[52].mxu1 %vm15_vm1, %v2626_v63  ;;  %v1975_v63 = vrot.slane %v1973_v31, 5  ;;  %v2689_v17 = vcombine.low %v1912_v49, %v1926_v15  ;;  %v1968_v31 = vsel %vm3226_vm4, %v1963_v37, %v1967_v46  ;;  %v2010_v28 = vsel %vm3226_vm4, %v2005_v62, %v2009_v0  ;;  %v78_v39 = vld [vmem:[#allocation2 + $0x50] sm:$0xff]  ;;  %v69_v49 = vld [vmem:[#allocation2 + $0x8] sm:$0xff]  ;;  %v75_v46 = vld [vmem:[#allocation2 + $0x38] sm:$0xff] }
  0x74   :  { %2944 = vmatprep.mubr.msk.bf16.mxu1 %vm15_vm1, %v2685_v61  ;;  %v1989_v61 = vrot.slane %v1987_v38, 5 }
  0x75   :  { %2939 = vmatmul.mubr.msk.bf16.gmra.mrb[52].mxu0 %vm15_vm1, %v2675_v58  ;;  %v1976_v23 = vor.u32 %v1975_v63, %v1972_v60  ;;  %v3034_v58 = vld [vmem:[%s4119_s0 + $0x1e0] ss:$8 sps:$4 sm:$0xff]  }
  0x76   :  { %2962 = vmatprep.mubr.msk.bf16.mxu0 %vm15_vm1, %v3031_v10  ;;  %v1953_v10 = vrot.slane %v1951_v8, 5  ;;  %v1990_v22 = vor.u32 %v1989_v61, %v1986_v59  ;;  %v77_v60 = vld [vmem:[#allocation2 + $0x48] sm:$0xff]  ;;  %v83_v61 = vld [vmem:[#allocation2 + $0x78] sm:$0xff] }
  0x77   :  { %v1977_v19 = vrot.slane %v1976_v23, 4 }
  0x78   :  { %v1954_v36 = vsel %vm3226_vm4, %v1949_v13, %v1953_v10  ;;  %v72_v10 = vld [vmem:[#allocation2 + $0x20] sm:$0xff] }
  0x79   :  { %v1982_v33 = vsel %vm3226_vm4, %v1977_v19, %v1981_v47  ;;  %v2690_v24 = vcombine.low %v1940_v6, %v1954_v36 }
  0x7a   :  { %v2691_v20 = vcombine.low %v1968_v31, %v1982_v33 }
  0x7b   :  { %2945 = vmatmul.mubr.msk.bf16.vlgmr.msra.gmra.mrb[56].mxu1 %vm15_vm1, %v2686_v18  ;;  %v1991_v18 = vrot.slane %v1990_v22, 4 }
  0x7c   :  { %2948 = vmatprep.mubr.msk.bf16.mxu1 %vm15_vm1, %v2687_v51  ;;  %v1995_v51 = vrot.slane %v1993_v11, 5 }
  0x7d   :  { %2963 = vmatmul.mubr.msk.bf16.vlgmr.msra.gmra.mrb[56].mxu0 %vm15_vm1, %v3032_v53  ;;  %v3037_v53 = vld [vmem:[%s4119_s0 + $0x218] ss:$8 sps:$4 sm:$0xff]  }
  0x7e   :  { %2966 = vmatprep.mubr.msk.bf16.mxu0 %vm15_vm1, %v3033_v29  ;;  %v1996_v16 = vsel %vm3226_vm4, %v1991_v18, %v1995_v51  ;;  %v76_v29 = vld [vmem:[#allocation2 + $0x40] sm:$0xff] }
  0x7f   :  { %v2692_v34 = vcombine.low %v1996_v16, %v2010_v28 }
  0x83   :  { %2949 = vmatmul.mubr.msk.bf16.gmra.mrb[60].mxu1 %vm15_vm1, %v2688_v5 }
  0x84   :  { %2952 = vmatprep.mubr.msk.bf16.mxu1 %vm15_vm1, %v2689_v17 }
  0x85   :  { %2967 = vmatmul.mubr.msk.bf16.gmra.mrb[60].mxu0 %vm15_vm1, %v3034_v58 }
  0x86   :  { %2970 = vmatprep.mubr.msk.bf16.mxu0 %vm15_vm1, %v3035_v55 }
  0x8b   :  { %2953 = vmatmul.mubr.msk.bf16.gmra.mrb[64].mxu1 %vm15_vm1, %v2690_v24 }
  0x8c   :  { %2956 = vmatprep.mubr.msk.bf16.mxu1 %vm15_vm1, %v2691_v20 }
  0x8d   :  { %2971 = vmatmul.mubr.msk.bf16.gmra.mrb[64].mxu0 %vm15_vm1, %v3036_v3 }
  0x8e   :  { %2974 = vmatprep.mubr.msk.bf16.mxu0 %vm15_vm1, %v3037_v53 }
  0x93   :  { %2957 = vmatmul.mubr.msk.bf16.gmra.mrb[68].mxu1 %vm15_vm1, %v2692_v34 }
  0x95   :  { %2975 = vmatmul.mubr.msk.bf16.gmra.mrb[68].mxu0 %vm15_vm1, %v3038_v35 }
  0xd9   :  { %v2828_v57 = vpop.f32.mrb[0].mxu1 }
  0xda   :  { %v260_v44 = vadd.f32 %v2828_v57, %v78_v39  ;;  %v219_v40 = vpop.f32.mrb[1].mxu1 }
  0xdb   :  { %v258_v63 = vadd.f32 %v219_v40, %v76_v29  ;;  %v2829_v52 = vpop.f32.mrb[2].mxu1 }
  0xdc   :  { %276 = vst.msk [vmem:[#allocation2 + $0x50] sm:$0xff] %vm15_vm1, %v260_v44  ;;  %v261_v38 = vadd.f32 %v2829_v52, %v79_v27  ;;  %v222_v48 = vpop.f32.mrb[3].mxu1 }
  0xdd   :  { %274 = vst.msk [vmem:[#allocation2 + $0x40] sm:$0xff] %vm15_vm1, %v258_v63  ;;  %v259_v4 = vadd.f32 %v222_v48, %v77_v60  ;;  %v2820_v7 = vpop.f32.mrb[0].mxu0 }
  0xde   :  { %277 = vst.msk [vmem:[#allocation2 + $0x58] sm:$0xff] %vm15_vm1, %v261_v38  ;;  %v252_v2 = vadd.f32 %v2820_v7, %v70_v45  ;;  %v187_v30 = vpop.f32.mrb[1].mxu0 }
  0xdf   :  { %275 = vst.msk [vmem:[#allocation2 + $0x48] sm:$0xff] %vm15_vm1, %v259_v4  ;;  %v250_v15 = vadd.f32 %v187_v30, %v68_v56  ;;  %v2821_v32 = vpop.f32.mrb[2].mxu0 }
  0xe0   :  { %268 = vst.msk [vmem:[#allocation2 + $0x10] sm:$0xff] %vm15_vm1, %v252_v2  ;;  %v253_v8 = vadd.f32 %v2821_v32, %v71_v9  ;;  %v190_v42 = vpop.f32.mrb[3].mxu0 }
  0xe1   :  { %266 = vst.msk [vmem:[#allocation2] sm:$0xff] %vm15_vm1, %v250_v15  ;;  %v251_v23 = vadd.f32 %v190_v42, %v69_v49 }
  0xe2   :  { %269 = vst.msk [vmem:[#allocation2 + $0x18] sm:$0xff] %vm15_vm1, %v253_v8  ;;  %v2832_v59 = vpop.f32.mrb[4].mxu1 }
  0xe3   :  { %267 = vst.msk [vmem:[#allocation2 + $0x8] sm:$0xff] %vm15_vm1, %v251_v23  ;;  %v264_v1 = vadd.f32 %v2832_v59, %v82_v50  ;;  %v235_v5 = vpop.f32.mrb[5].mxu1  ;;  %v292_v23 = vld [vmem:[#allocation2 + $0x50] sm:$0xff] }
  0xe4   :  { %v262_v54 = vadd.f32 %v235_v5, %v80_v12  ;;  %v2833_v58 = vpop.f32.mrb[6].mxu1 }
  0xe5   :  { %280 = vst.msk [vmem:[#allocation2 + $0x70] sm:$0xff] %vm15_vm1, %v264_v1  ;;  %v265_v17 = vadd.f32 %v2833_v58, %v83_v61  ;;  %v238_v13 = vpop.f32.mrb[7].mxu1  ;;  %v2824_v37 = vpop.f32.mrb[4].mxu0  ;;  %v290_v61 = vld [vmem:[#allocation2 + $0x40] sm:$0xff]  ;;  %v293_v58 = vld [vmem:[#allocation2 + $0x58] sm:$0xff] }
  0xe6   :  { %278 = vst.msk [vmem:[#allocation2 + $0x60] sm:$0xff] %vm15_vm1, %v262_v54  ;;  %v263_v43 = vadd.f32 %v238_v13, %v81_v41  ;;  %v256_v19 = vadd.f32 %v2824_v37, %v74_v25  ;;  %v203_v47 = vpop.f32.mrb[5].mxu0  ;;  %v291_v37 = vld [vmem:[#allocation2 + $0x48] sm:$0xff] }
  0xe7   :  { %281 = vst.msk [vmem:[#allocation2 + $0x78] sm:$0xff] %vm15_vm1, %v265_v17  ;;  %v254_v55 = vadd.f32 %v203_v47, %v72_v10  ;;  %v2825_v6 = vpop.f32.mrb[6].mxu0  ;;  %v284_v14 = vld [vmem:[#allocation2 + $0x10] sm:$0xff] }
  0xe8   :  { %279 = vst.msk [vmem:[#allocation2 + $0x68] sm:$0xff] %vm15_vm1, %v263_v43  ;;  %272 = vst.msk [vmem:[#allocation2 + $0x30] sm:$0xff] %vm15_vm1, %v256_v19  ;;  %v257_v22 = vadd.f32 %v2825_v6, %v75_v46  ;;  %v206_v36 = vpop.f32.mrb[7].mxu0  ;;  %v282_v26 = vld [vmem:[#allocation2] sm:$0xff] }
  0xe9   :  { %270 = vst.msk [vmem:[#allocation2 + $0x20] sm:$0xff] %vm15_vm1, %v254_v55  ;;  %v255_v11 = vadd.f32 %v206_v36, %v73_v21  ;;  %v285_v33 = vld [vmem:[#allocation2 + $0x18] sm:$0xff] }
  0xea   :  { %273 = vst.msk [vmem:[#allocation2 + $0x38] sm:$0xff] %vm15_vm1, %v257_v22  ;;  %v283_v20 = vld [vmem:[#allocation2 + $0x8] sm:$0xff] }
  0xeb   :  { %271 = vst.msk [vmem:[#allocation2 + $0x28] sm:$0xff] %vm15_vm1, %v255_v11 }
  0xed   :  { %v2838_v31 = vpop.f32.mrb[8].mxu1 }
  0xee   :  { %v677_v24 = vadd.f32 %v2838_v31, %v284_v14  ;;  %v612_v18 = vpop.f32.mrb[9].mxu1  ;;  %v2856_v51 = vpop.f32.mrb[8].mxu0  ;;  %v296_v14 = vld [vmem:[#allocation2 + $0x70] sm:$0xff] }
  0xef   :  { %v675_v62 = vadd.f32 %v612_v18, %v282_v26  ;;  %v2839_v0 = vpop.f32.mrb[10].mxu1  ;;  %v798_v3 = vpop.f32.mrb[9].mxu0  ;;  %v288_v39 = vld [vmem:[#allocation2 + $0x30] sm:$0xff] }
  0xf0   :  { %693 = vst.msk [vmem:[#allocation2 + $0x10] sm:$0xff] %vm15_vm1, %v677_v24  ;;  %v678_v53 = vadd.f32 %v2839_v0, %v285_v33  ;;  %v615_v16 = vpop.f32.mrb[11].mxu1  ;;  %v2857_v28 = vpop.f32.mrb[10].mxu0  ;;  %v286_v29 = vld [vmem:[#allocation2 + $0x20] sm:$0xff] }
  0xf1   :  { %691 = vst.msk [vmem:[#allocation2] sm:$0xff] %vm15_vm1, %v675_v62  ;;  %v676_v34 = vadd.f32 %v615_v16, %v283_v20  ;;  %v801_v35 = vpop.f32.mrb[11].mxu0  ;;  %v289_v27 = vld [vmem:[#allocation2 + $0x38] sm:$0xff]  ;;  %v294_v33 = vld [vmem:[#allocation2 + $0x60] sm:$0xff] }
  0xf2   :  { %694 = vst.msk [vmem:[#allocation2 + $0x18] sm:$0xff] %vm15_vm1, %v678_v53  ;;  %v287_v63 = vld [vmem:[#allocation2 + $0x28] sm:$0xff]  ;;  %v297_v62 = vld [vmem:[#allocation2 + $0x78] sm:$0xff] }
  0xf3   :  { %692 = vst.msk [vmem:[#allocation2 + $0x8] sm:$0xff] %vm15_vm1, %v676_v34  ;;  %v295_v34 = vld [vmem:[#allocation2 + $0x68] sm:$0xff] }
  0xf6   :  { %v2842_v57 = vpop.f32.mrb[12].mxu1 }
  0xf7   :  { %v681_v44 = vadd.f32 %v2842_v57, %v288_v39  ;;  %v709_v40 = vld [vmem:[#allocation2 + $0x10] sm:$0xff]  ;;  %v628_v60 = vpop.f32.mrb[13].mxu1  ;;  %v2860_v52 = vpop.f32.mrb[12].mxu0 }
  0xf8   :  { %v863_v45 = vadd.f32 %v2856_v51, %v709_v40  ;;  %v679_v38 = vadd.f32 %v628_v60, %v286_v29  ;;  %v707_v48 = vld [vmem:[#allocation2] sm:$0xff]  ;;  %v2843_v56 = vpop.f32.mrb[14].mxu1  ;;  %v814_v4 = vpop.f32.mrb[13].mxu0 }
  0xf9   :  { %697 = vst.msk [vmem:[#allocation2 + $0x30] sm:$0xff] %vm15_vm1, %v681_v44  ;;  %v861_v7 = vadd.f32 %v798_v3, %v707_v48  ;;  %v682_v9 = vadd.f32 %v2843_v56, %v289_v27  ;;  %v710_v2 = vld [vmem:[#allocation2 + $0x18] sm:$0xff]  ;;  %v631_v30 = vpop.f32.mrb[15].mxu1  ;;  %v2861_v49 = vpop.f32.mrb[14].mxu0 }
  0xfa   :  { %879 = vst.msk [vmem:[#allocation2 + $0x10] sm:$0xff] %vm15_vm1, %v863_v45  ;;  %695 = vst.msk [vmem:[#allocation2 + $0x20] sm:$0xff] %vm15_vm1, %v679_v38  ;;  %v864_v15 = vadd.f32 %v2857_v28, %v710_v2  ;;  %v680_v32 = vadd.f32 %v631_v30, %v287_v63  ;;  %v708_v8 = vld [vmem:[#allocation2 + $0x8] sm:$0xff]  ;;  %v817_v42 = vpop.f32.mrb[15].mxu0 }
  0xfb   :  { %877 = vst.msk [vmem:[#allocation2] sm:$0xff] %vm15_vm1, %v861_v7  ;;  %698 = vst.msk [vmem:[#allocation2 + $0x38] sm:$0xff] %vm15_vm1, %v682_v9  ;;  %v862_v50 = vadd.f32 %v801_v35, %v708_v8 }
  0xfc   :  { %880 = vst.msk [vmem:[#allocation2 + $0x18] sm:$0xff] %vm15_vm1, %v864_v15  ;;  %696 = vst.msk [vmem:[#allocation2 + $0x28] sm:$0xff] %vm15_vm1, %v680_v32 }
  0xfd   :  { %878 = vst.msk [vmem:[#allocation2 + $0x8] sm:$0xff] %vm15_vm1, %v862_v50 }
  0xfe   :  { %v2846_v12 = vpop.f32.mrb[16].mxu1 }
  0xff   :  { %v685_v59 = vadd.f32 %v2846_v12, %v292_v23  ;;  %v644_v1 = vpop.f32.mrb[17].mxu1  ;;  %v2864_v5 = vpop.f32.mrb[16].mxu0 }
 0x100   :  { %v713_v41 = vld [vmem:[#allocation2 + $0x30] sm:$0xff]  ;;  %v683_v54 = vadd.f32 %v644_v1, %v290_v61  ;;  %v2847_v25 = vpop.f32.mrb[18].mxu1  ;;  %v830_v17 = vpop.f32.mrb[17].mxu0 }
 0x101   :  { %701 = vst.msk [vmem:[#allocation2 + $0x50] sm:$0xff] %vm15_vm1, %v685_v59  ;;  %v867_v13 = vadd.f32 %v2860_v52, %v713_v41  ;;  %v711_v10 = vld [vmem:[#allocation2 + $0x20] sm:$0xff]  ;;  %v686_v43 = vadd.f32 %v2847_v25, %v293_v58  ;;  %v647_v46 = vpop.f32.mrb[19].mxu1  ;;  %v2865_v19 = vpop.f32.mrb[18].mxu0  ;;  %v895_v52 = vld [vmem:[#allocation2 + $0x10] sm:$0xff] }
 0x102   :  { %699 = vst.msk [vmem:[#allocation2 + $0x40] sm:$0xff] %vm15_vm1, %v683_v54  ;;  %v865_v47 = vadd.f32 %v814_v4, %v711_v10  ;;  %v714_v21 = vld [vmem:[#allocation2 + $0x38] sm:$0xff]  ;;  %v684_v55 = vadd.f32 %v647_v46, %v291_v37  ;;  %v833_v6 = vpop.f32.mrb[19].mxu0  ;;  %v893_v48 = vld [vmem:[#allocation2] sm:$0xff] }
 0x103   :  { %883 = vst.msk [vmem:[#allocation2 + $0x30] sm:$0xff] %vm15_vm1, %v867_v13  ;;  %702 = vst.msk [vmem:[#allocation2 + $0x58] sm:$0xff] %vm15_vm1, %v686_v43  ;;  %v868_v22 = vadd.f32 %v2861_v49, %v714_v21  ;;  %v712_v36 = vld [vmem:[#allocation2 + $0x28] sm:$0xff]  ;;  %v896_v9 = vld [vmem:[#allocation2 + $0x18] sm:$0xff] }
 0x104   :  { %881 = vst.msk [vmem:[#allocation2 + $0x20] sm:$0xff] %vm15_vm1, %v865_v47  ;;  %700 = vst.msk [vmem:[#allocation2 + $0x48] sm:$0xff] %vm15_vm1, %v684_v55  ;;  %v866_v11 = vadd.f32 %v817_v42, %v712_v36  ;;  %v894_v8 = vld [vmem:[#allocation2 + $0x8] sm:$0xff] }
 0x105   :  { %884 = vst.msk [vmem:[#allocation2 + $0x38] sm:$0xff] %vm15_vm1, %v868_v22 }
 0x106   :  { %882 = vst.msk [vmem:[#allocation2 + $0x28] sm:$0xff] %vm15_vm1, %v866_v11  ;;  %v2850_v26 = vpop.f32.mrb[20].mxu1 }
 0x107   :  { %v689_v31 = vadd.f32 %v2850_v26, %v296_v14  ;;  %v660_v24 = vpop.f32.mrb[21].mxu1  ;;  %v2868_v18 = vpop.f32.mrb[20].mxu0 }
 0x108   :  { %v717_v20 = vld [vmem:[#allocation2 + $0x50] sm:$0xff]  ;;  %v687_v51 = vadd.f32 %v660_v24, %v294_v33  ;;  %v2851_v0 = vpop.f32.mrb[22].mxu1  ;;  %v846_v3 = vpop.f32.mrb[21].mxu0 }
 0x109   :  { %705 = vst.msk [vmem:[#allocation2 + $0x70] sm:$0xff] %vm15_vm1, %v689_v31  ;;  %v871_v53 = vadd.f32 %v2864_v5, %v717_v20  ;;  %v715_v16 = vld [vmem:[#allocation2 + $0x40] sm:$0xff]  ;;  %v690_v28 = vadd.f32 %v2851_v0, %v297_v62  ;;  %v663_v35 = vpop.f32.mrb[23].mxu1  ;;  %v2869_v39 = vpop.f32.mrb[22].mxu0 }
 0x10a   :  { %703 = vst.msk [vmem:[#allocation2 + $0x60] sm:$0xff] %vm15_vm1, %v687_v51  ;;  %v869_v29 = vadd.f32 %v830_v17, %v715_v16  ;;  %v718_v57 = vld [vmem:[#allocation2 + $0x58] sm:$0xff]  ;;  %v688_v27 = vadd.f32 %v663_v35, %v295_v34  ;;  %v849_v44 = vpop.f32.mrb[23].mxu0  ;;  %v899_v58 = vld [vmem:[#allocation2 + $0x30] sm:$0xff] }
 0x10b   :  { %887 = vst.msk [vmem:[#allocation2 + $0x50] sm:$0xff] %vm15_vm1, %v871_v53  ;;  %706 = vst.msk [vmem:[#allocation2 + $0x78] sm:$0xff] %vm15_vm1, %v690_v28  ;;  %v872_v40 = vadd.f32 %v2865_v19, %v718_v57  ;;  %v716_v60 = vld [vmem:[#allocation2 + $0x48] sm:$0xff]  ;;  %v897_v13 = vld [vmem:[#allocation2 + $0x20] sm:$0xff] }
 0x10c   :  { %885 = vst.msk [vmem:[#allocation2 + $0x40] sm:$0xff] %vm15_vm1, %v869_v29  ;;  %704 = vst.msk [vmem:[#allocation2 + $0x68] sm:$0xff] %vm15_vm1, %v688_v27  ;;  %v870_v63 = vadd.f32 %v833_v6, %v716_v60  ;;  %v900_v46 = vld [vmem:[#allocation2 + $0x38] sm:$0xff] }
 0x10d   :  { %888 = vst.msk [vmem:[#allocation2 + $0x58] sm:$0xff] %vm15_vm1, %v872_v40  ;;  %v898_v22 = vld [vmem:[#allocation2 + $0x28] sm:$0xff] }
 0x10e   :  { %886 = vst.msk [vmem:[#allocation2 + $0x48] sm:$0xff] %vm15_vm1, %v870_v63  ;;  %v2874_v45 = vpop.f32.mrb[24].mxu1 }
 0x10f   :  { %v1075_v38 = vadd.f32 %v2874_v45, %v895_v52  ;;  %v1010_v56 = vpop.f32.mrb[25].mxu1 }
 0x110   :  { %v721_v4 = vld [vmem:[#allocation2 + $0x70] sm:$0xff]  ;;  %v1073_v7 = vadd.f32 %v1010_v56, %v893_v48  ;;  %v2875_v2 = vpop.f32.mrb[26].mxu1  ;;  %v2892_v30 = vpop.f32.mrb[24].mxu0 }
 0x111   :  { %v875_v49 = vadd.f32 %v2868_v18, %v721_v4  ;;  %1091 = vst.msk [vmem:[#allocation2 + $0x10] sm:$0xff] %vm15_vm1, %v1075_v38  ;;  %v719_v15 = vld [vmem:[#allocation2 + $0x60] sm:$0xff]  ;;  %v1076_v32 = vadd.f32 %v2875_v2, %v896_v9  ;;  %v1013_v42 = vpop.f32.mrb[27].mxu1  ;;  %v1243_v50 = vpop.f32.mrb[25].mxu0 }
 0x112   :  { %v873_v23 = vadd.f32 %v846_v3, %v719_v15  ;;  %1089 = vst.msk [vmem:[#allocation2] sm:$0xff] %vm15_vm1, %v1073_v7  ;;  %v722_v12 = vld [vmem:[#allocation2 + $0x78] sm:$0xff]  ;;  %v1074_v59 = vadd.f32 %v1013_v42, %v894_v8  ;;  %v2893_v61 = vpop.f32.mrb[26].mxu0  ;;  %v903_v62 = vld [vmem:[#allocation2 + $0x50] sm:$0xff] }
 0x113   :  { %891 = vst.msk [vmem:[#allocation2 + $0x70] sm:$0xff] %vm15_vm1, %v875_v49  ;;  %v876_v1 = vadd.f32 %v2869_v39, %v722_v12  ;;  %1092 = vst.msk [vmem:[#allocation2 + $0x18] sm:$0xff] %vm15_vm1, %v1076_v32  ;;  %v720_v5 = vld [vmem:[#allocation2 + $0x68] sm:$0xff]  ;;  %v1246_v41 = vpop.f32.mrb[27].mxu0  ;;  %v901_v53 = vld [vmem:[#allocation2 + $0x40] sm:$0xff] }
 0x114   :  { %889 = vst.msk [vmem:[#allocation2 + $0x60] sm:$0xff] %vm15_vm1, %v873_v23  ;;  %v874_v54 = vadd.f32 %v849_v44, %v720_v5  ;;  %1090 = vst.msk [vmem:[#allocation2 + $0x8] sm:$0xff] %vm15_vm1, %v1074_v59  ;;  %v904_v35 = vld [vmem:[#allocation2 + $0x58] sm:$0xff] }
 0x115   :  { %892 = vst.msk [vmem:[#allocation2 + $0x78] sm:$0xff] %vm15_vm1, %v876_v1  ;;  %v902_v40 = vld [vmem:[#allocation2 + $0x48] sm:$0xff] }
 0x116   :  { %890 = vst.msk [vmem:[#allocation2 + $0x68] sm:$0xff] %vm15_vm1, %v874_v54  ;;  %v2878_v25 = vpop.f32.mrb[28].mxu1 }
 0x117   :  { %v1079_v17 = vadd.f32 %v2878_v25, %v899_v58  ;;  %v1026_v10 = vpop.f32.mrb[29].mxu1 }
 0x118   :  { %v1126_v43 = vld [vmem:[#allocation2 + $0x10] sm:$0xff]  ;;  %v1077_v37 = vadd.f32 %v1026_v10, %v897_v13  ;;  %v2879_v19 = vpop.f32.mrb[30].mxu1  ;;  %v2896_v47 = vpop.f32.mrb[28].mxu0 }
 0x119   :  { %1095 = vst.msk [vmem:[#allocation2 + $0x30] sm:$0xff] %vm15_vm1, %v1079_v17  ;;  %v1308_v21 = vadd.f32 %v2892_v30, %v1126_v43  ;;  %v1124_v55 = vld [vmem:[#allocation2] sm:$0xff]  ;;  %v1080_v6 = vadd.f32 %v2879_v19, %v900_v46  ;;  %v1029_v36 = vpop.f32.mrb[31].mxu1  ;;  %v1259_v11 = vpop.f32.mrb[29].mxu0 }
 0x11a   :  { %1093 = vst.msk [vmem:[#allocation2 + $0x20] sm:$0xff] %vm15_vm1, %v1077_v37  ;;  %v1306_v14 = vadd.f32 %v1243_v50, %v1124_v55  ;;  %v1127_v26 = vld [vmem:[#allocation2 + $0x18] sm:$0xff]  ;;  %v1078_v31 = vadd.f32 %v1029_v36, %v898_v22  ;;  %v2897_v33 = vpop.f32.mrb[30].mxu0  ;;  %v907_v2 = vld [vmem:[#allocation2 + $0x70] sm:$0xff] }
 0x11b   :  { %1324 = vst.msk [vmem:[#allocation2 + $0x10] sm:$0xff] %vm15_vm1, %v1308_v21  ;;  %1096 = vst.msk [vmem:[#allocation2 + $0x38] sm:$0xff] %vm15_vm1, %v1080_v6  ;;  %v1309_v24 = vadd.f32 %v2893_v61, %v1127_v26  ;;  %v1125_v18 = vld [vmem:[#allocation2 + $0x8] sm:$0xff]  ;;  %v1262_v20 = vpop.f32.mrb[31].mxu0  ;;  %v905_v15 = vld [vmem:[#allocation2 + $0x60] sm:$0xff] }
 0x11c   :  { %1322 = vst.msk [vmem:[#allocation2] sm:$0xff] %vm15_vm1, %v1306_v14  ;;  %1094 = vst.msk [vmem:[#allocation2 + $0x28] sm:$0xff] %vm15_vm1, %v1078_v31  ;;  %v1307_v51 = vadd.f32 %v1246_v41, %v1125_v18  ;;  %v908_v50 = vld [vmem:[#allocation2 + $0x78] sm:$0xff] }
 0x11d   :  { %1325 = vst.msk [vmem:[#allocation2 + $0x18] sm:$0xff] %vm15_vm1, %v1309_v24  ;;  %v906_v5 = vld [vmem:[#allocation2 + $0x68] sm:$0xff] }
 0x11e   :  { %1323 = vst.msk [vmem:[#allocation2 + $0x8] sm:$0xff] %vm15_vm1, %v1307_v51  ;;  %v2882_v0 = vpop.f32.mrb[32].mxu1 }
 0x11f   :  { %v1083_v3 = vadd.f32 %v2882_v0, %v903_v62  ;;  %v1042_v16 = vpop.f32.mrb[33].mxu1 }
 0x120   :  { %v1130_v28 = vld [vmem:[#allocation2 + $0x30] sm:$0xff]  ;;  %v1081_v34 = vadd.f32 %v1042_v16, %v901_v53  ;;  %v2883_v39 = vpop.f32.mrb[34].mxu1  ;;  %v2900_v29 = vpop.f32.mrb[32].mxu0 }
 0x121   :  { %1099 = vst.msk [vmem:[#allocation2 + $0x50] sm:$0xff] %vm15_vm1, %v1083_v3  ;;  %v1312_v57 = vadd.f32 %v2896_v47, %v1130_v28  ;;  %v1128_v27 = vld [vmem:[#allocation2 + $0x20] sm:$0xff]  ;;  %v1084_v44 = vadd.f32 %v2883_v39, %v904_v35  ;;  %v1045_v60 = vpop.f32.mrb[35].mxu1  ;;  %v1275_v63 = vpop.f32.mrb[33].mxu0 }
 0x122   :  { %1097 = vst.msk [vmem:[#allocation2 + $0x40] sm:$0xff] %vm15_vm1, %v1081_v34  ;;  %v1310_v52 = vadd.f32 %v1259_v11, %v1128_v27  ;;  %v1131_v45 = vld [vmem:[#allocation2 + $0x38] sm:$0xff]  ;;  %v1082_v38 = vadd.f32 %v1045_v60, %v902_v40  ;;  %v2901_v48 = vpop.f32.mrb[34].mxu0  ;;  %v1340_v19 = vld [vmem:[#allocation2 + $0x10] sm:$0xff] }
 0x123   :  { %1328 = vst.msk [vmem:[#allocation2 + $0x30] sm:$0xff] %vm15_vm1, %v1312_v57  ;;  %1100 = vst.msk [vmem:[#allocation2 + $0x58] sm:$0xff] %vm15_vm1, %v1084_v44  ;;  %v1313_v56 = vadd.f32 %v2897_v33, %v1131_v45  ;;  %v1129_v4 = vld [vmem:[#allocation2 + $0x28] sm:$0xff]  ;;  %v1278_v7 = vpop.f32.mrb[35].mxu0  ;;  %v1338_v55 = vld [vmem:[#allocation2] sm:$0xff] }
 0x124   :  { %1326 = vst.msk [vmem:[#allocation2 + $0x20] sm:$0xff] %vm15_vm1, %v1310_v52  ;;  %1098 = vst.msk [vmem:[#allocation2 + $0x48] sm:$0xff] %vm15_vm1, %v1082_v38  ;;  %v1311_v9 = vadd.f32 %v1262_v20, %v1129_v4  ;;  %v1341_v11 = vld [vmem:[#allocation2 + $0x18] sm:$0xff] }
 0x125   :  { %1329 = vst.msk [vmem:[#allocation2 + $0x38] sm:$0xff] %vm15_vm1, %v1313_v56  ;;  %v1339_v18 = vld [vmem:[#allocation2 + $0x8] sm:$0xff] }
 0x126   :  { %1327 = vst.msk [vmem:[#allocation2 + $0x28] sm:$0xff] %vm15_vm1, %v1311_v9  ;;  %v2886_v30 = vpop.f32.mrb[36].mxu1 }
 0x127   :  { %v1087_v49 = vadd.f32 %v2886_v30, %v907_v2  ;;  %v1058_v32 = vpop.f32.mrb[37].mxu1 }
 0x128   :  { %v1134_v8 = vld [vmem:[#allocation2 + $0x50] sm:$0xff]  ;;  %v1085_v42 = vadd.f32 %v1058_v32, %v905_v15  ;;  %v2887_v23 = vpop.f32.mrb[38].mxu1  ;;  %v2904_v12 = vpop.f32.mrb[36].mxu0 }
 0x129   :  { %1103 = vst.msk [vmem:[#allocation2 + $0x70] sm:$0xff] %vm15_vm1, %v1087_v49  ;;  %v1316_v59 = vadd.f32 %v2900_v29, %v1134_v8  ;;  %v1132_v61 = vld [vmem:[#allocation2 + $0x40] sm:$0xff]  ;;  %v1088_v1 = vadd.f32 %v2887_v23, %v908_v50  ;;  %v1061_v41 = vpop.f32.mrb[39].mxu1  ;;  %v1291_v54 = vpop.f32.mrb[37].mxu0 }
 0x12a   :  { %1101 = vst.msk [vmem:[#allocation2 + $0x60] sm:$0xff] %vm15_vm1, %v1085_v42  ;;  %v1314_v58 = vadd.f32 %v1275_v63, %v1132_v61  ;;  %v1135_v25 = vld [vmem:[#allocation2 + $0x58] sm:$0xff]  ;;  %v1086_v17 = vadd.f32 %v1061_v41, %v906_v5  ;;  %v2905_v13 = vpop.f32.mrb[38].mxu0  ;;  %v1344_v39 = vld [vmem:[#allocation2 + $0x30] sm:$0xff] }
 0x12b   :  { %1332 = vst.msk [vmem:[#allocation2 + $0x50] sm:$0xff] %vm15_vm1, %v1316_v59  ;;  %1104 = vst.msk [vmem:[#allocation2 + $0x78] sm:$0xff] %vm15_vm1, %v1088_v1  ;;  %v1317_v10 = vadd.f32 %v2901_v48, %v1135_v25  ;;  %v1133_v43 = vld [vmem:[#allocation2 + $0x48] sm:$0xff]  ;;  %v1294_v37 = vpop.f32.mrb[39].mxu0  ;;  %v1342_v27 = vld [vmem:[#allocation2 + $0x20] sm:$0xff] }
 0x12c   :  { %1330 = vst.msk [vmem:[#allocation2 + $0x40] sm:$0xff] %vm15_vm1, %v1314_v58  ;;  %1102 = vst.msk [vmem:[#allocation2 + $0x68] sm:$0xff] %vm15_vm1, %v1086_v17  ;;  %v1315_v46 = vadd.f32 %v1278_v7, %v1133_v43  ;;  %v1345_v63 = vld [vmem:[#allocation2 + $0x38] sm:$0xff] }
 0x12d   :  { %1333 = vst.msk [vmem:[#allocation2 + $0x58] sm:$0xff] %vm15_vm1, %v1317_v10  ;;  %v1343_v4 = vld [vmem:[#allocation2 + $0x28] sm:$0xff] }
 0x12e   :  { %1331 = vst.msk [vmem:[#allocation2 + $0x48] sm:$0xff] %vm15_vm1, %v1315_v46  ;;  %v2910_v47 = vpop.f32.mrb[40].mxu1 }
 0x12f   :  { %v1494_v21 = vadd.f32 %v2910_v47, %v1340_v19  ;;  %v1429_v6 = vpop.f32.mrb[41].mxu1 }
 0x130   :  { %v1138_v22 = vld [vmem:[#allocation2 + $0x70] sm:$0xff]  ;;  %v1492_v36 = vadd.f32 %v1429_v6, %v1338_v55  ;;  %v2911_v14 = vpop.f32.mrb[42].mxu1  ;;  %v2928_v26 = vpop.f32.mrb[40].mxu0 }
 0x131   :  { %v1320_v31 = vadd.f32 %v2904_v12, %v1138_v22  ;;  %1510 = vst.msk [vmem:[#allocation2 + $0x10] sm:$0xff] %vm15_vm1, %v1494_v21  ;;  %v1136_v33 = vld [vmem:[#allocation2 + $0x60] sm:$0xff]  ;;  %v1495_v24 = vadd.f32 %v2911_v14, %v1341_v11  ;;  %v1432_v20 = vpop.f32.mrb[43].mxu1  ;;  %v1676_v51 = vpop.f32.mrb[41].mxu0 }
 0x132   :  { %v1318_v62 = vadd.f32 %v1291_v54, %v1136_v33  ;;  %1508 = vst.msk [vmem:[#allocation2] sm:$0xff] %vm15_vm1, %v1492_v36  ;;  %v1139_v0 = vld [vmem:[#allocation2 + $0x78] sm:$0xff]  ;;  %v1493_v3 = vadd.f32 %v1432_v20, %v1339_v18  ;;  %v2929_v53 = vpop.f32.mrb[42].mxu0  ;;  %v1348_v23 = vld [vmem:[#allocation2 + $0x50] sm:$0xff] }
 0x133   :  { %1336 = vst.msk [vmem:[#allocation2 + $0x70] sm:$0xff] %vm15_vm1, %v1320_v31  ;;  %v1321_v16 = vadd.f32 %v2905_v13, %v1139_v0  ;;  %1511 = vst.msk [vmem:[#allocation2 + $0x18] sm:$0xff] %vm15_vm1, %v1495_v24  ;;  %v1137_v28 = vld [vmem:[#allocation2 + $0x68] sm:$0xff]  ;;  %v1679_v34 = vpop.f32.mrb[43].mxu0  ;;  %v1346_v61 = vld [vmem:[#allocation2 + $0x40] sm:$0xff] }
 0x134   :  { %1334 = vst.msk [vmem:[#allocation2 + $0x60] sm:$0xff] %vm15_vm1, %v1318_v62  ;;  %v1319_v35 = vadd.f32 %v1294_v37, %v1137_v28  ;;  %1509 = vst.msk [vmem:[#allocation2 + $0x8] sm:$0xff] %vm15_vm1, %v1493_v3  ;;  %v1349_v54 = vld [vmem:[#allocation2 + $0x58] sm:$0xff] }
 0x135   :  { %1337 = vst.msk [vmem:[#allocation2 + $0x78] sm:$0xff] %vm15_vm1, %v1321_v16  ;;  %v1347_v43 = vld [vmem:[#allocation2 + $0x48] sm:$0xff] }
 0x136   :  { %1335 = vst.msk [vmem:[#allocation2 + $0x68] sm:$0xff] %vm15_vm1, %v1319_v35  ;;  %v2914_v29 = vpop.f32.mrb[44].mxu1 }
 0x137   :  { %v1498_v57 = vadd.f32 %v2914_v29, %v1344_v39  ;;  %v1445_v44 = vpop.f32.mrb[45].mxu1 }
 0x138   :  { %v1559_v40 = vld [vmem:[#allocation2 + $0x10] sm:$0xff]  ;;  %v1496_v60 = vadd.f32 %v1445_v44, %v1342_v27  ;;  %v2915_v52 = vpop.f32.mrb[46].mxu1  ;;  %v2932_v45 = vpop.f32.mrb[44].mxu0 }
 0x139   :  { %1514 = vst.msk [vmem:[#allocation2 + $0x30] sm:$0xff] %vm15_vm1, %v1498_v57  ;;  %v1741_v38 = vadd.f32 %v2928_v26, %v1559_v40  ;;  %v1557_v48 = vld [vmem:[#allocation2] sm:$0xff]  ;;  %v1499_v56 = vadd.f32 %v2915_v52, %v1345_v63  ;;  %v1448_v7 = vpop.f32.mrb[47].mxu1  ;;  %v1692_v9 = vpop.f32.mrb[45].mxu0 }
 0x13a   :  { %1512 = vst.msk [vmem:[#allocation2 + $0x20] sm:$0xff] %vm15_vm1, %v1496_v60  ;;  %v1739_v2 = vadd.f32 %v1676_v51, %v1557_v48  ;;  %v1560_v30 = vld [vmem:[#allocation2 + $0x18] sm:$0xff]  ;;  %v1497_v49 = vadd.f32 %v1448_v7, %v1343_v4  ;;  %v2933_v15 = vpop.f32.mrb[46].mxu0  ;;  %v1352_v14 = vld [vmem:[#allocation2 + $0x70] sm:$0xff] }
 0x13b   :  { %1757 = vst.msk [vmem:[#allocation2 + $0x10] sm:$0xff] %vm15_vm1, %v1741_v38  ;;  %1515 = vst.msk [vmem:[#allocation2 + $0x38] sm:$0xff] %vm15_vm1, %v1499_v56  ;;  %v1742_v32 = vadd.f32 %v2929_v53, %v1560_v30  ;;  %v1558_v8 = vld [vmem:[#allocation2 + $0x8] sm:$0xff]  ;;  %v1695_v42 = vpop.f32.mrb[47].mxu0  ;;  %v1350_v33 = vld [vmem:[#allocation2 + $0x60] sm:$0xff] }
 0x13c   :  { %1755 = vst.msk [vmem:[#allocation2] sm:$0xff] %vm15_vm1, %v1739_v2  ;;  %1513 = vst.msk [vmem:[#allocation2 + $0x28] sm:$0xff] %vm15_vm1, %v1497_v49  ;;  %v1740_v50 = vadd.f32 %v1679_v34, %v1558_v8  ;;  %v1353_v51 = vld [vmem:[#allocation2 + $0x78] sm:$0xff] }
 0x13d   :  { %1758 = vst.msk [vmem:[#allocation2 + $0x18] sm:$0xff] %vm15_vm1, %v1742_v32  ;;  %v1351_v28 = vld [vmem:[#allocation2 + $0x68] sm:$0xff] }
 0x13e   :  { %1756 = vst.msk [vmem:[#allocation2 + $0x8] sm:$0xff] %vm15_vm1, %v1740_v50  ;;  %v2918_v12 = vpop.f32.mrb[48].mxu1 }
 0x13f   :  { %v1502_v59 = vadd.f32 %v2918_v12, %v1348_v23  ;;  %v1461_v1 = vpop.f32.mrb[49].mxu1 }
 0x140   :  { %v1563_v5 = vld [vmem:[#allocation2 + $0x30] sm:$0xff]  ;;  %v1500_v41 = vadd.f32 %v1461_v1, %v1346_v61  ;;  %v2919_v58 = vpop.f32.mrb[50].mxu1  ;;  %v2936_v25 = vpop.f32.mrb[48].mxu0 }
 0x141   :  { %1518 = vst.msk [vmem:[#allocation2 + $0x50] sm:$0xff] %vm15_vm1, %v1502_v59  ;;  %v1745_v17 = vadd.f32 %v2932_v45, %v1563_v5  ;;  %v1561_v13 = vld [vmem:[#allocation2 + $0x20] sm:$0xff]  ;;  %v1503_v10 = vadd.f32 %v2919_v58, %v1349_v54  ;;  %v1464_v37 = vpop.f32.mrb[51].mxu1  ;;  %v1708_v46 = vpop.f32.mrb[49].mxu0 }
 0x142   :  { %1516 = vst.msk [vmem:[#allocation2 + $0x40] sm:$0xff] %vm15_vm1, %v1500_v41  ;;  %v1743_v19 = vadd.f32 %v1692_v9, %v1561_v13  ;;  %v1564_v47 = vld [vmem:[#allocation2 + $0x38] sm:$0xff]  ;;  %v1501_v21 = vadd.f32 %v1464_v37, %v1347_v43  ;;  %v2937_v55 = vpop.f32.mrb[50].mxu0  ;;  %v1773_v52 = vld [vmem:[#allocation2 + $0x10] sm:$0xff] }
 0x143   :  { %1761 = vst.msk [vmem:[#allocation2 + $0x30] sm:$0xff] %vm15_vm1, %v1745_v17  ;;  %1519 = vst.msk [vmem:[#allocation2 + $0x58] sm:$0xff] %vm15_vm1, %v1503_v10  ;;  %v1746_v6 = vadd.f32 %v2933_v15, %v1564_v47  ;;  %v1562_v22 = vld [vmem:[#allocation2 + $0x28] sm:$0xff]  ;;  %v1711_v36 = vpop.f32.mrb[51].mxu0  ;;  %v1771_v48 = vld [vmem:[#allocation2] sm:$0xff] }
 0x144   :  { %1759 = vst.msk [vmem:[#allocation2 + $0x20] sm:$0xff] %vm15_vm1, %v1743_v19  ;;  %1517 = vst.msk [vmem:[#allocation2 + $0x48] sm:$0xff] %vm15_vm1, %v1501_v21  ;;  %v1744_v11 = vadd.f32 %v1695_v42, %v1562_v22  ;;  %v1774_v9 = vld [vmem:[#allocation2 + $0x18] sm:$0xff] }
 0x145   :  { %1762 = vst.msk [vmem:[#allocation2 + $0x38] sm:$0xff] %vm15_vm1, %v1746_v6  ;;  %v1772_v8 = vld [vmem:[#allocation2 + $0x8] sm:$0xff] }
 0x146   :  { %1760 = vst.msk [vmem:[#allocation2 + $0x28] sm:$0xff] %vm15_vm1, %v1744_v11  ;;  %v2922_v26 = vpop.f32.mrb[52].mxu1 }
 0x147   :  { %v1506_v31 = vadd.f32 %v2922_v26, %v1352_v14  ;;  %v1477_v24 = vpop.f32.mrb[53].mxu1 }
 0x148   :  { %v1567_v18 = vld [vmem:[#allocation2 + $0x50] sm:$0xff]  ;;  %v1504_v20 = vadd.f32 %v1477_v24, %v1350_v33  ;;  %v2923_v62 = vpop.f32.mrb[54].mxu1  ;;  %v2940_v0 = vpop.f32.mrb[52].mxu0 }
 0x149   :  { %1522 = vst.msk [vmem:[#allocation2 + $0x70] sm:$0xff] %vm15_vm1, %v1506_v31  ;;  %v1749_v3 = vadd.f32 %v2936_v25, %v1567_v18  ;;  %v1565_v53 = vld [vmem:[#allocation2 + $0x40] sm:$0xff]  ;;  %v1507_v16 = vadd.f32 %v2923_v62, %v1353_v51  ;;  %v1480_v34 = vpop.f32.mrb[55].mxu1  ;;  %v1724_v35 = vpop.f32.mrb[53].mxu0 }
 0x14a   :  { %1520 = vst.msk [vmem:[#allocation2 + $0x60] sm:$0xff] %vm15_vm1, %v1504_v20  ;;  %v1747_v39 = vadd.f32 %v1708_v46, %v1565_v53  ;;  %v1568_v29 = vld [vmem:[#allocation2 + $0x58] sm:$0xff]  ;;  %v1505_v57 = vadd.f32 %v1480_v34, %v1351_v28  ;;  %v2941_v27 = vpop.f32.mrb[54].mxu0  ;;  %v1777_v58 = vld [vmem:[#allocation2 + $0x30] sm:$0xff]  ;;  %v4016_v28 = vld [vmem:[%s4120_s2] ss:$0 sm:$0xff] }
 0x14b   :  { %1765 = vst.msk [vmem:[#allocation2 + $0x50] sm:$0xff] %vm15_vm1, %v1749_v3  ;;  %1523 = vst.msk [vmem:[#allocation2 + $0x78] sm:$0xff] %vm15_vm1, %v1507_v16  ;;  %v1750_v44 = vadd.f32 %v2937_v55, %v1568_v29  ;;  %v1566_v40 = vld [vmem:[#allocation2 + $0x48] sm:$0xff]  ;;  %v1727_v60 = vpop.f32.mrb[55].mxu0  ;;  %v1775_v13 = vld [vmem:[#allocation2 + $0x20] sm:$0xff] }
 0x14c   :  { %1763 = vst.msk [vmem:[#allocation2 + $0x40] sm:$0xff] %vm15_vm1, %v1747_v39  ;;  %1521 = vst.msk [vmem:[#allocation2 + $0x68] sm:$0xff] %vm15_vm1, %v1505_v57  ;;  %v1748_v63 = vadd.f32 %v1711_v36, %v1566_v40  ;;  %v1778_v46 = vld [vmem:[#allocation2 + $0x38] sm:$0xff] }
 0x14d   :  { %1766 = vst.msk [vmem:[#allocation2 + $0x58] sm:$0xff] %vm15_vm1, %v1750_v44  ;;  %v1776_v22 = vld [vmem:[#allocation2 + $0x28] sm:$0xff] }
 0x14e   :  { %1764 = vst.msk [vmem:[#allocation2 + $0x48] sm:$0xff] %vm15_vm1, %v1748_v63  ;;  %v2946_v45 = vpop.f32.mrb[56].mxu1 }
 0x14f   :  { %v2163_v38 = vadd.f32 %v2946_v45, %v1773_v52  ;;  %v2098_v56 = vpop.f32.mrb[57].mxu1 }
 0x150   :  { %v1571_v4 = vld [vmem:[#allocation2 + $0x70] sm:$0xff]  ;;  %v2161_v7 = vadd.f32 %v2098_v56, %v1771_v48  ;;  %v2947_v2 = vpop.f32.mrb[58].mxu1  ;;  %v2964_v30 = vpop.f32.mrb[56].mxu0 }
 0x151   :  { %v1753_v49 = vadd.f32 %v2940_v0, %v1571_v4  ;;  %2179 = vst.msk [vmem:[#allocation2 + $0x10] sm:$0xff] %vm15_vm1, %v2163_v38  ;;  %v1569_v15 = vld [vmem:[#allocation2 + $0x60] sm:$0xff]  ;;  %v2164_v32 = vadd.f32 %v2947_v2, %v1774_v9  ;;  %v2101_v42 = vpop.f32.mrb[59].mxu1  ;;  %v2329_v50 = vpop.f32.mrb[57].mxu0 }
 0x152   :  { %v1751_v23 = vadd.f32 %v1724_v35, %v1569_v15  ;;  %2177 = vst.msk [vmem:[#allocation2] sm:$0xff] %vm15_vm1, %v2161_v7  ;;  %v1572_v12 = vld [vmem:[#allocation2 + $0x78] sm:$0xff]  ;;  %v2162_v59 = vadd.f32 %v2101_v42, %v1772_v8  ;;  %v2965_v61 = vpop.f32.mrb[58].mxu0  ;;  %v1781_v62 = vld [vmem:[#allocation2 + $0x50] sm:$0xff] }
 0x153   :  { %1769 = vst.msk [vmem:[#allocation2 + $0x70] sm:$0xff] %vm15_vm1, %v1753_v49  ;;  %v1754_v1 = vadd.f32 %v2941_v27, %v1572_v12  ;;  %2180 = vst.msk [vmem:[#allocation2 + $0x18] sm:$0xff] %vm15_vm1, %v2164_v32  ;;  %v1570_v5 = vld [vmem:[#allocation2 + $0x68] sm:$0xff]  ;;  %v2332_v41 = vpop.f32.mrb[59].mxu0  ;;  %v1779_v53 = vld [vmem:[#allocation2 + $0x40] sm:$0xff] }
 0x154   :  { %1767 = vst.msk [vmem:[#allocation2 + $0x60] sm:$0xff] %vm15_vm1, %v1751_v23  ;;  %v1752_v54 = vadd.f32 %v1727_v60, %v1570_v5  ;;  %2178 = vst.msk [vmem:[#allocation2 + $0x8] sm:$0xff] %vm15_vm1, %v2162_v59  ;;  %v1782_v39 = vld [vmem:[#allocation2 + $0x58] sm:$0xff] }
 0x155   :  { %1770 = vst.msk [vmem:[#allocation2 + $0x78] sm:$0xff] %vm15_vm1, %v1754_v1  ;;  %v1780_v60 = vld [vmem:[#allocation2 + $0x48] sm:$0xff] }
 0x156   :  { %1768 = vst.msk [vmem:[#allocation2 + $0x68] sm:$0xff] %vm15_vm1, %v1752_v54  ;;  %v2950_v25 = vpop.f32.mrb[60].mxu1 }
 0x157   :  { %v2167_v17 = vadd.f32 %v2950_v25, %v1777_v58  ;;  %v2114_v10 = vpop.f32.mrb[61].mxu1 }
 0x158   :  { %v2212_v43 = vld [vmem:[#allocation2 + $0x10] sm:$0xff]  ;;  %v2165_v37 = vadd.f32 %v2114_v10, %v1775_v13  ;;  %v2951_v19 = vpop.f32.mrb[62].mxu1  ;;  %v2968_v47 = vpop.f32.mrb[60].mxu0 }
 0x159   :  { %2183 = vst.msk [vmem:[#allocation2 + $0x30] sm:$0xff] %vm15_vm1, %v2167_v17  ;;  %v2394_v21 = vadd.f32 %v2964_v30, %v2212_v43  ;;  %v2210_v55 = vld [vmem:[#allocation2] sm:$0xff]  ;;  %v2168_v6 = vadd.f32 %v2951_v19, %v1778_v46  ;;  %v2117_v36 = vpop.f32.mrb[63].mxu1  ;;  %v2345_v11 = vpop.f32.mrb[61].mxu0 }
 0x15a   :  { %2181 = vst.msk [vmem:[#allocation2 + $0x20] sm:$0xff] %vm15_vm1, %v2165_v37  ;;  %v2392_v14 = vadd.f32 %v2329_v50, %v2210_v55  ;;  %v2213_v26 = vld [vmem:[#allocation2 + $0x18] sm:$0xff]  ;;  %v2166_v31 = vadd.f32 %v2117_v36, %v1776_v22  ;;  %v2969_v33 = vpop.f32.mrb[62].mxu0 }
 0x15b   :  { %2410 = vst.msk [vmem:[#allocation2 + $0x10] sm:$0xff] %vm15_vm1, %v2394_v21  ;;  %2184 = vst.msk [vmem:[#allocation2 + $0x38] sm:$0xff] %vm15_vm1, %v2168_v6  ;;  %v2395_v24 = vadd.f32 %v2965_v61, %v2213_v26  ;;  %v2211_v18 = vld [vmem:[#allocation2 + $0x8] sm:$0xff]  ;;  %v2348_v20 = vpop.f32.mrb[63].mxu0  ;;  %v1785_v61 = vld [vmem:[#allocation2 + $0x70] sm:$0xff] }
 0x15c   :  { %2408 = vst.msk [vmem:[#allocation2] sm:$0xff] %vm15_vm1, %v2392_v14  ;;  %2182 = vst.msk [vmem:[#allocation2 + $0x28] sm:$0xff] %vm15_vm1, %v2166_v31  ;;  %v2393_v51 = vadd.f32 %v2332_v41, %v2211_v18  ;;  %v1783_v58 = vld [vmem:[#allocation2 + $0x60] sm:$0xff]  ;;  %v1786_v37 = vld [vmem:[#allocation2 + $0x78] sm:$0xff] }
 0x15d   :  { %2411 = vst.msk [vmem:[#allocation2 + $0x18] sm:$0xff] %vm15_vm1, %v2395_v24  ;;  %v1784_v22 = vld [vmem:[#allocation2 + $0x68] sm:$0xff] }
 0x15e   :  { %2409 = vst.msk [vmem:[#allocation2 + $0x8] sm:$0xff] %vm15_vm1, %v2393_v51  ;;  %v2954_v0 = vpop.f32.mrb[64].mxu1 }
 0x15f   :  { %v2171_v3 = vadd.f32 %v2954_v0, %v1781_v62  ;;  %v2130_v16 = vpop.f32.mrb[65].mxu1 }
 0x160   :  { %v2216_v34 = vld [vmem:[#allocation2 + $0x30] sm:$0xff]  ;;  %v2169_v35 = vadd.f32 %v2130_v16, %v1779_v53  ;;  %v2955_v29 = vpop.f32.mrb[66].mxu1  ;;  %v2972_v57 = vpop.f32.mrb[64].mxu0 }
 0x161   :  { %2187 = vst.msk [vmem:[#allocation2 + $0x50] sm:$0xff] %vm15_vm1, %v2171_v3  ;;  %v2398_v27 = vadd.f32 %v2968_v47, %v2216_v34  ;;  %v2214_v44 = vld [vmem:[#allocation2 + $0x20] sm:$0xff]  ;;  %v2172_v40 = vadd.f32 %v2955_v29, %v1782_v39  ;;  %v2133_v63 = vpop.f32.mrb[67].mxu1  ;;  %v2361_v52 = vpop.f32.mrb[65].mxu0 }
 0x162   :  { %v2426_v45 = vld [vmem:[#allocation2 + $0x10] sm:$0xff]  ;;  %2185 = vst.msk [vmem:[#allocation2 + $0x40] sm:$0xff] %vm15_vm1, %v2169_v35  ;;  %v2396_v38 = vadd.f32 %v2345_v11, %v2214_v44  ;;  %v2217_v48 = vld [vmem:[#allocation2 + $0x38] sm:$0xff]  ;;  %v2170_v56 = vadd.f32 %v2133_v63, %v1780_v60  ;;  %v2973_v4 = vpop.f32.mrb[66].mxu0 }
 0x163   :  { %v2449_v7 = vadd.f32 %v4016_v28, %v2426_v45  ;;  %v2424_v9 = vld [vmem:[#allocation2] sm:$0xff]  ;;  %2414 = vst.msk [vmem:[#allocation2 + $0x30] sm:$0xff] %vm15_vm1, %v2398_v27  ;;  %2188 = vst.msk [vmem:[#allocation2 + $0x58] sm:$0xff] %vm15_vm1, %v2172_v40  ;;  %v2399_v2 = vadd.f32 %v2969_v33, %v2217_v48  ;;  %v2215_v30 = vld [vmem:[#allocation2 + $0x28] sm:$0xff]  ;;  %v2364_v49 = vpop.f32.mrb[67].mxu0 }
 0x164   :  { %v2447_v15 = vadd.f32 %v4016_v28, %v2424_v9  ;;  %v2427_v32 = vld [vmem:[#allocation2 + $0x18] sm:$0xff]  ;;  %2412 = vst.msk [vmem:[#allocation2 + $0x20] sm:$0xff] %vm15_vm1, %v2396_v38  ;;  %2186 = vst.msk [vmem:[#allocation2 + $0x48] sm:$0xff] %vm15_vm1, %v2170_v56  ;;  %v2397_v8 = vadd.f32 %v2348_v20, %v2215_v30 }
 0x165   :  { %v2465_v42 = vmax.f32 %v2449_v7, 0.0  ;;  %v2450_v50 = vadd.f32 %v4016_v28, %v2427_v32  ;;  %v2425_v23 = vld [vmem:[#allocation2 + $0x8] sm:$0xff]  ;;  %2415 = vst.msk [vmem:[#allocation2 + $0x38] sm:$0xff] %vm15_vm1, %v2399_v2 }
 0x166   :  { %v2463_v12 = vmax.f32 %v2447_v15, 0.0  ;;  %v2448_v59 = vadd.f32 %v4016_v28, %v2425_v23  ;;  %2413 = vst.msk [vmem:[#allocation2 + $0x28] sm:$0xff] %vm15_vm1, %v2397_v8  ;;  %v2958_v1 = vpop.f32.mrb[68].mxu1 }
 0x167   :  { %v2481_v5 = vpack.c.bf16 %v2465_v42, %v2465_v42  ;;  %v2466_v41 = vmax.f32 %v2450_v50, 0.0  ;;  %v2175_v54 = vadd.f32 %v2958_v1, %v1785_v61  ;;  %v2146_v25 = vpop.f32.mrb[69].mxu1 }
 0x168   :  { %v2479_v17 = vpack.c.bf16 %v2463_v12, %v2463_v12  ;;  %v2464_v13 = vmax.f32 %v2448_v59, 0.0  ;;  %v2220_v10 = vld [vmem:[#allocation2 + $0x50] sm:$0xff]  ;;  %v2173_v43 = vadd.f32 %v2146_v25, %v1783_v58  ;;  %v2959_v46 = vpop.f32.mrb[70].mxu1  ;;  %v2976_v19 = vpop.f32.mrb[68].mxu0 }
 0x169   :  { %2498 = vst.msk [vmem:[%s4121_s3 + $0x8] sm:$0xf] %vm2495_vm5, %v2481_v5  ;;  %v2482_v47 = vpack.c.bf16 %v2466_v41, %v2466_v41  ;;  %v2402_v21 = vadd.f32 %v2972_v57, %v2220_v10  ;;  %v2218_v55 = vld [vmem:[#allocation2 + $0x40] sm:$0xff]  ;;  %v2176_v6 = vadd.f32 %v2959_v46, %v1786_v37  ;;  %v2149_v36 = vpop.f32.mrb[71].mxu1  ;;  %v2377_v11 = vpop.f32.mrb[69].mxu0 }
 0x16a   :  { %2191 = vst.msk [vmem:[#allocation2 + $0x70] sm:$0xff] %vm15_vm1, %v2175_v54  ;;  %v2480_v14 = vpack.c.bf16 %v2464_v13, %v2464_v13  ;;  %v2430_v26 = vld [vmem:[#allocation2 + $0x30] sm:$0xff]  ;;  %2189 = vst.msk [vmem:[#allocation2 + $0x60] sm:$0xff] %vm15_vm1, %v2173_v43  ;;  %v2400_v31 = vadd.f32 %v2361_v52, %v2218_v55  ;;  %v2221_v33 = vld [vmem:[#allocation2 + $0x58] sm:$0xff]  ;;  %v2174_v24 = vadd.f32 %v2149_v36, %v1784_v22  ;;  %v2977_v18 = vpop.f32.mrb[70].mxu0 }
 0x16b   :  { %2496 = vst.msk [vmem:[%s4121_s3] sm:$0xf] %vm2495_vm5, %v2479_v17  ;;  %2499 = vst.msk [vmem:[%s4121_s3 + $0xc] sm:$0xf] %vm2495_vm5, %v2482_v47  ;;  %v2453_v20 = vadd.f32 %v4016_v28, %v2430_v26  ;;  %v2428_v51 = vld [vmem:[#allocation2 + $0x20] sm:$0xff]  ;;  %v2403_v62 = vadd.f32 %v2973_v4, %v2221_v33  ;;  %v2219_v0 = vld [vmem:[#allocation2 + $0x48] sm:$0xff] }
 0x16c   :  { %2418 = vst.msk [vmem:[#allocation2 + $0x50] sm:$0xff] %vm15_vm1, %v2402_v21  ;;  %2192 = vst.msk [vmem:[#allocation2 + $0x78] sm:$0xff] %vm15_vm1, %v2176_v6  ;;  %v2380_v3 = vpop.f32.mrb[71].mxu0  ;;  %v2451_v53 = vadd.f32 %v4016_v28, %v2428_v51  ;;  %v2431_v16 = vld [vmem:[#allocation2 + $0x38] sm:$0xff]  ;;  %v2401_v34 = vadd.f32 %v2364_v49, %v2219_v0 }
 0x16d   :  { %2497 = vst.msk [vmem:[%s4121_s3 + $0x4] sm:$0xf] %vm2495_vm5, %v2480_v14  ;;  %v2469_v35 = vmax.f32 %v2453_v20, 0.0  ;;  %v2454_v39 = vadd.f32 %v4016_v28, %v2431_v16  ;;  %v2429_v29 = vld [vmem:[#allocation2 + $0x28] sm:$0xff] }
 0x16e   :  { %2416 = vst.msk [vmem:[#allocation2 + $0x40] sm:$0xff] %vm15_vm1, %v2400_v31  ;;  %2190 = vst.msk [vmem:[#allocation2 + $0x68] sm:$0xff] %vm15_vm1, %v2174_v24  ;;  %v2467_v57 = vmax.f32 %v2451_v53, 0.0  ;;  %v2452_v27 = vadd.f32 %v4016_v28, %v2429_v29 }
 0x16f   :  { %2419 = vst.msk [vmem:[#allocation2 + $0x58] sm:$0xff] %vm15_vm1, %v2403_v62  ;;  %2417 = vst.msk [vmem:[#allocation2 + $0x48] sm:$0xff] %vm15_vm1, %v2401_v34  ;;  %v2485_v44 = vpack.c.bf16 %v2469_v35, %v2469_v35  ;;  %v2470_v40 = vmax.f32 %v2454_v39, 0.0 }
 0x170   :  { %v2483_v60 = vpack.c.bf16 %v2467_v57, %v2467_v57  ;;  %v2468_v63 = vmax.f32 %v2452_v27, 0.0 }
 0x171   :  { %v2224_v52 = vld [vmem:[#allocation2 + $0x70] sm:$0xff]  ;;  %2502 = vst.msk [vmem:[%s4121_s3 + $0x18] sm:$0xf] %vm2495_vm5, %v2485_v44  ;;  %v2486_v45 = vpack.c.bf16 %v2470_v40, %v2470_v40  ;;  %v2222_v48 = vld [vmem:[#allocation2 + $0x60] sm:$0xff] }
 0x172   :  { %v2406_v38 = vadd.f32 %v2976_v19, %v2224_v52  ;;  %2500 = vst.msk [vmem:[%s4121_s3 + $0x10] sm:$0xf] %vm2495_vm5, %v2483_v60  ;;  %v2484_v56 = vpack.c.bf16 %v2468_v63, %v2468_v63  ;;  %v2404_v7 = vadd.f32 %v2377_v11, %v2222_v48 }
 0x173   :  { %v2434_v4 = vld [vmem:[#allocation2 + $0x50] sm:$0xff]  ;;  %v2225_v9 = vld [vmem:[#allocation2 + $0x78] sm:$0xff]  ;;  %2503 = vst.msk [vmem:[%s4121_s3 + $0x1c] sm:$0xf] %vm2495_vm5, %v2486_v45 }
 0x174   :  { %v2457_v2 = vadd.f32 %v4016_v28, %v2434_v4  ;;  %2422 = vst.msk [vmem:[#allocation2 + $0x70] sm:$0xff] %vm15_vm1, %v2406_v38  ;;  %v2407_v49 = vadd.f32 %v2977_v18, %v2225_v9  ;;  %2420 = vst.msk [vmem:[#allocation2 + $0x60] sm:$0xff] %vm15_vm1, %v2404_v7 }
 0x175   :  { %v2432_v30 = vld [vmem:[#allocation2 + $0x40] sm:$0xff]  ;;  %v2223_v15 = vld [vmem:[#allocation2 + $0x68] sm:$0xff]  ;;  %2501 = vst.msk [vmem:[%s4121_s3 + $0x14] sm:$0xf] %vm2495_vm5, %v2484_v56 }
 0x176   :  { %v2455_v32 = vadd.f32 %v4016_v28, %v2432_v30  ;;  %v2435_v8 = vld [vmem:[#allocation2 + $0x58] sm:$0xff]  ;;  %v2405_v42 = vadd.f32 %v2380_v3, %v2223_v15  ;;  %v2473_v50 = vmax.f32 %v2457_v2, 0.0  ;;  %v2433_v12 = vld [vmem:[#allocation2 + $0x48] sm:$0xff]  ;;  %2423 = vst.msk [vmem:[#allocation2 + $0x78] sm:$0xff] %vm15_vm1, %v2407_v49 }
 0x177   :  { %v2458_v23 = vadd.f32 %v4016_v28, %v2435_v8  ;;  %v2456_v61 = vadd.f32 %v4016_v28, %v2433_v12 }
 0x178   :  { %v2471_v59 = vmax.f32 %v2455_v32, 0.0  ;;  %2421 = vst.msk [vmem:[#allocation2 + $0x68] sm:$0xff] %vm15_vm1, %v2405_v42  ;;  %v2489_v1 = vpack.c.bf16 %v2473_v50, %v2473_v50 }
 0x179   :  { %v2474_v5 = vmax.f32 %v2458_v23, 0.0  ;;  %v2472_v54 = vmax.f32 %v2456_v61, 0.0 }
 0x17a   :  { %v2487_v41 = vpack.c.bf16 %v2471_v59, %v2471_v59  ;;  %2506 = vst.msk [vmem:[%s4121_s3 + $0x28] sm:$0xf] %vm2495_vm5, %v2489_v1 }
 0x17b   :  { %v2490_v58 = vpack.c.bf16 %v2474_v5, %v2474_v5  ;;  %v2488_v25 = vpack.c.bf16 %v2472_v54, %v2472_v54  ;;  %v2438_v17 = vld [vmem:[#allocation2 + $0x70] sm:$0xff]  ;;  %v2436_v10 = vld [vmem:[#allocation2 + $0x60] sm:$0xff] }
 0x17c   :  { %2504 = vst.msk [vmem:[%s4121_s3 + $0x20] sm:$0xf] %vm2495_vm5, %v2487_v41  ;;  %v2461_v13 = vadd.f32 %v4016_v28, %v2438_v17  ;;  %v2459_v43 = vadd.f32 %v4016_v28, %v2436_v10 }
 0x17d   :  { %2507 = vst.msk [vmem:[%s4121_s3 + $0x2c] sm:$0xf] %vm2495_vm5, %v2490_v58  ;;  %2505 = vst.msk [vmem:[%s4121_s3 + $0x24] sm:$0xf] %vm2495_vm5, %v2488_v25  ;;  %v2439_v37 = vld [vmem:[#allocation2 + $0x78] sm:$0xff] }
 0x17e   :  { %v2477_v46 = vmax.f32 %v2461_v13, 0.0  ;;  %v2462_v19 = vadd.f32 %v4016_v28, %v2439_v37  ;;  %v2475_v21 = vmax.f32 %v2459_v43, 0.0 }
 0x17f   :  { %v2437_v47 = vld [vmem:[#allocation2 + $0x68] sm:$0xff] }
 0x180   :  { %v2460_v55 = vadd.f32 %v4016_v28, %v2437_v47  ;;  %v2493_v6 = vpack.c.bf16 %v2477_v46, %v2477_v46  ;;  %v2478_v22 = vmax.f32 %v2462_v19, 0.0  ;;  %v2491_v36 = vpack.c.bf16 %v2475_v21, %v2475_v21 }
 0x182   :  { %v2476_v11 = vmax.f32 %v2460_v55, 0.0  ;;  %2510 = vst.msk [vmem:[%s4121_s3 + $0x38] sm:$0xf] %vm2495_vm5, %v2493_v6  ;;  %v2494_v14 = vpack.c.bf16 %v2478_v22, %v2478_v22  ;;  %2508 = vst.msk [vmem:[%s4121_s3 + $0x30] sm:$0xf] %vm2495_vm5, %v2491_v36 }
 0x184   :  { %v2492_v26 = vpack.c.bf16 %v2476_v11, %v2476_v11  ;;  %2511 = vst.msk [vmem:[%s4121_s3 + $0x3c] sm:$0xf] %vm2495_vm5, %v2494_v14 }
 0x186   :  { %2509 = vst.msk [vmem:[%s4121_s3 + $0x34] sm:$0xf] %vm2495_vm5, %v2492_v26 }

</bundles_post_ra>
